<compile_context>
chip_gen: v6e
topology: v6e:2x2x1
jax: 0.10.0
libtpu: 0.0.40
codegen_flags: <defaults>
</compile_context>

<pallas_src>
import functools

import jax
import jax.numpy as jnp
from jax.experimental import pallas as pl
from jax.experimental.pallas import tpu as pltpu


_MIN_PALLAS_BYTES = 1 << 19       # below ~512 KiB, fused XLA elementwise wins
_TARGET_BLOCK_BYTES = 2 << 20     # ~2 MiB blocks: ~85%+ of HBM roofline,
                                  # 4x buffered (in+out, double-buffer) = 8 MiB
                                  # VMEM -> safe even on v7x (64 MiB physical)
_LANE = 128


# ----------------------------- kernels ------------------------------------ #

def _heaviside_kernel(x_ref, o_ref):
    # One compare + one select/cast per vreg; purely HBM-bandwidth bound.
    o_ref[...] = (x_ref[...] >= 0).astype(o_ref.dtype)


def _softsign_primitive_kernel(x_ref, o_ref, *, alpha):
    ax = x_ref[...].astype(jnp.float32) * alpha
    o_ref[...] = (0.5 * (ax / (1.0 + jnp.abs(ax)) + 1.0)).astype(o_ref.dtype)


# ----------------------------- tiling wrapper ------------------------------ #

def _sublanes_for(dtype):
    # Native sublane packing: 8 for 4-byte, 16 for 2-byte, 32 for 1-byte dtypes.
    itemsize = jnp.dtype(dtype).itemsize
    return max(8, 32 // itemsize)


def _choose_lane(n):
    # Largest multiple-of-128 divisor of n (lane-dense, unmasked stores).
    for lane in (1024, 512, 256, 128):
        if n % lane == 0:
            return lane
    return None


def _elementwise_pallas_2d(kernel, slab):
    rows, lane = slab.shape
    itemsize = jnp.dtype(slab.dtype).itemsize
    sub = _sublanes_for(slab.dtype)
    target_rows = max(sub, (_TARGET_BLOCK_BYTES // (lane * itemsize)) // sub * sub)
    if rows <= target_rows:
        block_rows = rows            # full extent -> always a legal block dim
    else:
        block_rows = target_rows     # multiple of native sublane packing
    grid = (pl.cdiv(rows, block_rows),)   # ragged last block handled by Pallas

    return pl.pallas_call(
        kernel,
        out_shape=jax.ShapeDtypeStruct(slab.shape, slab.dtype),
        grid_spec=pltpu.PrefetchScalarGridSpec(
            num_scalar_prefetch=0,
            grid=grid,
            in_specs=[pl.BlockSpec((block_rows, lane), lambda i: (i, 0))],
            out_specs=pl.BlockSpec((block_rows, lane), lambda i: (i, 0)),
        ),
        compiler_params=pltpu.CompilerParams(
            # Single streaming axis; "parallel" lets v7x shard it across both
            # TensorCores (no-op on single-TC v5e/v6e).
            dimension_semantics=("parallel",),
        ),
    )(slab)


def _elementwise_pallas(kernel, jnp_fallback, x):
    orig_shape = x.shape
    n = x.size
    if n == 0 or n * jnp.dtype(x.dtype).itemsize < _MIN_PALLAS_BYTES:
        # pallas_call launch/pipeline setup dominates tiny tensors.
        return jnp_fallback(x)

    flat = x.reshape(-1)
    lane = _choose_lane(n)
    if lane is None:
        # Ragged total size: pad to a lane multiple, run, slice.  Costs one
        # extra HBM pass; only hit when n is not a multiple of 128.
        n_pad = pl.cdiv(n, _LANE) * _LANE
        slab = jnp.pad(flat, (0, n_pad - n)).reshape(n_pad // _LANE, _LANE)
        out = _elementwise_pallas_2d(kernel, slab)
        return out.reshape(-1)[:n].reshape(orig_shape)

    # Common path: no pad, no slice -> exactly 2N bytes of HBM traffic.
    slab = flat.reshape(n // lane, lane)
    out = _elementwise_pallas_2d(kernel, slab)
    return out.reshape(orig_shape)


# ----------------------------- public ops ---------------------------------- #

def heaviside_pallas(x):
    """heaviside(x) = (x >= 0).astype(x.dtype), computed in a Pallas kernel."""
    return _elementwise_pallas(
        _heaviside_kernel,
        lambda v: (v >= 0).astype(v.dtype),
        x,
    )


def softsign_primitive_pallas(x, alpha):
    """(softsign(alpha * x) + 1) / 2, computed in a Pallas kernel."""
    alpha = float(alpha)
    kernel = functools.partial(_softsign_primitive_kernel, alpha=alpha)

    def fallback(v):
        av = v.astype(jnp.float32) * alpha
        return (0.5 * (av / (1.0 + jnp.abs(av)) + 1.0)).astype(v.dtype)

    return _elementwise_pallas(kernel, fallback, x)


class SoftSign:
    """JAX/Pallas port of spikingjelly.clock_driven.surrogate.SoftSign (forward only)."""

    def __init__(self, alpha=2.0, spiking=True):
        assert alpha > 0, 'alpha must be lager than 0'
        self.alpha = alpha
        self.spiking = spiking

    def __call__(self, x):
        return self.forward(x)

    def forward(self, x):
        if self.spiking:
            # Spiking path: forward is heaviside; the soft-sign shape only
            # defines the surrogate *gradient*.
            # TODO(synk): surrogate backward (custom_vjp with soft-sign grad) not implemented; forward only.
            return heaviside_pallas(x)
        return softsign_primitive_pallas(x, self.alpha)


# ----------------------------- self test ----------------------------------- #

if __name__ == "__main__":
    key = jax.random.PRNGKey(0)
    k1, k2, k3, k4 = jax.random.split(key, 4)

    module = SoftSign(alpha=2.0, spiking=True)

    # 1) Small NCHW input (module-sized): fused-XLA fast path.
    x_small = jax.random.normal(k1, (2, 4, 16, 16), dtype=jnp.float32)
    y_small = jax.block_until_ready(module(x_small))
    assert y_small.shape == x_small.shape and y_small.dtype == x_small.dtype
    assert bool(jnp.all(y_small == (x_small >= 0).astype(x_small.dtype)))

    # 2) Larger f32 input: exercises the Pallas kernel (multi-block grid,
    #    (512, 1024) = 2 MiB blocks, no pad / no slice).
    x_big = jax.random.normal(k2, (4, 4, 256, 256), dtype=jnp.float32)
    y_big = jax.block_until_ready(module(x_big))
    assert y_big.shape == x_big.shape and y_big.dtype == x_big.dtype
    assert bool(jnp.all(y_big == (x_big >= 0).astype(x_big.dtype)))

    # 3) bf16 input: exercises dtype-aware sublane tiling.
    x_bf16 = jax.random.normal(k3, (4, 4, 256, 256), dtype=jnp.bfloat16)
    y_bf16 = jax.block_until_ready(module(x_bf16))
    assert y_bf16.dtype == jnp.bfloat16
    assert bool(jnp.all(y_bf16 == (x_bf16 >= 0).astype(x_bf16.dtype)))

    # 4) Ragged total size: exercises the pad fallback + masked last block.
    x_ragged = jax.random.normal(k4, (1, 1, 999, 1000), dtype=jnp.float32)
    y_ragged = jax.block_until_ready(heaviside_pallas(x_ragged))
    assert y_ragged.shape == x_ragged.shape
    assert bool(jnp.all(y_ragged == (x_ragged >= 0).astype(x_ragged.dtype)))

    # 5) Non-spiking primitive-function path.
    module_ns = SoftSign(alpha=2.0, spiking=False)
    y_ns = jax.block_until_ready(module_ns(x_big))
    ref_ns = (jax.nn.soft_sign(x_big * 2.0) + 1.0) / 2.0
    assert bool(jnp.allclose(y_ns, ref_ns, rtol=1e-6, atol=1e-6))

    print("KERNEL_OK")
</pallas_src>

<mosaic_0001>
module attributes {stable_mosaic.version = 11 : i64} {
  func.func @_heaviside_kernel(%arg0: i32, %arg1: memref<512x1024xf32, #tpu.memory_space<vmem>>, %arg2: memref<512x1024xf32, #tpu.memory_space<vmem>>) attributes {dimension_semantics = [#tpu.dimension_semantics<parallel>], iteration_bounds = array<i64: 2>, scalar_prefetch = 0 : i64, scratch_operands = 0 : i64, tpu.core_type = #tpu.core_type<tc>, window_params = [{transform_indices = @transform_0, window_bounds = array<i64: 512, 1024>}, {transform_indices = @transform_1, window_bounds = array<i64: 512, 1024>}]} {
    %c0 = arith.constant 0 : index
    %c0_0 = arith.constant 0 : index
    %0 = vector.load %arg1[%c0, %c0_0] : memref<512x1024xf32, #tpu.memory_space<vmem>>, vector<512x1024xf32>
    %cst = arith.constant 0.000000e+00 : f32
    %1 = vector.broadcast %cst : f32 to vector<512x1024xf32>
    %2 = arith.cmpf oge, %0, %1 : vector<512x1024xf32>
    %3 = arith.extui %2 : vector<512x1024xi1> to vector<512x1024xi32>
    %4 = arith.sitofp %3 : vector<512x1024xi32> to vector<512x1024xf32>
    %c0_1 = arith.constant 0 : index
    %c0_2 = arith.constant 0 : index
    %5 = vector.load %arg2[%c0_1, %c0_2] : memref<512x1024xf32, #tpu.memory_space<vmem>>, vector<512x1024xf32>
    tpu.vector_store %arg2[%c0_1, %c0_2], %4 {strides = array<i32>} : memref<512x1024xf32, #tpu.memory_space<vmem>>, vector<512x1024xf32>,
    return
  }
  func.func @transform_0(%arg0: i32) -> (i32, i32) {
    %c0_i32 = arith.constant 0 : i32
    %c0_i32_0 = arith.constant 0 : i32
    return %arg0, %c0_i32 : i32, i32
  }
  func.func @transform_1(%arg0: i32) -> (i32, i32) {
    %c0_i32 = arith.constant 0 : i32
    %c0_i32_0 = arith.constant 0 : i32
    return %arg0, %c0_i32 : i32, i32
  }
}

</mosaic_0001>

<bundles_post_ra>
// kernel: tpu_custom_call.1
= control target key start
LH: loop header
LB: loop body
LE: loop exit
PB: predicated region body
PF: predicated region fallthrough
CT: control target
= control target key end

     0   :  { %6 = vsyncpa [#allocation3], 0  ;;  %s5175_s0 = inlined_call_operand.hbm [shape: f32[1024,1024], index: 0, kind: input, shape index: {}]   ;;  %s5176_s1 = inlined_call_operand.hbm [shape: f32[1024,1024], index: 1, kind: output, shape index: {}]  }
   0x1   :  { %8 = vsyncpa [#allocation3 + $0x1], 0 }
   0x2   :  { %9 = vsyncpa [#allocation4], 0 }
   0x3   :  { %11 = vsyncpa [#allocation4 + $0x1], 0  ;;  %s3480_s6 = smov 0   ;;  %s3482_s7 = smov 0  }
   0x4   :  { %s3484_s8 = smov 0   ;;  %s3486_s9 = smov 0  }
   0x5 LB: > { %s3501_s10 = sadd.s32 4294967295, %s3461_s9   ;;  %s2786_s11 = sadd.s32 4294967294, %s3461_s9   ;;  %s3461_s9 = sphi %s3486_s9, %s5191_s9   ;;  %s3457_s8 = sphi %s3484_s8, %s5190_s8   ;;  %s3453_s7 = sphi %s3482_s7, %s5189_s7   ;;  %s3449_s6 = sphi %s3480_s6, %s5188_s6  }
   0x6   : > { %s3505_s12 = sadd.s32 1, %s3461_s9   ;;  %s24_s13 = sadd.s32 1, %s3457_s8 }
   0x7   : > { %s21_s14 = ssub.s32 %s3461_s9, %s3505_s12  ;;  %p31_p0 = scmp.ne.s32.totalorder %s3457_s8, %s3453_s7 }
   0x8   : > { %p22_p1 = scmp.eq.s32.totalorder %s21_s14, 0  ;;  %p32_p2 = scmp.eq.s32.totalorder %s3461_s9, 0 }
   0x9   : > { %p37_p3 = scmp.ne.s32.totalorder %s3453_s7, %s3449_s6  ;;  %p38_p4 = scmp.eq.s32.totalorder %s3501_s10, 0 }
   0xa   : > { %s3517_s15 = scalar_select %p22_p1, %s3457_s8, %s24_s13  }
   0xb   : > { %p3519_p5 = por %p32_p2, %p31_p0  ;;  %p3523_p6 = por %p38_p4, %p37_p3 }
   0xc   : > { %p61_p7 = scmp.eq.s32.totalorder %s3501_s10, 1  ;;  %p67_p8 = scmp.eq.s32.totalorder %s2786_s11, 1 }
   0xd   : > { %s5180_s17 = scalar_select %p3523_p6, 1, 0 }
   0xe   : > { %p3330_p10 = scmp.lt.s32.totalorder %s3461_s9, 2  ;;  %p3530_p11 = por %p61_p7, %p31_p0 }
   0xf   : > { %p3534_p12 = por %p67_p8, %p37_p3  ;;  %s87_s20 = sand.u32 1, %s3457_s8  }
  0x10   : > { %s5181_s18 = scalar_select %p3530_p11, 1, 0 }
  0x11   : > { %s5182_s19 = scalar_select %p3534_p12, 1, 0 }
  0x12   : > { %s3315_s21 = sshll.u32 %s3461_s9, 16  ;;  %s2789_s22 = sshll.u32 %s87_s20, 12 }
  0x13   : > { %s3543_s25 = scalar_lea.hbm %s5175_s0, %s3315_s21  ;;  %s91_s26 = scalar_lea.vmem [#allocation2], %s2789_s22 }
  0x14   : > { %s99_s27 = sshll.u32 %s91_s26, 4  ;;  %p3547_p13 = pnand %p3330_p10, %p3519_p5  ;;  %s3551_s27 = int_to_ptr.vmem [resolvable:$true] %s99_s27 }
  0x15   : > { %s3553_s29 = scalar_lea.sflag [#allocation3], %s87_s20  ;;  %s3369_s30 = scalar_lea.hbm %s3543_s25, 65536 }
  0x16   : > { %p3370_p0 = scmp.ne.s32.totalorder %s3543_s25, %s3369_s30  ;;  %p3371_p1 = pneg %p3547_p13 }
  0x17   : > { %s3374_s4 = scalar_lea.hbm %s5175_s0, 131072  ;;  %p3375_p4 = scmp.lt.s32.totalorder %s3543_s25, %s5175_s0 }
  0x18   : > { %p3372_p2 = pnand %p3371_p1, %p3370_p0  ;;  %p3376_p5 = scmp.lt.s32.totalorder %s3374_s4, %s3369_s30 }
  0x1a   : > { %p3373_p3 = pneg %p3372_p2  ;;  %p3377_p7 = por %p3376_p5, %p3375_p4 }
  0x1c   : > { %p3378_p8 = pnand %p3377_p7, %p3373_p3 }
  0x1e   : > { %3381 = shalt.err (!%p3378_p8)
}
  0x1f   : > { %s3382_s13 = scalar_lea.vmem %s3551_s27, 65536  ;;  %s3463_s14 = smov [#allocation2]  }
  0x20   : > { %p3383_p10 = scmp.ne.s32.totalorder %s3551_s27, %s3382_s13  ;;  %s3387_s16 = sshll.u32 %s3463_s14, 4  ;;  %s3388_s16 = int_to_ptr.vmem [resolvable:$false] %s3387_s16 }
  0x21   : > { %s3389_s20 = scalar_lea.vmem %s3388_s16, 131072  ;;  %p3390_p2 = scmp.lt.s32.totalorder %s3551_s27, %s3388_s16 }
  0x22   : > { %p3385_p9 = pnand %p3383_p10, %p3371_p1  ;;  %p3391_p12 = scmp.lt.s32.totalorder %s3389_s20, %s3382_s13 }
  0x24   : > { %p3386_p0 = pneg %p3385_p9  ;;  %p3392_p11 = por %p3391_p12, %p3390_p2 }
  0x26   : > { %p3393_p6 = pnand %p3392_p11, %p3386_p0 }
  0x28   : > { %3396 = shalt.err (!%p3393_p6)
}
  0x29   : > { %s3464_s21 = smov 1024   ;;  %s3465_s22 = smov 64  }
  0x2a   : > { %3325 = dma.hbm_to_vmem [thread:$0]  (!%p3547_p13), %s3543_s25, 65536, %s3551_s27, %s3553_s29, %s3464_s21, %s3464_s21, %s3465_s22  }
  0x2b   : > { %p2793_p9 = scmp.ge.s32.totalorder %s3461_s9, 1  ;;  %p107_p1 = scmp.lt.s32.totalorder %s3461_s9, 3 }
  0x2d   : > { %p108_p3 = pnand %p2793_p9, %p107_p1 }
  0x2e   : > { %s3577_s23 = sand.u32 (!%p108_p3), 1, %s3453_s7   ;;  %p5184_p6 = scmp.ne.s32.totalorder (!%p108_p3), %s5180_s17, 0 }
  0x2f   : > { %111 = sbr.rel (%p108_p3) target bundleno = 418 (0x1a2), region = 24  ;;  %s2794_s24 = sshll.u32 (!%p108_p3), %s3577_s23, 12 }
  0x30   : > { %s114_s26 = scalar_lea.sflag (!%p108_p3), [#allocation3], %s3577_s23  ;;  %s3581_s30 = scalar_lea.vmem (!%p108_p3), [#allocation2], %s2794_s24 }
  0x34   : > { %3440 = dma.done.wait (%p5184_p6), %s114_s26, 65536  }
  0x35   : > { %3442 = vsyncadd (%p5184_p6), %s114_s26, 4294901760  ;;  %v138_v0 = vld [vmem:[%s3581_s30] sm:$0xff]  ;;  %v139_v1 = vld [vmem:[%s3581_s30 + $0x8] sm:$0xff]  ;;  %v3466_v6 = vmov 0.0   ;;  %s3598_s17 = scalar_lea.vmem [#allocation5], %s2794_s24  ;;  %s3317_s25 = sshll.u32 %s3501_s10, 16 }
  0x36   : > { %v140_v2 = vld [vmem:[%s3581_s30 + $0x10] sm:$0xff]  ;;  %vm650_vm0 = vcmp.ge.f32.partialorder %v138_v0, 0.0  ;;  %vm651_vm1 = vcmp.ge.f32.partialorder %v139_v1, 0.0  ;;  %v141_v3 = vld [vmem:[%s3581_s30 + $0x18] sm:$0xff]  ;;  %v142_v4 = vld [vmem:[%s3581_s30 + $0x20] sm:$0xff]  ;;  %s5124_s29 = scalar_lea.hbm %s5176_s1, %s3317_s25  ;;  %s2713_s2 = sshll.u32 %s3598_s17, 4  ;;  %s5131_s2 = int_to_ptr.vmem [resolvable:$true] %s2713_s2 }
  0x37   : > { %vm652_vm2 = vcmp.ge.f32.partialorder %v140_v2, 0.0  ;;  %v143_v5 = vld [vmem:[%s3581_s30 + $0x28] sm:$0xff]  ;;  %v2796_v7 = vsel %vm650_vm0, 1.0, %v3466_v6  ;;  %v2797_v8 = vsel %vm651_vm1, 1.0, %v3466_v6  ;;  %vm653_vm3 = vcmp.ge.f32.partialorder %v141_v3, 0.0  ;;  %v144_v10 = vld [vmem:[%s3581_s30 + $0x30] sm:$0xff] }
  0x38   : > { %v2798_v9 = vsel %vm652_vm2, 1.0, %v3466_v6  ;;  %v145_v11 = vld [vmem:[%s3581_s30 + $0x38] sm:$0xff]  ;;  %2186 = vst [vmem:[%s3598_s17] sm:$0xff] %v2796_v7  ;;  %2187 = vst [vmem:[%s3598_s17 + $0x8] sm:$0xff] %v2797_v8  ;;  %v2799_v12 = vsel %vm653_vm3, 1.0, %v3466_v6  ;;  %vm654_vm4 = vcmp.ge.f32.partialorder %v142_v4, 0.0  ;;  %vm655_vm5 = vcmp.ge.f32.partialorder %v143_v5, 0.0 }
  0x39   : > { %2188 = vst [vmem:[%s3598_s17 + $0x10] sm:$0xff] %v2798_v9  ;;  %vm656_vm6 = vcmp.ge.f32.partialorder %v144_v10, 0.0  ;;  %v146_v13 = vld [vmem:[%s3581_s30 + $0x40] sm:$0xff]  ;;  %v147_v14 = vld [vmem:[%s3581_s30 + $0x48] sm:$0xff]  ;;  %2189 = vst [vmem:[%s3598_s17 + $0x18] sm:$0xff] %v2799_v12  ;;  %v2800_v15 = vsel %vm654_vm4, 1.0, %v3466_v6 }
  0x3a   : > { %v2801_v16 = vsel %vm655_vm5, 1.0, %v3466_v6  ;;  %v2802_v17 = vsel %vm656_vm6, 1.0, %v3466_v6  ;;  %vm657_vm7 = vcmp.ge.f32.partialorder %v145_v11, 0.0  ;;  %v148_v18 = vld [vmem:[%s3581_s30 + $0x50] sm:$0xff]  ;;  %v149_v19 = vld [vmem:[%s3581_s30 + $0x58] sm:$0xff]  ;;  %2190 = vst [vmem:[%s3598_s17 + $0x20] sm:$0xff] %v2800_v15 }
  0x3b   : > { %2191 = vst [vmem:[%s3598_s17 + $0x28] sm:$0xff] %v2801_v16  ;;  %2192 = vst [vmem:[%s3598_s17 + $0x30] sm:$0xff] %v2802_v17  ;;  %v2803_v20 = vsel %vm657_vm7, 1.0, %v3466_v6  ;;  %vm658_vm8 = vcmp.ge.f32.partialorder %v146_v13, 0.0  ;;  %vm659_vm9 = vcmp.ge.f32.partialorder %v147_v14, 0.0  ;;  %vm660_vm10 = vcmp.ge.f32.partialorder %v148_v18, 0.0 }
  0x3c   : > { %v150_v21 = vld [vmem:[%s3581_s30 + $0x60] sm:$0xff]  ;;  %v151_v22 = vld [vmem:[%s3581_s30 + $0x68] sm:$0xff]  ;;  %2193 = vst [vmem:[%s3598_s17 + $0x38] sm:$0xff] %v2803_v20  ;;  %v2804_v23 = vsel %vm658_vm8, 1.0, %v3466_v6  ;;  %v2805_v24 = vsel %vm659_vm9, 1.0, %v3466_v6  ;;  %v2806_v25 = vsel %vm660_vm10, 1.0, %v3466_v6 }
  0x3d   : > { %vm661_vm11 = vcmp.ge.f32.partialorder %v149_v19, 0.0  ;;  %v152_v26 = vld [vmem:[%s3581_s30 + $0x70] sm:$0xff]  ;;  %v153_v27 = vld [vmem:[%s3581_s30 + $0x78] sm:$0xff]  ;;  %2194 = vst [vmem:[%s3598_s17 + $0x40] sm:$0xff] %v2804_v23  ;;  %2195 = vst [vmem:[%s3598_s17 + $0x48] sm:$0xff] %v2805_v24  ;;  %vm662_vm12 = vcmp.ge.f32.partialorder %v150_v21, 0.0 }
  0x3e   : > { %2196 = vst [vmem:[%s3598_s17 + $0x50] sm:$0xff] %v2806_v25  ;;  %v2807_v28 = vsel %vm661_vm11, 1.0, %v3466_v6  ;;  %vm663_vm13 = vcmp.ge.f32.partialorder %v151_v22, 0.0  ;;  %vm664_vm14 = vcmp.ge.f32.partialorder %v152_v26, 0.0  ;;  %v154_v29 = vld [vmem:[%s3581_s30 + $0x80] sm:$0xff]  ;;  %v155_v30 = vld [vmem:[%s3581_s30 + $0x88] sm:$0xff] }
  0x3f   : > { %2197 = vst [vmem:[%s3598_s17 + $0x58] sm:$0xff] %v2807_v28  ;;  %v2808_v31 = vsel %vm662_vm12, 1.0, %v3466_v6  ;;  %v2809_v32 = vsel %vm663_vm13, 1.0, %v3466_v6  ;;  %v2810_v33 = vsel %vm664_vm14, 1.0, %v3466_v6  ;;  %vm665_vm15 = vcmp.ge.f32.partialorder %v153_v27, 0.0  ;;  %v156_v34 = vld [vmem:[%s3581_s30 + $0x90] sm:$0xff] }
  0x40   : > { %v157_v35 = vld [vmem:[%s3581_s30 + $0x98] sm:$0xff]  ;;  %2198 = vst [vmem:[%s3598_s17 + $0x60] sm:$0xff] %v2808_v31  ;;  %2199 = vst [vmem:[%s3598_s17 + $0x68] sm:$0xff] %v2809_v32  ;;  %v2811_v36 = vsel %vm665_vm15, 1.0, %v3466_v6  ;;  %vm666_vm0 = vcmp.ge.f32.partialorder %v154_v29, 0.0  ;;  %vm667_vm1 = vcmp.ge.f32.partialorder %v155_v30, 0.0 }
  0x41   : > { %2200 = vst [vmem:[%s3598_s17 + $0x70] sm:$0xff] %v2810_v33  ;;  %vm668_vm2 = vcmp.ge.f32.partialorder %v156_v34, 0.0  ;;  %v158_v37 = vld [vmem:[%s3581_s30 + $0xa0] sm:$0xff]  ;;  %v159_v38 = vld [vmem:[%s3581_s30 + $0xa8] sm:$0xff]  ;;  %2201 = vst [vmem:[%s3598_s17 + $0x78] sm:$0xff] %v2811_v36  ;;  %v2812_v39 = vsel %vm666_vm0, 1.0, %v3466_v6 }
  0x42   : > { %v2813_v40 = vsel %vm667_vm1, 1.0, %v3466_v6  ;;  %v2814_v41 = vsel %vm668_vm2, 1.0, %v3466_v6  ;;  %vm669_vm3 = vcmp.ge.f32.partialorder %v157_v35, 0.0  ;;  %v160_v42 = vld [vmem:[%s3581_s30 + $0xb0] sm:$0xff]  ;;  %v161_v43 = vld [vmem:[%s3581_s30 + $0xb8] sm:$0xff]  ;;  %2202 = vst [vmem:[%s3598_s17 + $0x80] sm:$0xff] %v2812_v39 }
  0x43   : > { %2203 = vst [vmem:[%s3598_s17 + $0x88] sm:$0xff] %v2813_v40  ;;  %2204 = vst [vmem:[%s3598_s17 + $0x90] sm:$0xff] %v2814_v41  ;;  %v2815_v44 = vsel %vm669_vm3, 1.0, %v3466_v6  ;;  %vm670_vm4 = vcmp.ge.f32.partialorder %v158_v37, 0.0  ;;  %vm671_vm5 = vcmp.ge.f32.partialorder %v159_v38, 0.0  ;;  %vm672_vm6 = vcmp.ge.f32.partialorder %v160_v42, 0.0 }
  0x44   : > { %v162_v45 = vld [vmem:[%s3581_s30 + $0xc0] sm:$0xff]  ;;  %v163_v46 = vld [vmem:[%s3581_s30 + $0xc8] sm:$0xff]  ;;  %2205 = vst [vmem:[%s3598_s17 + $0x98] sm:$0xff] %v2815_v44  ;;  %v2816_v47 = vsel %vm670_vm4, 1.0, %v3466_v6  ;;  %v2817_v48 = vsel %vm671_vm5, 1.0, %v3466_v6  ;;  %v2818_v49 = vsel %vm672_vm6, 1.0, %v3466_v6 }
  0x45   : > { %vm673_vm7 = vcmp.ge.f32.partialorder %v161_v43, 0.0  ;;  %v164_v50 = vld [vmem:[%s3581_s30 + $0xd0] sm:$0xff]  ;;  %v165_v51 = vld [vmem:[%s3581_s30 + $0xd8] sm:$0xff]  ;;  %2206 = vst [vmem:[%s3598_s17 + $0xa0] sm:$0xff] %v2816_v47  ;;  %2207 = vst [vmem:[%s3598_s17 + $0xa8] sm:$0xff] %v2817_v48  ;;  %vm674_vm8 = vcmp.ge.f32.partialorder %v162_v45, 0.0 }
  0x46   : > { %2208 = vst [vmem:[%s3598_s17 + $0xb0] sm:$0xff] %v2818_v49  ;;  %v2819_v52 = vsel %vm673_vm7, 1.0, %v3466_v6  ;;  %vm675_vm9 = vcmp.ge.f32.partialorder %v163_v46, 0.0  ;;  %vm676_vm10 = vcmp.ge.f32.partialorder %v164_v50, 0.0  ;;  %v166_v53 = vld [vmem:[%s3581_s30 + $0xe0] sm:$0xff]  ;;  %v167_v54 = vld [vmem:[%s3581_s30 + $0xe8] sm:$0xff] }
  0x47   : > { %2209 = vst [vmem:[%s3598_s17 + $0xb8] sm:$0xff] %v2819_v52  ;;  %v2820_v55 = vsel %vm674_vm8, 1.0, %v3466_v6  ;;  %v2821_v56 = vsel %vm675_vm9, 1.0, %v3466_v6  ;;  %v2822_v57 = vsel %vm676_vm10, 1.0, %v3466_v6  ;;  %vm677_vm11 = vcmp.ge.f32.partialorder %v165_v51, 0.0  ;;  %v168_v58 = vld [vmem:[%s3581_s30 + $0xf0] sm:$0xff] }
  0x48   : > { %v169_v59 = vld [vmem:[%s3581_s30 + $0xf8] sm:$0xff]  ;;  %2210 = vst [vmem:[%s3598_s17 + $0xc0] sm:$0xff] %v2820_v55  ;;  %2211 = vst [vmem:[%s3598_s17 + $0xc8] sm:$0xff] %v2821_v56  ;;  %v2823_v60 = vsel %vm677_vm11, 1.0, %v3466_v6  ;;  %vm678_vm12 = vcmp.ge.f32.partialorder %v166_v53, 0.0  ;;  %vm679_vm13 = vcmp.ge.f32.partialorder %v167_v54, 0.0 }
  0x49   : > { %2212 = vst [vmem:[%s3598_s17 + $0xd0] sm:$0xff] %v2822_v57  ;;  %vm680_vm14 = vcmp.ge.f32.partialorder %v168_v58, 0.0  ;;  %v170_v61 = vld [vmem:[%s3581_s30 + $0x100] sm:$0xff]  ;;  %v171_v62 = vld [vmem:[%s3581_s30 + $0x108] sm:$0xff]  ;;  %2213 = vst [vmem:[%s3598_s17 + $0xd8] sm:$0xff] %v2823_v60  ;;  %v2824_v63 = vsel %vm678_vm12, 1.0, %v3466_v6 }
  0x4a   : > { %v2825_v0 = vsel %vm679_vm13, 1.0, %v3466_v6  ;;  %v2826_v1 = vsel %vm680_vm14, 1.0, %v3466_v6  ;;  %vm681_vm15 = vcmp.ge.f32.partialorder %v169_v59, 0.0  ;;  %v172_v2 = vld [vmem:[%s3581_s30 + $0x110] sm:$0xff]  ;;  %v173_v3 = vld [vmem:[%s3581_s30 + $0x118] sm:$0xff]  ;;  %2214 = vst [vmem:[%s3598_s17 + $0xe0] sm:$0xff] %v2824_v63 }
  0x4b   : > { %2215 = vst [vmem:[%s3598_s17 + $0xe8] sm:$0xff] %v2825_v0  ;;  %2216 = vst [vmem:[%s3598_s17 + $0xf0] sm:$0xff] %v2826_v1  ;;  %v2827_v4 = vsel %vm681_vm15, 1.0, %v3466_v6  ;;  %vm682_vm0 = vcmp.ge.f32.partialorder %v170_v61, 0.0  ;;  %vm683_vm1 = vcmp.ge.f32.partialorder %v171_v62, 0.0  ;;  %vm684_vm2 = vcmp.ge.f32.partialorder %v172_v2, 0.0 }
  0x4c   : > { %v174_v5 = vld [vmem:[%s3581_s30 + $0x120] sm:$0xff]  ;;  %v175_v7 = vld [vmem:[%s3581_s30 + $0x128] sm:$0xff]  ;;  %2217 = vst [vmem:[%s3598_s17 + $0xf8] sm:$0xff] %v2827_v4  ;;  %v2828_v8 = vsel %vm682_vm0, 1.0, %v3466_v6  ;;  %v2829_v9 = vsel %vm683_vm1, 1.0, %v3466_v6  ;;  %v2830_v10 = vsel %vm684_vm2, 1.0, %v3466_v6 }
  0x4d   : > { %vm685_vm3 = vcmp.ge.f32.partialorder %v173_v3, 0.0  ;;  %v176_v11 = vld [vmem:[%s3581_s30 + $0x130] sm:$0xff]  ;;  %v177_v12 = vld [vmem:[%s3581_s30 + $0x138] sm:$0xff]  ;;  %2218 = vst [vmem:[%s3598_s17 + $0x100] sm:$0xff] %v2828_v8  ;;  %2219 = vst [vmem:[%s3598_s17 + $0x108] sm:$0xff] %v2829_v9  ;;  %vm686_vm4 = vcmp.ge.f32.partialorder %v174_v5, 0.0 }
  0x4e   : > { %2220 = vst [vmem:[%s3598_s17 + $0x110] sm:$0xff] %v2830_v10  ;;  %v2831_v13 = vsel %vm685_vm3, 1.0, %v3466_v6  ;;  %vm687_vm5 = vcmp.ge.f32.partialorder %v175_v7, 0.0  ;;  %vm688_vm6 = vcmp.ge.f32.partialorder %v176_v11, 0.0  ;;  %v178_v14 = vld [vmem:[%s3581_s30 + $0x140] sm:$0xff]  ;;  %v179_v15 = vld [vmem:[%s3581_s30 + $0x148] sm:$0xff] }
  0x4f   : > { %2221 = vst [vmem:[%s3598_s17 + $0x118] sm:$0xff] %v2831_v13  ;;  %v2832_v16 = vsel %vm686_vm4, 1.0, %v3466_v6  ;;  %v2833_v17 = vsel %vm687_vm5, 1.0, %v3466_v6  ;;  %v2834_v18 = vsel %vm688_vm6, 1.0, %v3466_v6  ;;  %vm689_vm7 = vcmp.ge.f32.partialorder %v177_v12, 0.0  ;;  %v180_v19 = vld [vmem:[%s3581_s30 + $0x150] sm:$0xff] }
  0x50   : > { %v181_v20 = vld [vmem:[%s3581_s30 + $0x158] sm:$0xff]  ;;  %2222 = vst [vmem:[%s3598_s17 + $0x120] sm:$0xff] %v2832_v16  ;;  %2223 = vst [vmem:[%s3598_s17 + $0x128] sm:$0xff] %v2833_v17  ;;  %v2835_v21 = vsel %vm689_vm7, 1.0, %v3466_v6  ;;  %vm690_vm8 = vcmp.ge.f32.partialorder %v178_v14, 0.0  ;;  %vm691_vm9 = vcmp.ge.f32.partialorder %v179_v15, 0.0 }
  0x51   : > { %2224 = vst [vmem:[%s3598_s17 + $0x130] sm:$0xff] %v2834_v18  ;;  %vm692_vm10 = vcmp.ge.f32.partialorder %v180_v19, 0.0  ;;  %v182_v22 = vld [vmem:[%s3581_s30 + $0x160] sm:$0xff]  ;;  %v183_v23 = vld [vmem:[%s3581_s30 + $0x168] sm:$0xff]  ;;  %2225 = vst [vmem:[%s3598_s17 + $0x138] sm:$0xff] %v2835_v21  ;;  %v2836_v24 = vsel %vm690_vm8, 1.0, %v3466_v6 }
  0x52   : > { %v2837_v25 = vsel %vm691_vm9, 1.0, %v3466_v6  ;;  %v2838_v26 = vsel %vm692_vm10, 1.0, %v3466_v6  ;;  %vm693_vm11 = vcmp.ge.f32.partialorder %v181_v20, 0.0  ;;  %v184_v27 = vld [vmem:[%s3581_s30 + $0x170] sm:$0xff]  ;;  %v185_v28 = vld [vmem:[%s3581_s30 + $0x178] sm:$0xff]  ;;  %2226 = vst [vmem:[%s3598_s17 + $0x140] sm:$0xff] %v2836_v24 }
  0x53   : > { %2227 = vst [vmem:[%s3598_s17 + $0x148] sm:$0xff] %v2837_v25  ;;  %2228 = vst [vmem:[%s3598_s17 + $0x150] sm:$0xff] %v2838_v26  ;;  %v2839_v29 = vsel %vm693_vm11, 1.0, %v3466_v6  ;;  %vm694_vm12 = vcmp.ge.f32.partialorder %v182_v22, 0.0  ;;  %vm695_vm13 = vcmp.ge.f32.partialorder %v183_v23, 0.0  ;;  %vm696_vm14 = vcmp.ge.f32.partialorder %v184_v27, 0.0 }
  0x54   : > { %v186_v30 = vld [vmem:[%s3581_s30 + $0x180] sm:$0xff]  ;;  %v187_v31 = vld [vmem:[%s3581_s30 + $0x188] sm:$0xff]  ;;  %2229 = vst [vmem:[%s3598_s17 + $0x158] sm:$0xff] %v2839_v29  ;;  %v2840_v32 = vsel %vm694_vm12, 1.0, %v3466_v6  ;;  %v2841_v33 = vsel %vm695_vm13, 1.0, %v3466_v6  ;;  %v2842_v34 = vsel %vm696_vm14, 1.0, %v3466_v6 }
  0x55   : > { %vm697_vm15 = vcmp.ge.f32.partialorder %v185_v28, 0.0  ;;  %v188_v35 = vld [vmem:[%s3581_s30 + $0x190] sm:$0xff]  ;;  %v189_v36 = vld [vmem:[%s3581_s30 + $0x198] sm:$0xff]  ;;  %2230 = vst [vmem:[%s3598_s17 + $0x160] sm:$0xff] %v2840_v32  ;;  %2231 = vst [vmem:[%s3598_s17 + $0x168] sm:$0xff] %v2841_v33  ;;  %vm698_vm0 = vcmp.ge.f32.partialorder %v186_v30, 0.0 }
  0x56   : > { %2232 = vst [vmem:[%s3598_s17 + $0x170] sm:$0xff] %v2842_v34  ;;  %v2843_v37 = vsel %vm697_vm15, 1.0, %v3466_v6  ;;  %vm699_vm1 = vcmp.ge.f32.partialorder %v187_v31, 0.0  ;;  %vm700_vm2 = vcmp.ge.f32.partialorder %v188_v35, 0.0  ;;  %v190_v38 = vld [vmem:[%s3581_s30 + $0x1a0] sm:$0xff]  ;;  %v191_v39 = vld [vmem:[%s3581_s30 + $0x1a8] sm:$0xff] }
  0x57   : > { %2233 = vst [vmem:[%s3598_s17 + $0x178] sm:$0xff] %v2843_v37  ;;  %v2844_v40 = vsel %vm698_vm0, 1.0, %v3466_v6  ;;  %v2845_v41 = vsel %vm699_vm1, 1.0, %v3466_v6  ;;  %v2846_v42 = vsel %vm700_vm2, 1.0, %v3466_v6  ;;  %vm701_vm3 = vcmp.ge.f32.partialorder %v189_v36, 0.0  ;;  %v192_v43 = vld [vmem:[%s3581_s30 + $0x1b0] sm:$0xff] }
  0x58   : > { %v193_v44 = vld [vmem:[%s3581_s30 + $0x1b8] sm:$0xff]  ;;  %2234 = vst [vmem:[%s3598_s17 + $0x180] sm:$0xff] %v2844_v40  ;;  %2235 = vst [vmem:[%s3598_s17 + $0x188] sm:$0xff] %v2845_v41  ;;  %v2847_v45 = vsel %vm701_vm3, 1.0, %v3466_v6  ;;  %vm702_vm4 = vcmp.ge.f32.partialorder %v190_v38, 0.0  ;;  %vm703_vm5 = vcmp.ge.f32.partialorder %v191_v39, 0.0 }
  0x59   : > { %2236 = vst [vmem:[%s3598_s17 + $0x190] sm:$0xff] %v2846_v42  ;;  %vm704_vm6 = vcmp.ge.f32.partialorder %v192_v43, 0.0  ;;  %v194_v46 = vld [vmem:[%s3581_s30 + $0x1c0] sm:$0xff]  ;;  %v195_v47 = vld [vmem:[%s3581_s30 + $0x1c8] sm:$0xff]  ;;  %2237 = vst [vmem:[%s3598_s17 + $0x198] sm:$0xff] %v2847_v45  ;;  %v2848_v48 = vsel %vm702_vm4, 1.0, %v3466_v6 }
  0x5a   : > { %v2849_v49 = vsel %vm703_vm5, 1.0, %v3466_v6  ;;  %v2850_v50 = vsel %vm704_vm6, 1.0, %v3466_v6  ;;  %vm705_vm7 = vcmp.ge.f32.partialorder %v193_v44, 0.0  ;;  %v196_v51 = vld [vmem:[%s3581_s30 + $0x1d0] sm:$0xff]  ;;  %v197_v52 = vld [vmem:[%s3581_s30 + $0x1d8] sm:$0xff]  ;;  %2238 = vst [vmem:[%s3598_s17 + $0x1a0] sm:$0xff] %v2848_v48 }
  0x5b   : > { %2239 = vst [vmem:[%s3598_s17 + $0x1a8] sm:$0xff] %v2849_v49  ;;  %2240 = vst [vmem:[%s3598_s17 + $0x1b0] sm:$0xff] %v2850_v50  ;;  %v2851_v53 = vsel %vm705_vm7, 1.0, %v3466_v6  ;;  %vm706_vm8 = vcmp.ge.f32.partialorder %v194_v46, 0.0  ;;  %vm707_vm9 = vcmp.ge.f32.partialorder %v195_v47, 0.0  ;;  %vm708_vm10 = vcmp.ge.f32.partialorder %v196_v51, 0.0 }
  0x5c   : > { %v198_v54 = vld [vmem:[%s3581_s30 + $0x1e0] sm:$0xff]  ;;  %v199_v55 = vld [vmem:[%s3581_s30 + $0x1e8] sm:$0xff]  ;;  %2241 = vst [vmem:[%s3598_s17 + $0x1b8] sm:$0xff] %v2851_v53  ;;  %v2852_v56 = vsel %vm706_vm8, 1.0, %v3466_v6  ;;  %v2853_v57 = vsel %vm707_vm9, 1.0, %v3466_v6  ;;  %v2854_v58 = vsel %vm708_vm10, 1.0, %v3466_v6 }
  0x5d   : > { %vm709_vm11 = vcmp.ge.f32.partialorder %v197_v52, 0.0  ;;  %v200_v59 = vld [vmem:[%s3581_s30 + $0x1f0] sm:$0xff]  ;;  %v201_v60 = vld [vmem:[%s3581_s30 + $0x1f8] sm:$0xff]  ;;  %2242 = vst [vmem:[%s3598_s17 + $0x1c0] sm:$0xff] %v2852_v56  ;;  %2243 = vst [vmem:[%s3598_s17 + $0x1c8] sm:$0xff] %v2853_v57  ;;  %vm710_vm12 = vcmp.ge.f32.partialorder %v198_v54, 0.0 }
  0x5e   : > { %2244 = vst [vmem:[%s3598_s17 + $0x1d0] sm:$0xff] %v2854_v58  ;;  %v2855_v61 = vsel %vm709_vm11, 1.0, %v3466_v6  ;;  %vm711_vm13 = vcmp.ge.f32.partialorder %v199_v55, 0.0  ;;  %vm712_vm14 = vcmp.ge.f32.partialorder %v200_v59, 0.0  ;;  %v202_v62 = vld [vmem:[%s3581_s30 + $0x200] sm:$0xff]  ;;  %v203_v63 = vld [vmem:[%s3581_s30 + $0x208] sm:$0xff] }
  0x5f   : > { %2245 = vst [vmem:[%s3598_s17 + $0x1d8] sm:$0xff] %v2855_v61  ;;  %v2856_v0 = vsel %vm710_vm12, 1.0, %v3466_v6  ;;  %v2857_v1 = vsel %vm711_vm13, 1.0, %v3466_v6  ;;  %v2858_v2 = vsel %vm712_vm14, 1.0, %v3466_v6  ;;  %vm713_vm15 = vcmp.ge.f32.partialorder %v201_v60, 0.0  ;;  %v204_v3 = vld [vmem:[%s3581_s30 + $0x210] sm:$0xff] }
  0x60   : > { %v205_v4 = vld [vmem:[%s3581_s30 + $0x218] sm:$0xff]  ;;  %2246 = vst [vmem:[%s3598_s17 + $0x1e0] sm:$0xff] %v2856_v0  ;;  %2247 = vst [vmem:[%s3598_s17 + $0x1e8] sm:$0xff] %v2857_v1  ;;  %v2859_v5 = vsel %vm713_vm15, 1.0, %v3466_v6  ;;  %vm714_vm0 = vcmp.ge.f32.partialorder %v202_v62, 0.0  ;;  %vm715_vm1 = vcmp.ge.f32.partialorder %v203_v63, 0.0 }
  0x61   : > { %2248 = vst [vmem:[%s3598_s17 + $0x1f0] sm:$0xff] %v2858_v2  ;;  %vm716_vm2 = vcmp.ge.f32.partialorder %v204_v3, 0.0  ;;  %v206_v7 = vld [vmem:[%s3581_s30 + $0x220] sm:$0xff]  ;;  %v207_v8 = vld [vmem:[%s3581_s30 + $0x228] sm:$0xff]  ;;  %2249 = vst [vmem:[%s3598_s17 + $0x1f8] sm:$0xff] %v2859_v5  ;;  %v2860_v9 = vsel %vm714_vm0, 1.0, %v3466_v6 }
  0x62   : > { %v2861_v10 = vsel %vm715_vm1, 1.0, %v3466_v6  ;;  %v2862_v11 = vsel %vm716_vm2, 1.0, %v3466_v6  ;;  %vm717_vm3 = vcmp.ge.f32.partialorder %v205_v4, 0.0  ;;  %v208_v12 = vld [vmem:[%s3581_s30 + $0x230] sm:$0xff]  ;;  %v209_v13 = vld [vmem:[%s3581_s30 + $0x238] sm:$0xff]  ;;  %2250 = vst [vmem:[%s3598_s17 + $0x200] sm:$0xff] %v2860_v9 }
  0x63   : > { %2251 = vst [vmem:[%s3598_s17 + $0x208] sm:$0xff] %v2861_v10  ;;  %2252 = vst [vmem:[%s3598_s17 + $0x210] sm:$0xff] %v2862_v11  ;;  %v2863_v14 = vsel %vm717_vm3, 1.0, %v3466_v6  ;;  %vm718_vm4 = vcmp.ge.f32.partialorder %v206_v7, 0.0  ;;  %vm719_vm5 = vcmp.ge.f32.partialorder %v207_v8, 0.0  ;;  %vm720_vm6 = vcmp.ge.f32.partialorder %v208_v12, 0.0 }
  0x64   : > { %v210_v15 = vld [vmem:[%s3581_s30 + $0x240] sm:$0xff]  ;;  %v211_v16 = vld [vmem:[%s3581_s30 + $0x248] sm:$0xff]  ;;  %2253 = vst [vmem:[%s3598_s17 + $0x218] sm:$0xff] %v2863_v14  ;;  %v2864_v17 = vsel %vm718_vm4, 1.0, %v3466_v6  ;;  %v2865_v18 = vsel %vm719_vm5, 1.0, %v3466_v6  ;;  %v2866_v19 = vsel %vm720_vm6, 1.0, %v3466_v6 }
  0x65   : > { %vm721_vm7 = vcmp.ge.f32.partialorder %v209_v13, 0.0  ;;  %v212_v20 = vld [vmem:[%s3581_s30 + $0x250] sm:$0xff]  ;;  %v213_v21 = vld [vmem:[%s3581_s30 + $0x258] sm:$0xff]  ;;  %2254 = vst [vmem:[%s3598_s17 + $0x220] sm:$0xff] %v2864_v17  ;;  %2255 = vst [vmem:[%s3598_s17 + $0x228] sm:$0xff] %v2865_v18  ;;  %vm722_vm8 = vcmp.ge.f32.partialorder %v210_v15, 0.0 }
  0x66   : > { %2256 = vst [vmem:[%s3598_s17 + $0x230] sm:$0xff] %v2866_v19  ;;  %v2867_v22 = vsel %vm721_vm7, 1.0, %v3466_v6  ;;  %vm723_vm9 = vcmp.ge.f32.partialorder %v211_v16, 0.0  ;;  %vm724_vm10 = vcmp.ge.f32.partialorder %v212_v20, 0.0  ;;  %v214_v23 = vld [vmem:[%s3581_s30 + $0x260] sm:$0xff]  ;;  %v215_v24 = vld [vmem:[%s3581_s30 + $0x268] sm:$0xff] }
  0x67   : > { %2257 = vst [vmem:[%s3598_s17 + $0x238] sm:$0xff] %v2867_v22  ;;  %v2868_v25 = vsel %vm722_vm8, 1.0, %v3466_v6  ;;  %v2869_v26 = vsel %vm723_vm9, 1.0, %v3466_v6  ;;  %v2870_v27 = vsel %vm724_vm10, 1.0, %v3466_v6  ;;  %vm725_vm11 = vcmp.ge.f32.partialorder %v213_v21, 0.0  ;;  %v216_v28 = vld [vmem:[%s3581_s30 + $0x270] sm:$0xff] }
  0x68   : > { %v217_v29 = vld [vmem:[%s3581_s30 + $0x278] sm:$0xff]  ;;  %2258 = vst [vmem:[%s3598_s17 + $0x240] sm:$0xff] %v2868_v25  ;;  %2259 = vst [vmem:[%s3598_s17 + $0x248] sm:$0xff] %v2869_v26  ;;  %v2871_v30 = vsel %vm725_vm11, 1.0, %v3466_v6  ;;  %vm726_vm12 = vcmp.ge.f32.partialorder %v214_v23, 0.0  ;;  %vm727_vm13 = vcmp.ge.f32.partialorder %v215_v24, 0.0 }
  0x69   : > { %2260 = vst [vmem:[%s3598_s17 + $0x250] sm:$0xff] %v2870_v27  ;;  %vm728_vm14 = vcmp.ge.f32.partialorder %v216_v28, 0.0  ;;  %v218_v31 = vld [vmem:[%s3581_s30 + $0x280] sm:$0xff]  ;;  %v219_v32 = vld [vmem:[%s3581_s30 + $0x288] sm:$0xff]  ;;  %2261 = vst [vmem:[%s3598_s17 + $0x258] sm:$0xff] %v2871_v30  ;;  %v2872_v33 = vsel %vm726_vm12, 1.0, %v3466_v6 }
  0x6a   : > { %v2873_v34 = vsel %vm727_vm13, 1.0, %v3466_v6  ;;  %v2874_v35 = vsel %vm728_vm14, 1.0, %v3466_v6  ;;  %vm729_vm15 = vcmp.ge.f32.partialorder %v217_v29, 0.0  ;;  %v220_v36 = vld [vmem:[%s3581_s30 + $0x290] sm:$0xff]  ;;  %v221_v37 = vld [vmem:[%s3581_s30 + $0x298] sm:$0xff]  ;;  %2262 = vst [vmem:[%s3598_s17 + $0x260] sm:$0xff] %v2872_v33 }
  0x6b   : > { %2263 = vst [vmem:[%s3598_s17 + $0x268] sm:$0xff] %v2873_v34  ;;  %2264 = vst [vmem:[%s3598_s17 + $0x270] sm:$0xff] %v2874_v35  ;;  %v2875_v38 = vsel %vm729_vm15, 1.0, %v3466_v6  ;;  %vm730_vm0 = vcmp.ge.f32.partialorder %v218_v31, 0.0  ;;  %vm731_vm1 = vcmp.ge.f32.partialorder %v219_v32, 0.0  ;;  %vm732_vm2 = vcmp.ge.f32.partialorder %v220_v36, 0.0 }
  0x6c   : > { %v222_v39 = vld [vmem:[%s3581_s30 + $0x2a0] sm:$0xff]  ;;  %v223_v40 = vld [vmem:[%s3581_s30 + $0x2a8] sm:$0xff]  ;;  %2265 = vst [vmem:[%s3598_s17 + $0x278] sm:$0xff] %v2875_v38  ;;  %v2876_v41 = vsel %vm730_vm0, 1.0, %v3466_v6  ;;  %v2877_v42 = vsel %vm731_vm1, 1.0, %v3466_v6  ;;  %v2878_v43 = vsel %vm732_vm2, 1.0, %v3466_v6 }
  0x6d   : > { %vm733_vm3 = vcmp.ge.f32.partialorder %v221_v37, 0.0  ;;  %v224_v44 = vld [vmem:[%s3581_s30 + $0x2b0] sm:$0xff]  ;;  %v225_v45 = vld [vmem:[%s3581_s30 + $0x2b8] sm:$0xff]  ;;  %2266 = vst [vmem:[%s3598_s17 + $0x280] sm:$0xff] %v2876_v41  ;;  %2267 = vst [vmem:[%s3598_s17 + $0x288] sm:$0xff] %v2877_v42  ;;  %vm734_vm4 = vcmp.ge.f32.partialorder %v222_v39, 0.0 }
  0x6e   : > { %2268 = vst [vmem:[%s3598_s17 + $0x290] sm:$0xff] %v2878_v43  ;;  %v2879_v46 = vsel %vm733_vm3, 1.0, %v3466_v6  ;;  %vm735_vm5 = vcmp.ge.f32.partialorder %v223_v40, 0.0  ;;  %vm736_vm6 = vcmp.ge.f32.partialorder %v224_v44, 0.0  ;;  %v226_v47 = vld [vmem:[%s3581_s30 + $0x2c0] sm:$0xff]  ;;  %v227_v48 = vld [vmem:[%s3581_s30 + $0x2c8] sm:$0xff] }
  0x6f   : > { %2269 = vst [vmem:[%s3598_s17 + $0x298] sm:$0xff] %v2879_v46  ;;  %v2880_v49 = vsel %vm734_vm4, 1.0, %v3466_v6  ;;  %v2881_v50 = vsel %vm735_vm5, 1.0, %v3466_v6  ;;  %v2882_v51 = vsel %vm736_vm6, 1.0, %v3466_v6  ;;  %vm737_vm7 = vcmp.ge.f32.partialorder %v225_v45, 0.0  ;;  %v228_v52 = vld [vmem:[%s3581_s30 + $0x2d0] sm:$0xff] }
  0x70   : > { %v229_v53 = vld [vmem:[%s3581_s30 + $0x2d8] sm:$0xff]  ;;  %2270 = vst [vmem:[%s3598_s17 + $0x2a0] sm:$0xff] %v2880_v49  ;;  %2271 = vst [vmem:[%s3598_s17 + $0x2a8] sm:$0xff] %v2881_v50  ;;  %v2883_v54 = vsel %vm737_vm7, 1.0, %v3466_v6  ;;  %vm738_vm8 = vcmp.ge.f32.partialorder %v226_v47, 0.0  ;;  %vm739_vm9 = vcmp.ge.f32.partialorder %v227_v48, 0.0 }
  0x71   : > { %2272 = vst [vmem:[%s3598_s17 + $0x2b0] sm:$0xff] %v2882_v51  ;;  %vm740_vm10 = vcmp.ge.f32.partialorder %v228_v52, 0.0  ;;  %v230_v55 = vld [vmem:[%s3581_s30 + $0x2e0] sm:$0xff]  ;;  %v231_v56 = vld [vmem:[%s3581_s30 + $0x2e8] sm:$0xff]  ;;  %2273 = vst [vmem:[%s3598_s17 + $0x2b8] sm:$0xff] %v2883_v54  ;;  %v2884_v57 = vsel %vm738_vm8, 1.0, %v3466_v6 }
  0x72   : > { %v2885_v58 = vsel %vm739_vm9, 1.0, %v3466_v6  ;;  %v2886_v59 = vsel %vm740_vm10, 1.0, %v3466_v6  ;;  %vm741_vm11 = vcmp.ge.f32.partialorder %v229_v53, 0.0  ;;  %v232_v60 = vld [vmem:[%s3581_s30 + $0x2f0] sm:$0xff]  ;;  %v233_v61 = vld [vmem:[%s3581_s30 + $0x2f8] sm:$0xff]  ;;  %2274 = vst [vmem:[%s3598_s17 + $0x2c0] sm:$0xff] %v2884_v57 }
  0x73   : > { %2275 = vst [vmem:[%s3598_s17 + $0x2c8] sm:$0xff] %v2885_v58  ;;  %2276 = vst [vmem:[%s3598_s17 + $0x2d0] sm:$0xff] %v2886_v59  ;;  %v2887_v62 = vsel %vm741_vm11, 1.0, %v3466_v6  ;;  %vm742_vm12 = vcmp.ge.f32.partialorder %v230_v55, 0.0  ;;  %vm743_vm13 = vcmp.ge.f32.partialorder %v231_v56, 0.0  ;;  %vm744_vm14 = vcmp.ge.f32.partialorder %v232_v60, 0.0 }
  0x74   : > { %v234_v63 = vld [vmem:[%s3581_s30 + $0x300] sm:$0xff]  ;;  %v235_v0 = vld [vmem:[%s3581_s30 + $0x308] sm:$0xff]  ;;  %2277 = vst [vmem:[%s3598_s17 + $0x2d8] sm:$0xff] %v2887_v62  ;;  %v2888_v1 = vsel %vm742_vm12, 1.0, %v3466_v6  ;;  %v2889_v2 = vsel %vm743_vm13, 1.0, %v3466_v6  ;;  %v2890_v3 = vsel %vm744_vm14, 1.0, %v3466_v6 }
  0x75   : > { %vm745_vm15 = vcmp.ge.f32.partialorder %v233_v61, 0.0  ;;  %v236_v4 = vld [vmem:[%s3581_s30 + $0x310] sm:$0xff]  ;;  %v237_v5 = vld [vmem:[%s3581_s30 + $0x318] sm:$0xff]  ;;  %2278 = vst [vmem:[%s3598_s17 + $0x2e0] sm:$0xff] %v2888_v1  ;;  %2279 = vst [vmem:[%s3598_s17 + $0x2e8] sm:$0xff] %v2889_v2  ;;  %vm746_vm0 = vcmp.ge.f32.partialorder %v234_v63, 0.0 }
  0x76   : > { %2280 = vst [vmem:[%s3598_s17 + $0x2f0] sm:$0xff] %v2890_v3  ;;  %v2891_v7 = vsel %vm745_vm15, 1.0, %v3466_v6  ;;  %vm747_vm1 = vcmp.ge.f32.partialorder %v235_v0, 0.0  ;;  %vm748_vm2 = vcmp.ge.f32.partialorder %v236_v4, 0.0  ;;  %v238_v8 = vld [vmem:[%s3581_s30 + $0x320] sm:$0xff]  ;;  %v239_v9 = vld [vmem:[%s3581_s30 + $0x328] sm:$0xff] }
  0x77   : > { %2281 = vst [vmem:[%s3598_s17 + $0x2f8] sm:$0xff] %v2891_v7  ;;  %v2892_v10 = vsel %vm746_vm0, 1.0, %v3466_v6  ;;  %v2893_v11 = vsel %vm747_vm1, 1.0, %v3466_v6  ;;  %v2894_v12 = vsel %vm748_vm2, 1.0, %v3466_v6  ;;  %vm749_vm3 = vcmp.ge.f32.partialorder %v237_v5, 0.0  ;;  %v240_v13 = vld [vmem:[%s3581_s30 + $0x330] sm:$0xff] }
  0x78   : > { %v241_v14 = vld [vmem:[%s3581_s30 + $0x338] sm:$0xff]  ;;  %2282 = vst [vmem:[%s3598_s17 + $0x300] sm:$0xff] %v2892_v10  ;;  %2283 = vst [vmem:[%s3598_s17 + $0x308] sm:$0xff] %v2893_v11  ;;  %v2895_v15 = vsel %vm749_vm3, 1.0, %v3466_v6  ;;  %vm750_vm4 = vcmp.ge.f32.partialorder %v238_v8, 0.0  ;;  %vm751_vm5 = vcmp.ge.f32.partialorder %v239_v9, 0.0 }
  0x79   : > { %2284 = vst [vmem:[%s3598_s17 + $0x310] sm:$0xff] %v2894_v12  ;;  %vm752_vm6 = vcmp.ge.f32.partialorder %v240_v13, 0.0  ;;  %v242_v16 = vld [vmem:[%s3581_s30 + $0x340] sm:$0xff]  ;;  %v243_v17 = vld [vmem:[%s3581_s30 + $0x348] sm:$0xff]  ;;  %2285 = vst [vmem:[%s3598_s17 + $0x318] sm:$0xff] %v2895_v15  ;;  %v2896_v18 = vsel %vm750_vm4, 1.0, %v3466_v6 }
  0x7a   : > { %v2897_v19 = vsel %vm751_vm5, 1.0, %v3466_v6  ;;  %v2898_v20 = vsel %vm752_vm6, 1.0, %v3466_v6  ;;  %vm753_vm7 = vcmp.ge.f32.partialorder %v241_v14, 0.0  ;;  %v244_v21 = vld [vmem:[%s3581_s30 + $0x350] sm:$0xff]  ;;  %v245_v22 = vld [vmem:[%s3581_s30 + $0x358] sm:$0xff]  ;;  %2286 = vst [vmem:[%s3598_s17 + $0x320] sm:$0xff] %v2896_v18 }
  0x7b   : > { %2287 = vst [vmem:[%s3598_s17 + $0x328] sm:$0xff] %v2897_v19  ;;  %2288 = vst [vmem:[%s3598_s17 + $0x330] sm:$0xff] %v2898_v20  ;;  %v2899_v23 = vsel %vm753_vm7, 1.0, %v3466_v6  ;;  %vm754_vm8 = vcmp.ge.f32.partialorder %v242_v16, 0.0  ;;  %vm755_vm9 = vcmp.ge.f32.partialorder %v243_v17, 0.0  ;;  %vm756_vm10 = vcmp.ge.f32.partialorder %v244_v21, 0.0 }
  0x7c   : > { %v246_v24 = vld [vmem:[%s3581_s30 + $0x360] sm:$0xff]  ;;  %v247_v25 = vld [vmem:[%s3581_s30 + $0x368] sm:$0xff]  ;;  %2289 = vst [vmem:[%s3598_s17 + $0x338] sm:$0xff] %v2899_v23  ;;  %v2900_v26 = vsel %vm754_vm8, 1.0, %v3466_v6  ;;  %v2901_v27 = vsel %vm755_vm9, 1.0, %v3466_v6  ;;  %v2902_v28 = vsel %vm756_vm10, 1.0, %v3466_v6 }
  0x7d   : > { %vm757_vm11 = vcmp.ge.f32.partialorder %v245_v22, 0.0  ;;  %v248_v29 = vld [vmem:[%s3581_s30 + $0x370] sm:$0xff]  ;;  %v249_v30 = vld [vmem:[%s3581_s30 + $0x378] sm:$0xff]  ;;  %2290 = vst [vmem:[%s3598_s17 + $0x340] sm:$0xff] %v2900_v26  ;;  %2291 = vst [vmem:[%s3598_s17 + $0x348] sm:$0xff] %v2901_v27  ;;  %vm758_vm12 = vcmp.ge.f32.partialorder %v246_v24, 0.0 }
  0x7e   : > { %2292 = vst [vmem:[%s3598_s17 + $0x350] sm:$0xff] %v2902_v28  ;;  %v2903_v31 = vsel %vm757_vm11, 1.0, %v3466_v6  ;;  %vm759_vm13 = vcmp.ge.f32.partialorder %v247_v25, 0.0  ;;  %vm760_vm14 = vcmp.ge.f32.partialorder %v248_v29, 0.0  ;;  %v250_v32 = vld [vmem:[%s3581_s30 + $0x380] sm:$0xff]  ;;  %v251_v33 = vld [vmem:[%s3581_s30 + $0x388] sm:$0xff] }
  0x7f   : > { %2293 = vst [vmem:[%s3598_s17 + $0x358] sm:$0xff] %v2903_v31  ;;  %v2904_v34 = vsel %vm758_vm12, 1.0, %v3466_v6  ;;  %v2905_v35 = vsel %vm759_vm13, 1.0, %v3466_v6  ;;  %v2906_v36 = vsel %vm760_vm14, 1.0, %v3466_v6  ;;  %vm761_vm15 = vcmp.ge.f32.partialorder %v249_v30, 0.0  ;;  %v252_v37 = vld [vmem:[%s3581_s30 + $0x390] sm:$0xff] }
  0x80   : > { %v253_v38 = vld [vmem:[%s3581_s30 + $0x398] sm:$0xff]  ;;  %2294 = vst [vmem:[%s3598_s17 + $0x360] sm:$0xff] %v2904_v34  ;;  %2295 = vst [vmem:[%s3598_s17 + $0x368] sm:$0xff] %v2905_v35  ;;  %v2907_v39 = vsel %vm761_vm15, 1.0, %v3466_v6  ;;  %vm762_vm0 = vcmp.ge.f32.partialorder %v250_v32, 0.0  ;;  %vm763_vm1 = vcmp.ge.f32.partialorder %v251_v33, 0.0 }
  0x81   : > { %2296 = vst [vmem:[%s3598_s17 + $0x370] sm:$0xff] %v2906_v36  ;;  %vm764_vm2 = vcmp.ge.f32.partialorder %v252_v37, 0.0  ;;  %v254_v40 = vld [vmem:[%s3581_s30 + $0x3a0] sm:$0xff]  ;;  %v255_v41 = vld [vmem:[%s3581_s30 + $0x3a8] sm:$0xff]  ;;  %2297 = vst [vmem:[%s3598_s17 + $0x378] sm:$0xff] %v2907_v39  ;;  %v2908_v42 = vsel %vm762_vm0, 1.0, %v3466_v6 }
  0x82   : > { %v2909_v43 = vsel %vm763_vm1, 1.0, %v3466_v6  ;;  %v2910_v44 = vsel %vm764_vm2, 1.0, %v3466_v6  ;;  %vm765_vm3 = vcmp.ge.f32.partialorder %v253_v38, 0.0  ;;  %v256_v45 = vld [vmem:[%s3581_s30 + $0x3b0] sm:$0xff]  ;;  %v257_v46 = vld [vmem:[%s3581_s30 + $0x3b8] sm:$0xff]  ;;  %2298 = vst [vmem:[%s3598_s17 + $0x380] sm:$0xff] %v2908_v42 }
  0x83   : > { %2299 = vst [vmem:[%s3598_s17 + $0x388] sm:$0xff] %v2909_v43  ;;  %2300 = vst [vmem:[%s3598_s17 + $0x390] sm:$0xff] %v2910_v44  ;;  %v2911_v47 = vsel %vm765_vm3, 1.0, %v3466_v6  ;;  %vm766_vm4 = vcmp.ge.f32.partialorder %v254_v40, 0.0  ;;  %vm767_vm5 = vcmp.ge.f32.partialorder %v255_v41, 0.0  ;;  %vm768_vm6 = vcmp.ge.f32.partialorder %v256_v45, 0.0 }
  0x84   : > { %v258_v48 = vld [vmem:[%s3581_s30 + $0x3c0] sm:$0xff]  ;;  %v259_v49 = vld [vmem:[%s3581_s30 + $0x3c8] sm:$0xff]  ;;  %2301 = vst [vmem:[%s3598_s17 + $0x398] sm:$0xff] %v2911_v47  ;;  %v2912_v50 = vsel %vm766_vm4, 1.0, %v3466_v6  ;;  %v2913_v51 = vsel %vm767_vm5, 1.0, %v3466_v6  ;;  %v2914_v52 = vsel %vm768_vm6, 1.0, %v3466_v6 }
  0x85   : > { %vm769_vm7 = vcmp.ge.f32.partialorder %v257_v46, 0.0  ;;  %v260_v53 = vld [vmem:[%s3581_s30 + $0x3d0] sm:$0xff]  ;;  %v261_v54 = vld [vmem:[%s3581_s30 + $0x3d8] sm:$0xff]  ;;  %2302 = vst [vmem:[%s3598_s17 + $0x3a0] sm:$0xff] %v2912_v50  ;;  %2303 = vst [vmem:[%s3598_s17 + $0x3a8] sm:$0xff] %v2913_v51  ;;  %vm770_vm8 = vcmp.ge.f32.partialorder %v258_v48, 0.0 }
  0x86   : > { %2304 = vst [vmem:[%s3598_s17 + $0x3b0] sm:$0xff] %v2914_v52  ;;  %v2915_v55 = vsel %vm769_vm7, 1.0, %v3466_v6  ;;  %vm771_vm9 = vcmp.ge.f32.partialorder %v259_v49, 0.0  ;;  %vm772_vm10 = vcmp.ge.f32.partialorder %v260_v53, 0.0  ;;  %v262_v56 = vld [vmem:[%s3581_s30 + $0x3e0] sm:$0xff]  ;;  %v263_v57 = vld [vmem:[%s3581_s30 + $0x3e8] sm:$0xff] }
  0x87   : > { %2305 = vst [vmem:[%s3598_s17 + $0x3b8] sm:$0xff] %v2915_v55  ;;  %v2916_v58 = vsel %vm770_vm8, 1.0, %v3466_v6  ;;  %v2917_v59 = vsel %vm771_vm9, 1.0, %v3466_v6  ;;  %v2918_v60 = vsel %vm772_vm10, 1.0, %v3466_v6  ;;  %vm773_vm11 = vcmp.ge.f32.partialorder %v261_v54, 0.0  ;;  %v264_v61 = vld [vmem:[%s3581_s30 + $0x3f0] sm:$0xff] }
  0x88   : > { %v265_v62 = vld [vmem:[%s3581_s30 + $0x3f8] sm:$0xff]  ;;  %2306 = vst [vmem:[%s3598_s17 + $0x3c0] sm:$0xff] %v2916_v58  ;;  %2307 = vst [vmem:[%s3598_s17 + $0x3c8] sm:$0xff] %v2917_v59  ;;  %v2919_v63 = vsel %vm773_vm11, 1.0, %v3466_v6  ;;  %vm774_vm12 = vcmp.ge.f32.partialorder %v262_v56, 0.0  ;;  %vm775_vm13 = vcmp.ge.f32.partialorder %v263_v57, 0.0 }
  0x89   : > { %2308 = vst [vmem:[%s3598_s17 + $0x3d0] sm:$0xff] %v2918_v60  ;;  %vm776_vm14 = vcmp.ge.f32.partialorder %v264_v61, 0.0  ;;  %v266_v0 = vld [vmem:[%s3581_s30 + $0x400] sm:$0xff]  ;;  %v267_v1 = vld [vmem:[%s3581_s30 + $0x408] sm:$0xff]  ;;  %2309 = vst [vmem:[%s3598_s17 + $0x3d8] sm:$0xff] %v2919_v63  ;;  %v2920_v2 = vsel %vm774_vm12, 1.0, %v3466_v6 }
  0x8a   : > { %v2921_v3 = vsel %vm775_vm13, 1.0, %v3466_v6  ;;  %v2922_v4 = vsel %vm776_vm14, 1.0, %v3466_v6  ;;  %vm777_vm15 = vcmp.ge.f32.partialorder %v265_v62, 0.0  ;;  %v268_v5 = vld [vmem:[%s3581_s30 + $0x410] sm:$0xff]  ;;  %v269_v7 = vld [vmem:[%s3581_s30 + $0x418] sm:$0xff]  ;;  %2310 = vst [vmem:[%s3598_s17 + $0x3e0] sm:$0xff] %v2920_v2 }
  0x8b   : > { %2311 = vst [vmem:[%s3598_s17 + $0x3e8] sm:$0xff] %v2921_v3  ;;  %2312 = vst [vmem:[%s3598_s17 + $0x3f0] sm:$0xff] %v2922_v4  ;;  %v2923_v8 = vsel %vm777_vm15, 1.0, %v3466_v6  ;;  %vm778_vm0 = vcmp.ge.f32.partialorder %v266_v0, 0.0  ;;  %vm779_vm1 = vcmp.ge.f32.partialorder %v267_v1, 0.0  ;;  %vm780_vm2 = vcmp.ge.f32.partialorder %v268_v5, 0.0 }
  0x8c   : > { %v270_v9 = vld [vmem:[%s3581_s30 + $0x420] sm:$0xff]  ;;  %v271_v10 = vld [vmem:[%s3581_s30 + $0x428] sm:$0xff]  ;;  %2313 = vst [vmem:[%s3598_s17 + $0x3f8] sm:$0xff] %v2923_v8  ;;  %v2924_v11 = vsel %vm778_vm0, 1.0, %v3466_v6  ;;  %v2925_v12 = vsel %vm779_vm1, 1.0, %v3466_v6  ;;  %v2926_v13 = vsel %vm780_vm2, 1.0, %v3466_v6 }
  0x8d   : > { %vm781_vm3 = vcmp.ge.f32.partialorder %v269_v7, 0.0  ;;  %v272_v14 = vld [vmem:[%s3581_s30 + $0x430] sm:$0xff]  ;;  %v273_v15 = vld [vmem:[%s3581_s30 + $0x438] sm:$0xff]  ;;  %2314 = vst [vmem:[%s3598_s17 + $0x400] sm:$0xff] %v2924_v11  ;;  %2315 = vst [vmem:[%s3598_s17 + $0x408] sm:$0xff] %v2925_v12  ;;  %vm782_vm4 = vcmp.ge.f32.partialorder %v270_v9, 0.0 }
  0x8e   : > { %2316 = vst [vmem:[%s3598_s17 + $0x410] sm:$0xff] %v2926_v13  ;;  %v2927_v16 = vsel %vm781_vm3, 1.0, %v3466_v6  ;;  %vm783_vm5 = vcmp.ge.f32.partialorder %v271_v10, 0.0  ;;  %vm784_vm6 = vcmp.ge.f32.partialorder %v272_v14, 0.0  ;;  %v274_v17 = vld [vmem:[%s3581_s30 + $0x440] sm:$0xff]  ;;  %v275_v18 = vld [vmem:[%s3581_s30 + $0x448] sm:$0xff] }
  0x8f   : > { %2317 = vst [vmem:[%s3598_s17 + $0x418] sm:$0xff] %v2927_v16  ;;  %v2928_v19 = vsel %vm782_vm4, 1.0, %v3466_v6  ;;  %v2929_v20 = vsel %vm783_vm5, 1.0, %v3466_v6  ;;  %v2930_v21 = vsel %vm784_vm6, 1.0, %v3466_v6  ;;  %vm785_vm7 = vcmp.ge.f32.partialorder %v273_v15, 0.0  ;;  %v276_v22 = vld [vmem:[%s3581_s30 + $0x450] sm:$0xff] }
  0x90   : > { %v277_v23 = vld [vmem:[%s3581_s30 + $0x458] sm:$0xff]  ;;  %2318 = vst [vmem:[%s3598_s17 + $0x420] sm:$0xff] %v2928_v19  ;;  %2319 = vst [vmem:[%s3598_s17 + $0x428] sm:$0xff] %v2929_v20  ;;  %v2931_v24 = vsel %vm785_vm7, 1.0, %v3466_v6  ;;  %vm786_vm8 = vcmp.ge.f32.partialorder %v274_v17, 0.0  ;;  %vm787_vm9 = vcmp.ge.f32.partialorder %v275_v18, 0.0 }
  0x91   : > { %2320 = vst [vmem:[%s3598_s17 + $0x430] sm:$0xff] %v2930_v21  ;;  %vm788_vm10 = vcmp.ge.f32.partialorder %v276_v22, 0.0  ;;  %v278_v25 = vld [vmem:[%s3581_s30 + $0x460] sm:$0xff]  ;;  %v279_v26 = vld [vmem:[%s3581_s30 + $0x468] sm:$0xff]  ;;  %2321 = vst [vmem:[%s3598_s17 + $0x438] sm:$0xff] %v2931_v24  ;;  %v2932_v27 = vsel %vm786_vm8, 1.0, %v3466_v6 }
  0x92   : > { %v2933_v28 = vsel %vm787_vm9, 1.0, %v3466_v6  ;;  %v2934_v29 = vsel %vm788_vm10, 1.0, %v3466_v6  ;;  %vm789_vm11 = vcmp.ge.f32.partialorder %v277_v23, 0.0  ;;  %v280_v30 = vld [vmem:[%s3581_s30 + $0x470] sm:$0xff]  ;;  %v281_v31 = vld [vmem:[%s3581_s30 + $0x478] sm:$0xff]  ;;  %2322 = vst [vmem:[%s3598_s17 + $0x440] sm:$0xff] %v2932_v27 }
  0x93   : > { %2323 = vst [vmem:[%s3598_s17 + $0x448] sm:$0xff] %v2933_v28  ;;  %2324 = vst [vmem:[%s3598_s17 + $0x450] sm:$0xff] %v2934_v29  ;;  %v2935_v32 = vsel %vm789_vm11, 1.0, %v3466_v6  ;;  %vm790_vm12 = vcmp.ge.f32.partialorder %v278_v25, 0.0  ;;  %vm791_vm13 = vcmp.ge.f32.partialorder %v279_v26, 0.0  ;;  %vm792_vm14 = vcmp.ge.f32.partialorder %v280_v30, 0.0 }
  0x94   : > { %v282_v33 = vld [vmem:[%s3581_s30 + $0x480] sm:$0xff]  ;;  %v283_v34 = vld [vmem:[%s3581_s30 + $0x488] sm:$0xff]  ;;  %2325 = vst [vmem:[%s3598_s17 + $0x458] sm:$0xff] %v2935_v32  ;;  %v2936_v35 = vsel %vm790_vm12, 1.0, %v3466_v6  ;;  %v2937_v36 = vsel %vm791_vm13, 1.0, %v3466_v6  ;;  %v2938_v37 = vsel %vm792_vm14, 1.0, %v3466_v6 }
  0x95   : > { %vm793_vm15 = vcmp.ge.f32.partialorder %v281_v31, 0.0  ;;  %v284_v38 = vld [vmem:[%s3581_s30 + $0x490] sm:$0xff]  ;;  %v285_v39 = vld [vmem:[%s3581_s30 + $0x498] sm:$0xff]  ;;  %2326 = vst [vmem:[%s3598_s17 + $0x460] sm:$0xff] %v2936_v35  ;;  %2327 = vst [vmem:[%s3598_s17 + $0x468] sm:$0xff] %v2937_v36  ;;  %vm794_vm0 = vcmp.ge.f32.partialorder %v282_v33, 0.0 }
  0x96   : > { %2328 = vst [vmem:[%s3598_s17 + $0x470] sm:$0xff] %v2938_v37  ;;  %v2939_v40 = vsel %vm793_vm15, 1.0, %v3466_v6  ;;  %vm795_vm1 = vcmp.ge.f32.partialorder %v283_v34, 0.0  ;;  %vm796_vm2 = vcmp.ge.f32.partialorder %v284_v38, 0.0  ;;  %v286_v41 = vld [vmem:[%s3581_s30 + $0x4a0] sm:$0xff]  ;;  %v287_v42 = vld [vmem:[%s3581_s30 + $0x4a8] sm:$0xff] }
  0x97   : > { %2329 = vst [vmem:[%s3598_s17 + $0x478] sm:$0xff] %v2939_v40  ;;  %v2940_v43 = vsel %vm794_vm0, 1.0, %v3466_v6  ;;  %v2941_v44 = vsel %vm795_vm1, 1.0, %v3466_v6  ;;  %v2942_v45 = vsel %vm796_vm2, 1.0, %v3466_v6  ;;  %vm797_vm3 = vcmp.ge.f32.partialorder %v285_v39, 0.0  ;;  %v288_v46 = vld [vmem:[%s3581_s30 + $0x4b0] sm:$0xff] }
  0x98   : > { %v289_v47 = vld [vmem:[%s3581_s30 + $0x4b8] sm:$0xff]  ;;  %2330 = vst [vmem:[%s3598_s17 + $0x480] sm:$0xff] %v2940_v43  ;;  %2331 = vst [vmem:[%s3598_s17 + $0x488] sm:$0xff] %v2941_v44  ;;  %v2943_v48 = vsel %vm797_vm3, 1.0, %v3466_v6  ;;  %vm798_vm4 = vcmp.ge.f32.partialorder %v286_v41, 0.0  ;;  %vm799_vm5 = vcmp.ge.f32.partialorder %v287_v42, 0.0 }
  0x99   : > { %2332 = vst [vmem:[%s3598_s17 + $0x490] sm:$0xff] %v2942_v45  ;;  %vm800_vm6 = vcmp.ge.f32.partialorder %v288_v46, 0.0  ;;  %v290_v49 = vld [vmem:[%s3581_s30 + $0x4c0] sm:$0xff]  ;;  %v291_v50 = vld [vmem:[%s3581_s30 + $0x4c8] sm:$0xff]  ;;  %2333 = vst [vmem:[%s3598_s17 + $0x498] sm:$0xff] %v2943_v48  ;;  %v2944_v51 = vsel %vm798_vm4, 1.0, %v3466_v6 }
  0x9a   : > { %v2945_v52 = vsel %vm799_vm5, 1.0, %v3466_v6  ;;  %v2946_v53 = vsel %vm800_vm6, 1.0, %v3466_v6  ;;  %vm801_vm7 = vcmp.ge.f32.partialorder %v289_v47, 0.0  ;;  %v292_v54 = vld [vmem:[%s3581_s30 + $0x4d0] sm:$0xff]  ;;  %v293_v55 = vld [vmem:[%s3581_s30 + $0x4d8] sm:$0xff]  ;;  %2334 = vst [vmem:[%s3598_s17 + $0x4a0] sm:$0xff] %v2944_v51 }
  0x9b   : > { %2335 = vst [vmem:[%s3598_s17 + $0x4a8] sm:$0xff] %v2945_v52  ;;  %2336 = vst [vmem:[%s3598_s17 + $0x4b0] sm:$0xff] %v2946_v53  ;;  %v2947_v56 = vsel %vm801_vm7, 1.0, %v3466_v6  ;;  %vm802_vm8 = vcmp.ge.f32.partialorder %v290_v49, 0.0  ;;  %vm803_vm9 = vcmp.ge.f32.partialorder %v291_v50, 0.0  ;;  %vm804_vm10 = vcmp.ge.f32.partialorder %v292_v54, 0.0 }
  0x9c   : > { %v294_v57 = vld [vmem:[%s3581_s30 + $0x4e0] sm:$0xff]  ;;  %v295_v58 = vld [vmem:[%s3581_s30 + $0x4e8] sm:$0xff]  ;;  %2337 = vst [vmem:[%s3598_s17 + $0x4b8] sm:$0xff] %v2947_v56  ;;  %v2948_v59 = vsel %vm802_vm8, 1.0, %v3466_v6  ;;  %v2949_v60 = vsel %vm803_vm9, 1.0, %v3466_v6  ;;  %v2950_v61 = vsel %vm804_vm10, 1.0, %v3466_v6 }
  0x9d   : > { %vm805_vm11 = vcmp.ge.f32.partialorder %v293_v55, 0.0  ;;  %v296_v62 = vld [vmem:[%s3581_s30 + $0x4f0] sm:$0xff]  ;;  %v297_v63 = vld [vmem:[%s3581_s30 + $0x4f8] sm:$0xff]  ;;  %2338 = vst [vmem:[%s3598_s17 + $0x4c0] sm:$0xff] %v2948_v59  ;;  %2339 = vst [vmem:[%s3598_s17 + $0x4c8] sm:$0xff] %v2949_v60  ;;  %vm806_vm12 = vcmp.ge.f32.partialorder %v294_v57, 0.0 }
  0x9e   : > { %2340 = vst [vmem:[%s3598_s17 + $0x4d0] sm:$0xff] %v2950_v61  ;;  %v2951_v0 = vsel %vm805_vm11, 1.0, %v3466_v6  ;;  %vm807_vm13 = vcmp.ge.f32.partialorder %v295_v58, 0.0  ;;  %vm808_vm14 = vcmp.ge.f32.partialorder %v296_v62, 0.0  ;;  %v298_v1 = vld [vmem:[%s3581_s30 + $0x500] sm:$0xff]  ;;  %v299_v2 = vld [vmem:[%s3581_s30 + $0x508] sm:$0xff] }
  0x9f   : > { %2341 = vst [vmem:[%s3598_s17 + $0x4d8] sm:$0xff] %v2951_v0  ;;  %v2952_v3 = vsel %vm806_vm12, 1.0, %v3466_v6  ;;  %v2953_v4 = vsel %vm807_vm13, 1.0, %v3466_v6  ;;  %v2954_v5 = vsel %vm808_vm14, 1.0, %v3466_v6  ;;  %vm809_vm15 = vcmp.ge.f32.partialorder %v297_v63, 0.0  ;;  %v300_v7 = vld [vmem:[%s3581_s30 + $0x510] sm:$0xff] }
  0xa0   : > { %v301_v8 = vld [vmem:[%s3581_s30 + $0x518] sm:$0xff]  ;;  %2342 = vst [vmem:[%s3598_s17 + $0x4e0] sm:$0xff] %v2952_v3  ;;  %2343 = vst [vmem:[%s3598_s17 + $0x4e8] sm:$0xff] %v2953_v4  ;;  %v2955_v9 = vsel %vm809_vm15, 1.0, %v3466_v6  ;;  %vm810_vm0 = vcmp.ge.f32.partialorder %v298_v1, 0.0  ;;  %vm811_vm1 = vcmp.ge.f32.partialorder %v299_v2, 0.0 }
  0xa1   : > { %2344 = vst [vmem:[%s3598_s17 + $0x4f0] sm:$0xff] %v2954_v5  ;;  %vm812_vm2 = vcmp.ge.f32.partialorder %v300_v7, 0.0  ;;  %v302_v10 = vld [vmem:[%s3581_s30 + $0x520] sm:$0xff]  ;;  %v303_v11 = vld [vmem:[%s3581_s30 + $0x528] sm:$0xff]  ;;  %2345 = vst [vmem:[%s3598_s17 + $0x4f8] sm:$0xff] %v2955_v9  ;;  %v2956_v12 = vsel %vm810_vm0, 1.0, %v3466_v6 }
  0xa2   : > { %v2957_v13 = vsel %vm811_vm1, 1.0, %v3466_v6  ;;  %v2958_v14 = vsel %vm812_vm2, 1.0, %v3466_v6  ;;  %vm813_vm3 = vcmp.ge.f32.partialorder %v301_v8, 0.0  ;;  %v304_v15 = vld [vmem:[%s3581_s30 + $0x530] sm:$0xff]  ;;  %v305_v16 = vld [vmem:[%s3581_s30 + $0x538] sm:$0xff]  ;;  %2346 = vst [vmem:[%s3598_s17 + $0x500] sm:$0xff] %v2956_v12 }
  0xa3   : > { %2347 = vst [vmem:[%s3598_s17 + $0x508] sm:$0xff] %v2957_v13  ;;  %2348 = vst [vmem:[%s3598_s17 + $0x510] sm:$0xff] %v2958_v14  ;;  %v2959_v17 = vsel %vm813_vm3, 1.0, %v3466_v6  ;;  %vm814_vm4 = vcmp.ge.f32.partialorder %v302_v10, 0.0  ;;  %vm815_vm5 = vcmp.ge.f32.partialorder %v303_v11, 0.0  ;;  %vm816_vm6 = vcmp.ge.f32.partialorder %v304_v15, 0.0 }
  0xa4   : > { %v306_v18 = vld [vmem:[%s3581_s30 + $0x540] sm:$0xff]  ;;  %v307_v19 = vld [vmem:[%s3581_s30 + $0x548] sm:$0xff]  ;;  %2349 = vst [vmem:[%s3598_s17 + $0x518] sm:$0xff] %v2959_v17  ;;  %v2960_v20 = vsel %vm814_vm4, 1.0, %v3466_v6  ;;  %v2961_v21 = vsel %vm815_vm5, 1.0, %v3466_v6  ;;  %v2962_v22 = vsel %vm816_vm6, 1.0, %v3466_v6 }
  0xa5   : > { %vm817_vm7 = vcmp.ge.f32.partialorder %v305_v16, 0.0  ;;  %v308_v23 = vld [vmem:[%s3581_s30 + $0x550] sm:$0xff]  ;;  %v309_v24 = vld [vmem:[%s3581_s30 + $0x558] sm:$0xff]  ;;  %2350 = vst [vmem:[%s3598_s17 + $0x520] sm:$0xff] %v2960_v20  ;;  %2351 = vst [vmem:[%s3598_s17 + $0x528] sm:$0xff] %v2961_v21  ;;  %vm818_vm8 = vcmp.ge.f32.partialorder %v306_v18, 0.0 }
  0xa6   : > { %2352 = vst [vmem:[%s3598_s17 + $0x530] sm:$0xff] %v2962_v22  ;;  %v2963_v25 = vsel %vm817_vm7, 1.0, %v3466_v6  ;;  %vm819_vm9 = vcmp.ge.f32.partialorder %v307_v19, 0.0  ;;  %vm820_vm10 = vcmp.ge.f32.partialorder %v308_v23, 0.0  ;;  %v310_v26 = vld [vmem:[%s3581_s30 + $0x560] sm:$0xff]  ;;  %v311_v27 = vld [vmem:[%s3581_s30 + $0x568] sm:$0xff] }
  0xa7   : > { %2353 = vst [vmem:[%s3598_s17 + $0x538] sm:$0xff] %v2963_v25  ;;  %v2964_v28 = vsel %vm818_vm8, 1.0, %v3466_v6  ;;  %v2965_v29 = vsel %vm819_vm9, 1.0, %v3466_v6  ;;  %v2966_v30 = vsel %vm820_vm10, 1.0, %v3466_v6  ;;  %vm821_vm11 = vcmp.ge.f32.partialorder %v309_v24, 0.0  ;;  %v312_v31 = vld [vmem:[%s3581_s30 + $0x570] sm:$0xff] }
  0xa8   : > { %v313_v32 = vld [vmem:[%s3581_s30 + $0x578] sm:$0xff]  ;;  %2354 = vst [vmem:[%s3598_s17 + $0x540] sm:$0xff] %v2964_v28  ;;  %2355 = vst [vmem:[%s3598_s17 + $0x548] sm:$0xff] %v2965_v29  ;;  %v2967_v33 = vsel %vm821_vm11, 1.0, %v3466_v6  ;;  %vm822_vm12 = vcmp.ge.f32.partialorder %v310_v26, 0.0  ;;  %vm823_vm13 = vcmp.ge.f32.partialorder %v311_v27, 0.0 }
  0xa9   : > { %2356 = vst [vmem:[%s3598_s17 + $0x550] sm:$0xff] %v2966_v30  ;;  %vm824_vm14 = vcmp.ge.f32.partialorder %v312_v31, 0.0  ;;  %v314_v34 = vld [vmem:[%s3581_s30 + $0x580] sm:$0xff]  ;;  %v315_v35 = vld [vmem:[%s3581_s30 + $0x588] sm:$0xff]  ;;  %2357 = vst [vmem:[%s3598_s17 + $0x558] sm:$0xff] %v2967_v33  ;;  %v2968_v36 = vsel %vm822_vm12, 1.0, %v3466_v6 }
  0xaa   : > { %v2969_v37 = vsel %vm823_vm13, 1.0, %v3466_v6  ;;  %v2970_v38 = vsel %vm824_vm14, 1.0, %v3466_v6  ;;  %vm825_vm15 = vcmp.ge.f32.partialorder %v313_v32, 0.0  ;;  %v316_v39 = vld [vmem:[%s3581_s30 + $0x590] sm:$0xff]  ;;  %v317_v40 = vld [vmem:[%s3581_s30 + $0x598] sm:$0xff]  ;;  %2358 = vst [vmem:[%s3598_s17 + $0x560] sm:$0xff] %v2968_v36 }
  0xab   : > { %2359 = vst [vmem:[%s3598_s17 + $0x568] sm:$0xff] %v2969_v37  ;;  %2360 = vst [vmem:[%s3598_s17 + $0x570] sm:$0xff] %v2970_v38  ;;  %v2971_v41 = vsel %vm825_vm15, 1.0, %v3466_v6  ;;  %vm826_vm0 = vcmp.ge.f32.partialorder %v314_v34, 0.0  ;;  %vm827_vm1 = vcmp.ge.f32.partialorder %v315_v35, 0.0  ;;  %vm828_vm2 = vcmp.ge.f32.partialorder %v316_v39, 0.0 }
  0xac   : > { %v318_v42 = vld [vmem:[%s3581_s30 + $0x5a0] sm:$0xff]  ;;  %v319_v43 = vld [vmem:[%s3581_s30 + $0x5a8] sm:$0xff]  ;;  %2361 = vst [vmem:[%s3598_s17 + $0x578] sm:$0xff] %v2971_v41  ;;  %v2972_v44 = vsel %vm826_vm0, 1.0, %v3466_v6  ;;  %v2973_v45 = vsel %vm827_vm1, 1.0, %v3466_v6  ;;  %v2974_v46 = vsel %vm828_vm2, 1.0, %v3466_v6 }
  0xad   : > { %vm829_vm3 = vcmp.ge.f32.partialorder %v317_v40, 0.0  ;;  %v320_v47 = vld [vmem:[%s3581_s30 + $0x5b0] sm:$0xff]  ;;  %v321_v48 = vld [vmem:[%s3581_s30 + $0x5b8] sm:$0xff]  ;;  %2362 = vst [vmem:[%s3598_s17 + $0x580] sm:$0xff] %v2972_v44  ;;  %2363 = vst [vmem:[%s3598_s17 + $0x588] sm:$0xff] %v2973_v45  ;;  %vm830_vm4 = vcmp.ge.f32.partialorder %v318_v42, 0.0 }
  0xae   : > { %2364 = vst [vmem:[%s3598_s17 + $0x590] sm:$0xff] %v2974_v46  ;;  %v2975_v49 = vsel %vm829_vm3, 1.0, %v3466_v6  ;;  %vm831_vm5 = vcmp.ge.f32.partialorder %v319_v43, 0.0  ;;  %vm832_vm6 = vcmp.ge.f32.partialorder %v320_v47, 0.0  ;;  %v322_v50 = vld [vmem:[%s3581_s30 + $0x5c0] sm:$0xff]  ;;  %v323_v51 = vld [vmem:[%s3581_s30 + $0x5c8] sm:$0xff] }
  0xaf   : > { %2365 = vst [vmem:[%s3598_s17 + $0x598] sm:$0xff] %v2975_v49  ;;  %v2976_v52 = vsel %vm830_vm4, 1.0, %v3466_v6  ;;  %v2977_v53 = vsel %vm831_vm5, 1.0, %v3466_v6  ;;  %v2978_v54 = vsel %vm832_vm6, 1.0, %v3466_v6  ;;  %vm833_vm7 = vcmp.ge.f32.partialorder %v321_v48, 0.0  ;;  %v324_v55 = vld [vmem:[%s3581_s30 + $0x5d0] sm:$0xff] }
  0xb0   : > { %v325_v56 = vld [vmem:[%s3581_s30 + $0x5d8] sm:$0xff]  ;;  %2366 = vst [vmem:[%s3598_s17 + $0x5a0] sm:$0xff] %v2976_v52  ;;  %2367 = vst [vmem:[%s3598_s17 + $0x5a8] sm:$0xff] %v2977_v53  ;;  %v2979_v57 = vsel %vm833_vm7, 1.0, %v3466_v6  ;;  %vm834_vm8 = vcmp.ge.f32.partialorder %v322_v50, 0.0  ;;  %vm835_vm9 = vcmp.ge.f32.partialorder %v323_v51, 0.0 }
  0xb1   : > { %2368 = vst [vmem:[%s3598_s17 + $0x5b0] sm:$0xff] %v2978_v54  ;;  %vm836_vm10 = vcmp.ge.f32.partialorder %v324_v55, 0.0  ;;  %v326_v58 = vld [vmem:[%s3581_s30 + $0x5e0] sm:$0xff]  ;;  %v327_v59 = vld [vmem:[%s3581_s30 + $0x5e8] sm:$0xff]  ;;  %2369 = vst [vmem:[%s3598_s17 + $0x5b8] sm:$0xff] %v2979_v57  ;;  %v2980_v60 = vsel %vm834_vm8, 1.0, %v3466_v6 }
  0xb2   : > { %v2981_v61 = vsel %vm835_vm9, 1.0, %v3466_v6  ;;  %v2982_v62 = vsel %vm836_vm10, 1.0, %v3466_v6  ;;  %vm837_vm11 = vcmp.ge.f32.partialorder %v325_v56, 0.0  ;;  %v328_v63 = vld [vmem:[%s3581_s30 + $0x5f0] sm:$0xff]  ;;  %v329_v0 = vld [vmem:[%s3581_s30 + $0x5f8] sm:$0xff]  ;;  %2370 = vst [vmem:[%s3598_s17 + $0x5c0] sm:$0xff] %v2980_v60 }
  0xb3   : > { %2371 = vst [vmem:[%s3598_s17 + $0x5c8] sm:$0xff] %v2981_v61  ;;  %2372 = vst [vmem:[%s3598_s17 + $0x5d0] sm:$0xff] %v2982_v62  ;;  %v2983_v1 = vsel %vm837_vm11, 1.0, %v3466_v6  ;;  %vm838_vm12 = vcmp.ge.f32.partialorder %v326_v58, 0.0  ;;  %vm839_vm13 = vcmp.ge.f32.partialorder %v327_v59, 0.0  ;;  %vm840_vm14 = vcmp.ge.f32.partialorder %v328_v63, 0.0 }
  0xb4   : > { %v330_v2 = vld [vmem:[%s3581_s30 + $0x600] sm:$0xff]  ;;  %v331_v3 = vld [vmem:[%s3581_s30 + $0x608] sm:$0xff]  ;;  %2373 = vst [vmem:[%s3598_s17 + $0x5d8] sm:$0xff] %v2983_v1  ;;  %v2984_v4 = vsel %vm838_vm12, 1.0, %v3466_v6  ;;  %v2985_v5 = vsel %vm839_vm13, 1.0, %v3466_v6  ;;  %v2986_v7 = vsel %vm840_vm14, 1.0, %v3466_v6 }
  0xb5   : > { %vm841_vm15 = vcmp.ge.f32.partialorder %v329_v0, 0.0  ;;  %v332_v8 = vld [vmem:[%s3581_s30 + $0x610] sm:$0xff]  ;;  %v333_v9 = vld [vmem:[%s3581_s30 + $0x618] sm:$0xff]  ;;  %2374 = vst [vmem:[%s3598_s17 + $0x5e0] sm:$0xff] %v2984_v4  ;;  %2375 = vst [vmem:[%s3598_s17 + $0x5e8] sm:$0xff] %v2985_v5  ;;  %vm842_vm0 = vcmp.ge.f32.partialorder %v330_v2, 0.0 }
  0xb6   : > { %2376 = vst [vmem:[%s3598_s17 + $0x5f0] sm:$0xff] %v2986_v7  ;;  %v2987_v10 = vsel %vm841_vm15, 1.0, %v3466_v6  ;;  %vm843_vm1 = vcmp.ge.f32.partialorder %v331_v3, 0.0  ;;  %vm844_vm2 = vcmp.ge.f32.partialorder %v332_v8, 0.0  ;;  %v334_v11 = vld [vmem:[%s3581_s30 + $0x620] sm:$0xff]  ;;  %v335_v12 = vld [vmem:[%s3581_s30 + $0x628] sm:$0xff] }
  0xb7   : > { %2377 = vst [vmem:[%s3598_s17 + $0x5f8] sm:$0xff] %v2987_v10  ;;  %v2988_v13 = vsel %vm842_vm0, 1.0, %v3466_v6  ;;  %v2989_v14 = vsel %vm843_vm1, 1.0, %v3466_v6  ;;  %v2990_v15 = vsel %vm844_vm2, 1.0, %v3466_v6  ;;  %vm845_vm3 = vcmp.ge.f32.partialorder %v333_v9, 0.0  ;;  %v336_v16 = vld [vmem:[%s3581_s30 + $0x630] sm:$0xff] }
  0xb8   : > { %v337_v17 = vld [vmem:[%s3581_s30 + $0x638] sm:$0xff]  ;;  %2378 = vst [vmem:[%s3598_s17 + $0x600] sm:$0xff] %v2988_v13  ;;  %2379 = vst [vmem:[%s3598_s17 + $0x608] sm:$0xff] %v2989_v14  ;;  %v2991_v18 = vsel %vm845_vm3, 1.0, %v3466_v6  ;;  %vm846_vm4 = vcmp.ge.f32.partialorder %v334_v11, 0.0  ;;  %vm847_vm5 = vcmp.ge.f32.partialorder %v335_v12, 0.0 }
  0xb9   : > { %2380 = vst [vmem:[%s3598_s17 + $0x610] sm:$0xff] %v2990_v15  ;;  %vm848_vm6 = vcmp.ge.f32.partialorder %v336_v16, 0.0  ;;  %v338_v19 = vld [vmem:[%s3581_s30 + $0x640] sm:$0xff]  ;;  %v339_v20 = vld [vmem:[%s3581_s30 + $0x648] sm:$0xff]  ;;  %2381 = vst [vmem:[%s3598_s17 + $0x618] sm:$0xff] %v2991_v18  ;;  %v2992_v21 = vsel %vm846_vm4, 1.0, %v3466_v6 }
  0xba   : > { %v2993_v22 = vsel %vm847_vm5, 1.0, %v3466_v6  ;;  %v2994_v23 = vsel %vm848_vm6, 1.0, %v3466_v6  ;;  %vm849_vm7 = vcmp.ge.f32.partialorder %v337_v17, 0.0  ;;  %v340_v24 = vld [vmem:[%s3581_s30 + $0x650] sm:$0xff]  ;;  %v341_v25 = vld [vmem:[%s3581_s30 + $0x658] sm:$0xff]  ;;  %2382 = vst [vmem:[%s3598_s17 + $0x620] sm:$0xff] %v2992_v21 }
  0xbb   : > { %2383 = vst [vmem:[%s3598_s17 + $0x628] sm:$0xff] %v2993_v22  ;;  %2384 = vst [vmem:[%s3598_s17 + $0x630] sm:$0xff] %v2994_v23  ;;  %v2995_v26 = vsel %vm849_vm7, 1.0, %v3466_v6  ;;  %vm850_vm8 = vcmp.ge.f32.partialorder %v338_v19, 0.0  ;;  %vm851_vm9 = vcmp.ge.f32.partialorder %v339_v20, 0.0  ;;  %vm852_vm10 = vcmp.ge.f32.partialorder %v340_v24, 0.0 }
  0xbc   : > { %v342_v27 = vld [vmem:[%s3581_s30 + $0x660] sm:$0xff]  ;;  %v343_v28 = vld [vmem:[%s3581_s30 + $0x668] sm:$0xff]  ;;  %2385 = vst [vmem:[%s3598_s17 + $0x638] sm:$0xff] %v2995_v26  ;;  %v2996_v29 = vsel %vm850_vm8, 1.0, %v3466_v6  ;;  %v2997_v30 = vsel %vm851_vm9, 1.0, %v3466_v6  ;;  %v2998_v31 = vsel %vm852_vm10, 1.0, %v3466_v6 }
  0xbd   : > { %vm853_vm11 = vcmp.ge.f32.partialorder %v341_v25, 0.0  ;;  %v344_v32 = vld [vmem:[%s3581_s30 + $0x670] sm:$0xff]  ;;  %v345_v33 = vld [vmem:[%s3581_s30 + $0x678] sm:$0xff]  ;;  %2386 = vst [vmem:[%s3598_s17 + $0x640] sm:$0xff] %v2996_v29  ;;  %2387 = vst [vmem:[%s3598_s17 + $0x648] sm:$0xff] %v2997_v30  ;;  %vm854_vm12 = vcmp.ge.f32.partialorder %v342_v27, 0.0 }
  0xbe   : > { %2388 = vst [vmem:[%s3598_s17 + $0x650] sm:$0xff] %v2998_v31  ;;  %v2999_v34 = vsel %vm853_vm11, 1.0, %v3466_v6  ;;  %vm855_vm13 = vcmp.ge.f32.partialorder %v343_v28, 0.0  ;;  %vm856_vm14 = vcmp.ge.f32.partialorder %v344_v32, 0.0  ;;  %v346_v35 = vld [vmem:[%s3581_s30 + $0x680] sm:$0xff]  ;;  %v347_v36 = vld [vmem:[%s3581_s30 + $0x688] sm:$0xff] }
  0xbf   : > { %2389 = vst [vmem:[%s3598_s17 + $0x658] sm:$0xff] %v2999_v34  ;;  %v3000_v37 = vsel %vm854_vm12, 1.0, %v3466_v6  ;;  %v3001_v38 = vsel %vm855_vm13, 1.0, %v3466_v6  ;;  %v3002_v39 = vsel %vm856_vm14, 1.0, %v3466_v6  ;;  %vm857_vm15 = vcmp.ge.f32.partialorder %v345_v33, 0.0  ;;  %v348_v40 = vld [vmem:[%s3581_s30 + $0x690] sm:$0xff] }
  0xc0   : > { %v349_v41 = vld [vmem:[%s3581_s30 + $0x698] sm:$0xff]  ;;  %2390 = vst [vmem:[%s3598_s17 + $0x660] sm:$0xff] %v3000_v37  ;;  %2391 = vst [vmem:[%s3598_s17 + $0x668] sm:$0xff] %v3001_v38  ;;  %v3003_v42 = vsel %vm857_vm15, 1.0, %v3466_v6  ;;  %vm858_vm0 = vcmp.ge.f32.partialorder %v346_v35, 0.0  ;;  %vm859_vm1 = vcmp.ge.f32.partialorder %v347_v36, 0.0 }
  0xc1   : > { %2392 = vst [vmem:[%s3598_s17 + $0x670] sm:$0xff] %v3002_v39  ;;  %vm860_vm2 = vcmp.ge.f32.partialorder %v348_v40, 0.0  ;;  %v350_v43 = vld [vmem:[%s3581_s30 + $0x6a0] sm:$0xff]  ;;  %v351_v44 = vld [vmem:[%s3581_s30 + $0x6a8] sm:$0xff]  ;;  %2393 = vst [vmem:[%s3598_s17 + $0x678] sm:$0xff] %v3003_v42  ;;  %v3004_v45 = vsel %vm858_vm0, 1.0, %v3466_v6 }
  0xc2   : > { %v3005_v46 = vsel %vm859_vm1, 1.0, %v3466_v6  ;;  %v3006_v47 = vsel %vm860_vm2, 1.0, %v3466_v6  ;;  %vm861_vm3 = vcmp.ge.f32.partialorder %v349_v41, 0.0  ;;  %v352_v48 = vld [vmem:[%s3581_s30 + $0x6b0] sm:$0xff]  ;;  %v353_v49 = vld [vmem:[%s3581_s30 + $0x6b8] sm:$0xff]  ;;  %2394 = vst [vmem:[%s3598_s17 + $0x680] sm:$0xff] %v3004_v45 }
  0xc3   : > { %2395 = vst [vmem:[%s3598_s17 + $0x688] sm:$0xff] %v3005_v46  ;;  %2396 = vst [vmem:[%s3598_s17 + $0x690] sm:$0xff] %v3006_v47  ;;  %v3007_v50 = vsel %vm861_vm3, 1.0, %v3466_v6  ;;  %vm862_vm4 = vcmp.ge.f32.partialorder %v350_v43, 0.0  ;;  %vm863_vm5 = vcmp.ge.f32.partialorder %v351_v44, 0.0  ;;  %vm864_vm6 = vcmp.ge.f32.partialorder %v352_v48, 0.0 }
  0xc4   : > { %v354_v51 = vld [vmem:[%s3581_s30 + $0x6c0] sm:$0xff]  ;;  %v355_v52 = vld [vmem:[%s3581_s30 + $0x6c8] sm:$0xff]  ;;  %2397 = vst [vmem:[%s3598_s17 + $0x698] sm:$0xff] %v3007_v50  ;;  %v3008_v53 = vsel %vm862_vm4, 1.0, %v3466_v6  ;;  %v3009_v54 = vsel %vm863_vm5, 1.0, %v3466_v6  ;;  %v3010_v55 = vsel %vm864_vm6, 1.0, %v3466_v6 }
  0xc5   : > { %vm865_vm7 = vcmp.ge.f32.partialorder %v353_v49, 0.0  ;;  %v356_v56 = vld [vmem:[%s3581_s30 + $0x6d0] sm:$0xff]  ;;  %v357_v57 = vld [vmem:[%s3581_s30 + $0x6d8] sm:$0xff]  ;;  %2398 = vst [vmem:[%s3598_s17 + $0x6a0] sm:$0xff] %v3008_v53  ;;  %2399 = vst [vmem:[%s3598_s17 + $0x6a8] sm:$0xff] %v3009_v54  ;;  %vm866_vm8 = vcmp.ge.f32.partialorder %v354_v51, 0.0 }
  0xc6   : > { %2400 = vst [vmem:[%s3598_s17 + $0x6b0] sm:$0xff] %v3010_v55  ;;  %v3011_v58 = vsel %vm865_vm7, 1.0, %v3466_v6  ;;  %vm867_vm9 = vcmp.ge.f32.partialorder %v355_v52, 0.0  ;;  %vm868_vm10 = vcmp.ge.f32.partialorder %v356_v56, 0.0  ;;  %v358_v59 = vld [vmem:[%s3581_s30 + $0x6e0] sm:$0xff]  ;;  %v359_v60 = vld [vmem:[%s3581_s30 + $0x6e8] sm:$0xff] }
  0xc7   : > { %2401 = vst [vmem:[%s3598_s17 + $0x6b8] sm:$0xff] %v3011_v58  ;;  %v3012_v61 = vsel %vm866_vm8, 1.0, %v3466_v6  ;;  %v3013_v62 = vsel %vm867_vm9, 1.0, %v3466_v6  ;;  %v3014_v63 = vsel %vm868_vm10, 1.0, %v3466_v6  ;;  %vm869_vm11 = vcmp.ge.f32.partialorder %v357_v57, 0.0  ;;  %v360_v0 = vld [vmem:[%s3581_s30 + $0x6f0] sm:$0xff] }
  0xc8   : > { %v361_v1 = vld [vmem:[%s3581_s30 + $0x6f8] sm:$0xff]  ;;  %2402 = vst [vmem:[%s3598_s17 + $0x6c0] sm:$0xff] %v3012_v61  ;;  %2403 = vst [vmem:[%s3598_s17 + $0x6c8] sm:$0xff] %v3013_v62  ;;  %v3015_v2 = vsel %vm869_vm11, 1.0, %v3466_v6  ;;  %vm870_vm12 = vcmp.ge.f32.partialorder %v358_v59, 0.0  ;;  %vm871_vm13 = vcmp.ge.f32.partialorder %v359_v60, 0.0 }
  0xc9   : > { %2404 = vst [vmem:[%s3598_s17 + $0x6d0] sm:$0xff] %v3014_v63  ;;  %vm872_vm14 = vcmp.ge.f32.partialorder %v360_v0, 0.0  ;;  %v362_v3 = vld [vmem:[%s3581_s30 + $0x700] sm:$0xff]  ;;  %v363_v4 = vld [vmem:[%s3581_s30 + $0x708] sm:$0xff]  ;;  %2405 = vst [vmem:[%s3598_s17 + $0x6d8] sm:$0xff] %v3015_v2  ;;  %v3016_v5 = vsel %vm870_vm12, 1.0, %v3466_v6 }
  0xca   : > { %v3017_v7 = vsel %vm871_vm13, 1.0, %v3466_v6  ;;  %v3018_v8 = vsel %vm872_vm14, 1.0, %v3466_v6  ;;  %vm873_vm15 = vcmp.ge.f32.partialorder %v361_v1, 0.0  ;;  %v364_v9 = vld [vmem:[%s3581_s30 + $0x710] sm:$0xff]  ;;  %v365_v10 = vld [vmem:[%s3581_s30 + $0x718] sm:$0xff]  ;;  %2406 = vst [vmem:[%s3598_s17 + $0x6e0] sm:$0xff] %v3016_v5 }
  0xcb   : > { %2407 = vst [vmem:[%s3598_s17 + $0x6e8] sm:$0xff] %v3017_v7  ;;  %2408 = vst [vmem:[%s3598_s17 + $0x6f0] sm:$0xff] %v3018_v8  ;;  %v3019_v11 = vsel %vm873_vm15, 1.0, %v3466_v6  ;;  %vm874_vm0 = vcmp.ge.f32.partialorder %v362_v3, 0.0  ;;  %vm875_vm1 = vcmp.ge.f32.partialorder %v363_v4, 0.0  ;;  %vm876_vm2 = vcmp.ge.f32.partialorder %v364_v9, 0.0 }
  0xcc   : > { %v366_v12 = vld [vmem:[%s3581_s30 + $0x720] sm:$0xff]  ;;  %v367_v13 = vld [vmem:[%s3581_s30 + $0x728] sm:$0xff]  ;;  %2409 = vst [vmem:[%s3598_s17 + $0x6f8] sm:$0xff] %v3019_v11  ;;  %v3020_v14 = vsel %vm874_vm0, 1.0, %v3466_v6  ;;  %v3021_v15 = vsel %vm875_vm1, 1.0, %v3466_v6  ;;  %v3022_v16 = vsel %vm876_vm2, 1.0, %v3466_v6 }
  0xcd   : > { %vm877_vm3 = vcmp.ge.f32.partialorder %v365_v10, 0.0  ;;  %v368_v17 = vld [vmem:[%s3581_s30 + $0x730] sm:$0xff]  ;;  %v369_v18 = vld [vmem:[%s3581_s30 + $0x738] sm:$0xff]  ;;  %2410 = vst [vmem:[%s3598_s17 + $0x700] sm:$0xff] %v3020_v14  ;;  %2411 = vst [vmem:[%s3598_s17 + $0x708] sm:$0xff] %v3021_v15  ;;  %vm878_vm4 = vcmp.ge.f32.partialorder %v366_v12, 0.0 }
  0xce   : > { %2412 = vst [vmem:[%s3598_s17 + $0x710] sm:$0xff] %v3022_v16  ;;  %v3023_v19 = vsel %vm877_vm3, 1.0, %v3466_v6  ;;  %vm879_vm5 = vcmp.ge.f32.partialorder %v367_v13, 0.0  ;;  %vm880_vm6 = vcmp.ge.f32.partialorder %v368_v17, 0.0  ;;  %v370_v20 = vld [vmem:[%s3581_s30 + $0x740] sm:$0xff]  ;;  %v371_v21 = vld [vmem:[%s3581_s30 + $0x748] sm:$0xff] }
  0xcf   : > { %2413 = vst [vmem:[%s3598_s17 + $0x718] sm:$0xff] %v3023_v19  ;;  %v3024_v22 = vsel %vm878_vm4, 1.0, %v3466_v6  ;;  %v3025_v23 = vsel %vm879_vm5, 1.0, %v3466_v6  ;;  %v3026_v24 = vsel %vm880_vm6, 1.0, %v3466_v6  ;;  %vm881_vm7 = vcmp.ge.f32.partialorder %v369_v18, 0.0  ;;  %v372_v25 = vld [vmem:[%s3581_s30 + $0x750] sm:$0xff] }
  0xd0   : > { %v373_v26 = vld [vmem:[%s3581_s30 + $0x758] sm:$0xff]  ;;  %2414 = vst [vmem:[%s3598_s17 + $0x720] sm:$0xff] %v3024_v22  ;;  %2415 = vst [vmem:[%s3598_s17 + $0x728] sm:$0xff] %v3025_v23  ;;  %v3027_v27 = vsel %vm881_vm7, 1.0, %v3466_v6  ;;  %vm882_vm8 = vcmp.ge.f32.partialorder %v370_v20, 0.0  ;;  %vm883_vm9 = vcmp.ge.f32.partialorder %v371_v21, 0.0 }
  0xd1   : > { %2416 = vst [vmem:[%s3598_s17 + $0x730] sm:$0xff] %v3026_v24  ;;  %vm884_vm10 = vcmp.ge.f32.partialorder %v372_v25, 0.0  ;;  %v374_v28 = vld [vmem:[%s3581_s30 + $0x760] sm:$0xff]  ;;  %v375_v29 = vld [vmem:[%s3581_s30 + $0x768] sm:$0xff]  ;;  %2417 = vst [vmem:[%s3598_s17 + $0x738] sm:$0xff] %v3027_v27  ;;  %v3028_v30 = vsel %vm882_vm8, 1.0, %v3466_v6 }
  0xd2   : > { %v3029_v31 = vsel %vm883_vm9, 1.0, %v3466_v6  ;;  %v3030_v32 = vsel %vm884_vm10, 1.0, %v3466_v6  ;;  %vm885_vm11 = vcmp.ge.f32.partialorder %v373_v26, 0.0  ;;  %v376_v33 = vld [vmem:[%s3581_s30 + $0x770] sm:$0xff]  ;;  %v377_v34 = vld [vmem:[%s3581_s30 + $0x778] sm:$0xff]  ;;  %2418 = vst [vmem:[%s3598_s17 + $0x740] sm:$0xff] %v3028_v30 }
  0xd3   : > { %2419 = vst [vmem:[%s3598_s17 + $0x748] sm:$0xff] %v3029_v31  ;;  %2420 = vst [vmem:[%s3598_s17 + $0x750] sm:$0xff] %v3030_v32  ;;  %v3031_v35 = vsel %vm885_vm11, 1.0, %v3466_v6  ;;  %vm886_vm12 = vcmp.ge.f32.partialorder %v374_v28, 0.0  ;;  %vm887_vm13 = vcmp.ge.f32.partialorder %v375_v29, 0.0  ;;  %vm888_vm14 = vcmp.ge.f32.partialorder %v376_v33, 0.0 }
  0xd4   : > { %v378_v36 = vld [vmem:[%s3581_s30 + $0x780] sm:$0xff]  ;;  %v379_v37 = vld [vmem:[%s3581_s30 + $0x788] sm:$0xff]  ;;  %2421 = vst [vmem:[%s3598_s17 + $0x758] sm:$0xff] %v3031_v35  ;;  %v3032_v38 = vsel %vm886_vm12, 1.0, %v3466_v6  ;;  %v3033_v39 = vsel %vm887_vm13, 1.0, %v3466_v6  ;;  %v3034_v40 = vsel %vm888_vm14, 1.0, %v3466_v6 }
  0xd5   : > { %vm889_vm15 = vcmp.ge.f32.partialorder %v377_v34, 0.0  ;;  %v380_v41 = vld [vmem:[%s3581_s30 + $0x790] sm:$0xff]  ;;  %v381_v42 = vld [vmem:[%s3581_s30 + $0x798] sm:$0xff]  ;;  %2422 = vst [vmem:[%s3598_s17 + $0x760] sm:$0xff] %v3032_v38  ;;  %2423 = vst [vmem:[%s3598_s17 + $0x768] sm:$0xff] %v3033_v39  ;;  %vm890_vm0 = vcmp.ge.f32.partialorder %v378_v36, 0.0 }
  0xd6   : > { %2424 = vst [vmem:[%s3598_s17 + $0x770] sm:$0xff] %v3034_v40  ;;  %v3035_v43 = vsel %vm889_vm15, 1.0, %v3466_v6  ;;  %vm891_vm1 = vcmp.ge.f32.partialorder %v379_v37, 0.0  ;;  %vm892_vm2 = vcmp.ge.f32.partialorder %v380_v41, 0.0  ;;  %v382_v44 = vld [vmem:[%s3581_s30 + $0x7a0] sm:$0xff]  ;;  %v383_v45 = vld [vmem:[%s3581_s30 + $0x7a8] sm:$0xff] }
  0xd7   : > { %2425 = vst [vmem:[%s3598_s17 + $0x778] sm:$0xff] %v3035_v43  ;;  %v3036_v46 = vsel %vm890_vm0, 1.0, %v3466_v6  ;;  %v3037_v47 = vsel %vm891_vm1, 1.0, %v3466_v6  ;;  %v3038_v48 = vsel %vm892_vm2, 1.0, %v3466_v6  ;;  %vm893_vm3 = vcmp.ge.f32.partialorder %v381_v42, 0.0  ;;  %v384_v49 = vld [vmem:[%s3581_s30 + $0x7b0] sm:$0xff] }
  0xd8   : > { %v385_v50 = vld [vmem:[%s3581_s30 + $0x7b8] sm:$0xff]  ;;  %2426 = vst [vmem:[%s3598_s17 + $0x780] sm:$0xff] %v3036_v46  ;;  %2427 = vst [vmem:[%s3598_s17 + $0x788] sm:$0xff] %v3037_v47  ;;  %v3039_v51 = vsel %vm893_vm3, 1.0, %v3466_v6  ;;  %vm894_vm4 = vcmp.ge.f32.partialorder %v382_v44, 0.0  ;;  %vm895_vm5 = vcmp.ge.f32.partialorder %v383_v45, 0.0 }
  0xd9   : > { %2428 = vst [vmem:[%s3598_s17 + $0x790] sm:$0xff] %v3038_v48  ;;  %vm896_vm6 = vcmp.ge.f32.partialorder %v384_v49, 0.0  ;;  %v386_v52 = vld [vmem:[%s3581_s30 + $0x7c0] sm:$0xff]  ;;  %v387_v53 = vld [vmem:[%s3581_s30 + $0x7c8] sm:$0xff]  ;;  %2429 = vst [vmem:[%s3598_s17 + $0x798] sm:$0xff] %v3039_v51  ;;  %v3040_v54 = vsel %vm894_vm4, 1.0, %v3466_v6 }
  0xda   : > { %v3041_v55 = vsel %vm895_vm5, 1.0, %v3466_v6  ;;  %v3042_v56 = vsel %vm896_vm6, 1.0, %v3466_v6  ;;  %vm897_vm7 = vcmp.ge.f32.partialorder %v385_v50, 0.0  ;;  %v388_v57 = vld [vmem:[%s3581_s30 + $0x7d0] sm:$0xff]  ;;  %v389_v58 = vld [vmem:[%s3581_s30 + $0x7d8] sm:$0xff]  ;;  %2430 = vst [vmem:[%s3598_s17 + $0x7a0] sm:$0xff] %v3040_v54 }
  0xdb   : > { %2431 = vst [vmem:[%s3598_s17 + $0x7a8] sm:$0xff] %v3041_v55  ;;  %2432 = vst [vmem:[%s3598_s17 + $0x7b0] sm:$0xff] %v3042_v56  ;;  %v3043_v59 = vsel %vm897_vm7, 1.0, %v3466_v6  ;;  %vm898_vm8 = vcmp.ge.f32.partialorder %v386_v52, 0.0  ;;  %vm899_vm9 = vcmp.ge.f32.partialorder %v387_v53, 0.0  ;;  %vm900_vm10 = vcmp.ge.f32.partialorder %v388_v57, 0.0 }
  0xdc   : > { %v390_v60 = vld [vmem:[%s3581_s30 + $0x7e0] sm:$0xff]  ;;  %v391_v61 = vld [vmem:[%s3581_s30 + $0x7e8] sm:$0xff]  ;;  %2433 = vst [vmem:[%s3598_s17 + $0x7b8] sm:$0xff] %v3043_v59  ;;  %v3044_v62 = vsel %vm898_vm8, 1.0, %v3466_v6  ;;  %v3045_v63 = vsel %vm899_vm9, 1.0, %v3466_v6  ;;  %v3046_v0 = vsel %vm900_vm10, 1.0, %v3466_v6 }
  0xdd   : > { %vm901_vm11 = vcmp.ge.f32.partialorder %v389_v58, 0.0  ;;  %v392_v1 = vld [vmem:[%s3581_s30 + $0x7f0] sm:$0xff]  ;;  %v393_v2 = vld [vmem:[%s3581_s30 + $0x7f8] sm:$0xff]  ;;  %2434 = vst [vmem:[%s3598_s17 + $0x7c0] sm:$0xff] %v3044_v62  ;;  %2435 = vst [vmem:[%s3598_s17 + $0x7c8] sm:$0xff] %v3045_v63  ;;  %vm902_vm12 = vcmp.ge.f32.partialorder %v390_v60, 0.0 }
  0xde   : > { %2436 = vst [vmem:[%s3598_s17 + $0x7d0] sm:$0xff] %v3046_v0  ;;  %v3047_v3 = vsel %vm901_vm11, 1.0, %v3466_v6  ;;  %vm903_vm13 = vcmp.ge.f32.partialorder %v391_v61, 0.0  ;;  %vm904_vm14 = vcmp.ge.f32.partialorder %v392_v1, 0.0  ;;  %v394_v4 = vld [vmem:[%s3581_s30 + $0x800] sm:$0xff]  ;;  %v395_v5 = vld [vmem:[%s3581_s30 + $0x808] sm:$0xff] }
  0xdf   : > { %2437 = vst [vmem:[%s3598_s17 + $0x7d8] sm:$0xff] %v3047_v3  ;;  %v3048_v7 = vsel %vm902_vm12, 1.0, %v3466_v6  ;;  %v3049_v8 = vsel %vm903_vm13, 1.0, %v3466_v6  ;;  %v3050_v9 = vsel %vm904_vm14, 1.0, %v3466_v6  ;;  %vm905_vm15 = vcmp.ge.f32.partialorder %v393_v2, 0.0  ;;  %v396_v10 = vld [vmem:[%s3581_s30 + $0x810] sm:$0xff] }
  0xe0   : > { %v397_v11 = vld [vmem:[%s3581_s30 + $0x818] sm:$0xff]  ;;  %2438 = vst [vmem:[%s3598_s17 + $0x7e0] sm:$0xff] %v3048_v7  ;;  %2439 = vst [vmem:[%s3598_s17 + $0x7e8] sm:$0xff] %v3049_v8  ;;  %v3051_v12 = vsel %vm905_vm15, 1.0, %v3466_v6  ;;  %vm906_vm0 = vcmp.ge.f32.partialorder %v394_v4, 0.0  ;;  %vm907_vm1 = vcmp.ge.f32.partialorder %v395_v5, 0.0 }
  0xe1   : > { %2440 = vst [vmem:[%s3598_s17 + $0x7f0] sm:$0xff] %v3050_v9  ;;  %vm908_vm2 = vcmp.ge.f32.partialorder %v396_v10, 0.0  ;;  %v398_v13 = vld [vmem:[%s3581_s30 + $0x820] sm:$0xff]  ;;  %v399_v14 = vld [vmem:[%s3581_s30 + $0x828] sm:$0xff]  ;;  %2441 = vst [vmem:[%s3598_s17 + $0x7f8] sm:$0xff] %v3051_v12  ;;  %v3052_v15 = vsel %vm906_vm0, 1.0, %v3466_v6 }
  0xe2   : > { %v3053_v16 = vsel %vm907_vm1, 1.0, %v3466_v6  ;;  %v3054_v17 = vsel %vm908_vm2, 1.0, %v3466_v6  ;;  %vm909_vm3 = vcmp.ge.f32.partialorder %v397_v11, 0.0  ;;  %v400_v18 = vld [vmem:[%s3581_s30 + $0x830] sm:$0xff]  ;;  %v401_v19 = vld [vmem:[%s3581_s30 + $0x838] sm:$0xff]  ;;  %2442 = vst [vmem:[%s3598_s17 + $0x800] sm:$0xff] %v3052_v15 }
  0xe3   : > { %2443 = vst [vmem:[%s3598_s17 + $0x808] sm:$0xff] %v3053_v16  ;;  %2444 = vst [vmem:[%s3598_s17 + $0x810] sm:$0xff] %v3054_v17  ;;  %v3055_v20 = vsel %vm909_vm3, 1.0, %v3466_v6  ;;  %vm910_vm4 = vcmp.ge.f32.partialorder %v398_v13, 0.0  ;;  %vm911_vm5 = vcmp.ge.f32.partialorder %v399_v14, 0.0  ;;  %vm912_vm6 = vcmp.ge.f32.partialorder %v400_v18, 0.0 }
  0xe4   : > { %v402_v21 = vld [vmem:[%s3581_s30 + $0x840] sm:$0xff]  ;;  %v403_v22 = vld [vmem:[%s3581_s30 + $0x848] sm:$0xff]  ;;  %2445 = vst [vmem:[%s3598_s17 + $0x818] sm:$0xff] %v3055_v20  ;;  %v3056_v23 = vsel %vm910_vm4, 1.0, %v3466_v6  ;;  %v3057_v24 = vsel %vm911_vm5, 1.0, %v3466_v6  ;;  %v3058_v25 = vsel %vm912_vm6, 1.0, %v3466_v6 }
  0xe5   : > { %vm913_vm7 = vcmp.ge.f32.partialorder %v401_v19, 0.0  ;;  %v404_v26 = vld [vmem:[%s3581_s30 + $0x850] sm:$0xff]  ;;  %v405_v27 = vld [vmem:[%s3581_s30 + $0x858] sm:$0xff]  ;;  %2446 = vst [vmem:[%s3598_s17 + $0x820] sm:$0xff] %v3056_v23  ;;  %2447 = vst [vmem:[%s3598_s17 + $0x828] sm:$0xff] %v3057_v24  ;;  %vm914_vm8 = vcmp.ge.f32.partialorder %v402_v21, 0.0 }
  0xe6   : > { %2448 = vst [vmem:[%s3598_s17 + $0x830] sm:$0xff] %v3058_v25  ;;  %v3059_v28 = vsel %vm913_vm7, 1.0, %v3466_v6  ;;  %vm915_vm9 = vcmp.ge.f32.partialorder %v403_v22, 0.0  ;;  %vm916_vm10 = vcmp.ge.f32.partialorder %v404_v26, 0.0  ;;  %v406_v29 = vld [vmem:[%s3581_s30 + $0x860] sm:$0xff]  ;;  %v407_v30 = vld [vmem:[%s3581_s30 + $0x868] sm:$0xff] }
  0xe7   : > { %2449 = vst [vmem:[%s3598_s17 + $0x838] sm:$0xff] %v3059_v28  ;;  %v3060_v31 = vsel %vm914_vm8, 1.0, %v3466_v6  ;;  %v3061_v32 = vsel %vm915_vm9, 1.0, %v3466_v6  ;;  %v3062_v33 = vsel %vm916_vm10, 1.0, %v3466_v6  ;;  %vm917_vm11 = vcmp.ge.f32.partialorder %v405_v27, 0.0  ;;  %v408_v34 = vld [vmem:[%s3581_s30 + $0x870] sm:$0xff] }
  0xe8   : > { %v409_v35 = vld [vmem:[%s3581_s30 + $0x878] sm:$0xff]  ;;  %2450 = vst [vmem:[%s3598_s17 + $0x840] sm:$0xff] %v3060_v31  ;;  %2451 = vst [vmem:[%s3598_s17 + $0x848] sm:$0xff] %v3061_v32  ;;  %v3063_v36 = vsel %vm917_vm11, 1.0, %v3466_v6  ;;  %vm918_vm12 = vcmp.ge.f32.partialorder %v406_v29, 0.0  ;;  %vm919_vm13 = vcmp.ge.f32.partialorder %v407_v30, 0.0 }
  0xe9   : > { %2452 = vst [vmem:[%s3598_s17 + $0x850] sm:$0xff] %v3062_v33  ;;  %vm920_vm14 = vcmp.ge.f32.partialorder %v408_v34, 0.0  ;;  %v410_v37 = vld [vmem:[%s3581_s30 + $0x880] sm:$0xff]  ;;  %v411_v38 = vld [vmem:[%s3581_s30 + $0x888] sm:$0xff]  ;;  %2453 = vst [vmem:[%s3598_s17 + $0x858] sm:$0xff] %v3063_v36  ;;  %v3064_v39 = vsel %vm918_vm12, 1.0, %v3466_v6 }
  0xea   : > { %v3065_v40 = vsel %vm919_vm13, 1.0, %v3466_v6  ;;  %v3066_v41 = vsel %vm920_vm14, 1.0, %v3466_v6  ;;  %vm921_vm15 = vcmp.ge.f32.partialorder %v409_v35, 0.0  ;;  %v412_v42 = vld [vmem:[%s3581_s30 + $0x890] sm:$0xff]  ;;  %v413_v43 = vld [vmem:[%s3581_s30 + $0x898] sm:$0xff]  ;;  %2454 = vst [vmem:[%s3598_s17 + $0x860] sm:$0xff] %v3064_v39 }
  0xeb   : > { %2455 = vst [vmem:[%s3598_s17 + $0x868] sm:$0xff] %v3065_v40  ;;  %2456 = vst [vmem:[%s3598_s17 + $0x870] sm:$0xff] %v3066_v41  ;;  %v3067_v44 = vsel %vm921_vm15, 1.0, %v3466_v6  ;;  %vm922_vm0 = vcmp.ge.f32.partialorder %v410_v37, 0.0  ;;  %vm923_vm1 = vcmp.ge.f32.partialorder %v411_v38, 0.0  ;;  %vm924_vm2 = vcmp.ge.f32.partialorder %v412_v42, 0.0 }
  0xec   : > { %v414_v45 = vld [vmem:[%s3581_s30 + $0x8a0] sm:$0xff]  ;;  %v415_v46 = vld [vmem:[%s3581_s30 + $0x8a8] sm:$0xff]  ;;  %2457 = vst [vmem:[%s3598_s17 + $0x878] sm:$0xff] %v3067_v44  ;;  %v3068_v47 = vsel %vm922_vm0, 1.0, %v3466_v6  ;;  %v3069_v48 = vsel %vm923_vm1, 1.0, %v3466_v6  ;;  %v3070_v49 = vsel %vm924_vm2, 1.0, %v3466_v6 }
  0xed   : > { %vm925_vm3 = vcmp.ge.f32.partialorder %v413_v43, 0.0  ;;  %v416_v50 = vld [vmem:[%s3581_s30 + $0x8b0] sm:$0xff]  ;;  %v417_v51 = vld [vmem:[%s3581_s30 + $0x8b8] sm:$0xff]  ;;  %2458 = vst [vmem:[%s3598_s17 + $0x880] sm:$0xff] %v3068_v47  ;;  %2459 = vst [vmem:[%s3598_s17 + $0x888] sm:$0xff] %v3069_v48  ;;  %vm926_vm4 = vcmp.ge.f32.partialorder %v414_v45, 0.0 }
  0xee   : > { %2460 = vst [vmem:[%s3598_s17 + $0x890] sm:$0xff] %v3070_v49  ;;  %v3071_v52 = vsel %vm925_vm3, 1.0, %v3466_v6  ;;  %vm927_vm5 = vcmp.ge.f32.partialorder %v415_v46, 0.0  ;;  %vm928_vm6 = vcmp.ge.f32.partialorder %v416_v50, 0.0  ;;  %v418_v53 = vld [vmem:[%s3581_s30 + $0x8c0] sm:$0xff]  ;;  %v419_v54 = vld [vmem:[%s3581_s30 + $0x8c8] sm:$0xff] }
  0xef   : > { %2461 = vst [vmem:[%s3598_s17 + $0x898] sm:$0xff] %v3071_v52  ;;  %v3072_v55 = vsel %vm926_vm4, 1.0, %v3466_v6  ;;  %v3073_v56 = vsel %vm927_vm5, 1.0, %v3466_v6  ;;  %v3074_v57 = vsel %vm928_vm6, 1.0, %v3466_v6  ;;  %vm929_vm7 = vcmp.ge.f32.partialorder %v417_v51, 0.0  ;;  %v420_v58 = vld [vmem:[%s3581_s30 + $0x8d0] sm:$0xff] }
  0xf0   : > { %v421_v59 = vld [vmem:[%s3581_s30 + $0x8d8] sm:$0xff]  ;;  %2462 = vst [vmem:[%s3598_s17 + $0x8a0] sm:$0xff] %v3072_v55  ;;  %2463 = vst [vmem:[%s3598_s17 + $0x8a8] sm:$0xff] %v3073_v56  ;;  %v3075_v60 = vsel %vm929_vm7, 1.0, %v3466_v6  ;;  %vm930_vm8 = vcmp.ge.f32.partialorder %v418_v53, 0.0  ;;  %vm931_vm9 = vcmp.ge.f32.partialorder %v419_v54, 0.0 }
  0xf1   : > { %2464 = vst [vmem:[%s3598_s17 + $0x8b0] sm:$0xff] %v3074_v57  ;;  %vm932_vm10 = vcmp.ge.f32.partialorder %v420_v58, 0.0  ;;  %v422_v61 = vld [vmem:[%s3581_s30 + $0x8e0] sm:$0xff]  ;;  %v423_v62 = vld [vmem:[%s3581_s30 + $0x8e8] sm:$0xff]  ;;  %2465 = vst [vmem:[%s3598_s17 + $0x8b8] sm:$0xff] %v3075_v60  ;;  %v3076_v63 = vsel %vm930_vm8, 1.0, %v3466_v6 }
  0xf2   : > { %v3077_v0 = vsel %vm931_vm9, 1.0, %v3466_v6  ;;  %v3078_v1 = vsel %vm932_vm10, 1.0, %v3466_v6  ;;  %vm933_vm11 = vcmp.ge.f32.partialorder %v421_v59, 0.0  ;;  %v424_v2 = vld [vmem:[%s3581_s30 + $0x8f0] sm:$0xff]  ;;  %v425_v3 = vld [vmem:[%s3581_s30 + $0x8f8] sm:$0xff]  ;;  %2466 = vst [vmem:[%s3598_s17 + $0x8c0] sm:$0xff] %v3076_v63 }
  0xf3   : > { %2467 = vst [vmem:[%s3598_s17 + $0x8c8] sm:$0xff] %v3077_v0  ;;  %2468 = vst [vmem:[%s3598_s17 + $0x8d0] sm:$0xff] %v3078_v1  ;;  %v3079_v4 = vsel %vm933_vm11, 1.0, %v3466_v6  ;;  %vm934_vm12 = vcmp.ge.f32.partialorder %v422_v61, 0.0  ;;  %vm935_vm13 = vcmp.ge.f32.partialorder %v423_v62, 0.0  ;;  %vm936_vm14 = vcmp.ge.f32.partialorder %v424_v2, 0.0 }
  0xf4   : > { %v426_v5 = vld [vmem:[%s3581_s30 + $0x900] sm:$0xff]  ;;  %v427_v7 = vld [vmem:[%s3581_s30 + $0x908] sm:$0xff]  ;;  %2469 = vst [vmem:[%s3598_s17 + $0x8d8] sm:$0xff] %v3079_v4  ;;  %v3080_v8 = vsel %vm934_vm12, 1.0, %v3466_v6  ;;  %v3081_v9 = vsel %vm935_vm13, 1.0, %v3466_v6  ;;  %v3082_v10 = vsel %vm936_vm14, 1.0, %v3466_v6 }
  0xf5   : > { %vm937_vm15 = vcmp.ge.f32.partialorder %v425_v3, 0.0  ;;  %v428_v11 = vld [vmem:[%s3581_s30 + $0x910] sm:$0xff]  ;;  %v429_v12 = vld [vmem:[%s3581_s30 + $0x918] sm:$0xff]  ;;  %2470 = vst [vmem:[%s3598_s17 + $0x8e0] sm:$0xff] %v3080_v8  ;;  %2471 = vst [vmem:[%s3598_s17 + $0x8e8] sm:$0xff] %v3081_v9  ;;  %vm938_vm0 = vcmp.ge.f32.partialorder %v426_v5, 0.0 }
  0xf6   : > { %2472 = vst [vmem:[%s3598_s17 + $0x8f0] sm:$0xff] %v3082_v10  ;;  %v3083_v13 = vsel %vm937_vm15, 1.0, %v3466_v6  ;;  %vm939_vm1 = vcmp.ge.f32.partialorder %v427_v7, 0.0  ;;  %vm940_vm2 = vcmp.ge.f32.partialorder %v428_v11, 0.0  ;;  %v430_v14 = vld [vmem:[%s3581_s30 + $0x920] sm:$0xff]  ;;  %v431_v15 = vld [vmem:[%s3581_s30 + $0x928] sm:$0xff] }
  0xf7   : > { %2473 = vst [vmem:[%s3598_s17 + $0x8f8] sm:$0xff] %v3083_v13  ;;  %v3084_v16 = vsel %vm938_vm0, 1.0, %v3466_v6  ;;  %v3085_v17 = vsel %vm939_vm1, 1.0, %v3466_v6  ;;  %v3086_v18 = vsel %vm940_vm2, 1.0, %v3466_v6  ;;  %vm941_vm3 = vcmp.ge.f32.partialorder %v429_v12, 0.0  ;;  %v432_v19 = vld [vmem:[%s3581_s30 + $0x930] sm:$0xff] }
  0xf8   : > { %v433_v20 = vld [vmem:[%s3581_s30 + $0x938] sm:$0xff]  ;;  %2474 = vst [vmem:[%s3598_s17 + $0x900] sm:$0xff] %v3084_v16  ;;  %2475 = vst [vmem:[%s3598_s17 + $0x908] sm:$0xff] %v3085_v17  ;;  %v3087_v21 = vsel %vm941_vm3, 1.0, %v3466_v6  ;;  %vm942_vm4 = vcmp.ge.f32.partialorder %v430_v14, 0.0  ;;  %vm943_vm5 = vcmp.ge.f32.partialorder %v431_v15, 0.0 }
  0xf9   : > { %2476 = vst [vmem:[%s3598_s17 + $0x910] sm:$0xff] %v3086_v18  ;;  %vm944_vm6 = vcmp.ge.f32.partialorder %v432_v19, 0.0  ;;  %v434_v22 = vld [vmem:[%s3581_s30 + $0x940] sm:$0xff]  ;;  %v435_v23 = vld [vmem:[%s3581_s30 + $0x948] sm:$0xff]  ;;  %2477 = vst [vmem:[%s3598_s17 + $0x918] sm:$0xff] %v3087_v21  ;;  %v3088_v24 = vsel %vm942_vm4, 1.0, %v3466_v6 }
  0xfa   : > { %v3089_v25 = vsel %vm943_vm5, 1.0, %v3466_v6  ;;  %v3090_v26 = vsel %vm944_vm6, 1.0, %v3466_v6  ;;  %vm945_vm7 = vcmp.ge.f32.partialorder %v433_v20, 0.0  ;;  %v436_v27 = vld [vmem:[%s3581_s30 + $0x950] sm:$0xff]  ;;  %v437_v28 = vld [vmem:[%s3581_s30 + $0x958] sm:$0xff]  ;;  %2478 = vst [vmem:[%s3598_s17 + $0x920] sm:$0xff] %v3088_v24 }
  0xfb   : > { %2479 = vst [vmem:[%s3598_s17 + $0x928] sm:$0xff] %v3089_v25  ;;  %2480 = vst [vmem:[%s3598_s17 + $0x930] sm:$0xff] %v3090_v26  ;;  %v3091_v29 = vsel %vm945_vm7, 1.0, %v3466_v6  ;;  %vm946_vm8 = vcmp.ge.f32.partialorder %v434_v22, 0.0  ;;  %vm947_vm9 = vcmp.ge.f32.partialorder %v435_v23, 0.0  ;;  %vm948_vm10 = vcmp.ge.f32.partialorder %v436_v27, 0.0 }
  0xfc   : > { %v438_v30 = vld [vmem:[%s3581_s30 + $0x960] sm:$0xff]  ;;  %v439_v31 = vld [vmem:[%s3581_s30 + $0x968] sm:$0xff]  ;;  %2481 = vst [vmem:[%s3598_s17 + $0x938] sm:$0xff] %v3091_v29  ;;  %v3092_v32 = vsel %vm946_vm8, 1.0, %v3466_v6  ;;  %v3093_v33 = vsel %vm947_vm9, 1.0, %v3466_v6  ;;  %v3094_v34 = vsel %vm948_vm10, 1.0, %v3466_v6 }
  0xfd   : > { %vm949_vm11 = vcmp.ge.f32.partialorder %v437_v28, 0.0  ;;  %v440_v35 = vld [vmem:[%s3581_s30 + $0x970] sm:$0xff]  ;;  %v441_v36 = vld [vmem:[%s3581_s30 + $0x978] sm:$0xff]  ;;  %2482 = vst [vmem:[%s3598_s17 + $0x940] sm:$0xff] %v3092_v32  ;;  %2483 = vst [vmem:[%s3598_s17 + $0x948] sm:$0xff] %v3093_v33  ;;  %vm950_vm12 = vcmp.ge.f32.partialorder %v438_v30, 0.0 }
  0xfe   : > { %2484 = vst [vmem:[%s3598_s17 + $0x950] sm:$0xff] %v3094_v34  ;;  %v3095_v37 = vsel %vm949_vm11, 1.0, %v3466_v6  ;;  %vm951_vm13 = vcmp.ge.f32.partialorder %v439_v31, 0.0  ;;  %vm952_vm14 = vcmp.ge.f32.partialorder %v440_v35, 0.0  ;;  %v442_v38 = vld [vmem:[%s3581_s30 + $0x980] sm:$0xff]  ;;  %v443_v39 = vld [vmem:[%s3581_s30 + $0x988] sm:$0xff] }
  0xff   : > { %2485 = vst [vmem:[%s3598_s17 + $0x958] sm:$0xff] %v3095_v37  ;;  %v3096_v40 = vsel %vm950_vm12, 1.0, %v3466_v6  ;;  %v3097_v41 = vsel %vm951_vm13, 1.0, %v3466_v6  ;;  %v3098_v42 = vsel %vm952_vm14, 1.0, %v3466_v6  ;;  %vm953_vm15 = vcmp.ge.f32.partialorder %v441_v36, 0.0  ;;  %v444_v43 = vld [vmem:[%s3581_s30 + $0x990] sm:$0xff] }
 0x100   : > { %v445_v44 = vld [vmem:[%s3581_s30 + $0x998] sm:$0xff]  ;;  %2486 = vst [vmem:[%s3598_s17 + $0x960] sm:$0xff] %v3096_v40  ;;  %2487 = vst [vmem:[%s3598_s17 + $0x968] sm:$0xff] %v3097_v41  ;;  %v3099_v45 = vsel %vm953_vm15, 1.0, %v3466_v6  ;;  %vm954_vm0 = vcmp.ge.f32.partialorder %v442_v38, 0.0  ;;  %vm955_vm1 = vcmp.ge.f32.partialorder %v443_v39, 0.0 }
 0x101   : > { %2488 = vst [vmem:[%s3598_s17 + $0x970] sm:$0xff] %v3098_v42  ;;  %vm956_vm2 = vcmp.ge.f32.partialorder %v444_v43, 0.0  ;;  %v446_v46 = vld [vmem:[%s3581_s30 + $0x9a0] sm:$0xff]  ;;  %v447_v47 = vld [vmem:[%s3581_s30 + $0x9a8] sm:$0xff]  ;;  %2489 = vst [vmem:[%s3598_s17 + $0x978] sm:$0xff] %v3099_v45  ;;  %v3100_v48 = vsel %vm954_vm0, 1.0, %v3466_v6 }
 0x102   : > { %v3101_v49 = vsel %vm955_vm1, 1.0, %v3466_v6  ;;  %v3102_v50 = vsel %vm956_vm2, 1.0, %v3466_v6  ;;  %vm957_vm3 = vcmp.ge.f32.partialorder %v445_v44, 0.0  ;;  %v448_v51 = vld [vmem:[%s3581_s30 + $0x9b0] sm:$0xff]  ;;  %v449_v52 = vld [vmem:[%s3581_s30 + $0x9b8] sm:$0xff]  ;;  %2490 = vst [vmem:[%s3598_s17 + $0x980] sm:$0xff] %v3100_v48 }
 0x103   : > { %2491 = vst [vmem:[%s3598_s17 + $0x988] sm:$0xff] %v3101_v49  ;;  %2492 = vst [vmem:[%s3598_s17 + $0x990] sm:$0xff] %v3102_v50  ;;  %v3103_v53 = vsel %vm957_vm3, 1.0, %v3466_v6  ;;  %vm958_vm4 = vcmp.ge.f32.partialorder %v446_v46, 0.0  ;;  %vm959_vm5 = vcmp.ge.f32.partialorder %v447_v47, 0.0  ;;  %vm960_vm6 = vcmp.ge.f32.partialorder %v448_v51, 0.0 }
 0x104   : > { %v450_v54 = vld [vmem:[%s3581_s30 + $0x9c0] sm:$0xff]  ;;  %v451_v55 = vld [vmem:[%s3581_s30 + $0x9c8] sm:$0xff]  ;;  %2493 = vst [vmem:[%s3598_s17 + $0x998] sm:$0xff] %v3103_v53  ;;  %v3104_v56 = vsel %vm958_vm4, 1.0, %v3466_v6  ;;  %v3105_v57 = vsel %vm959_vm5, 1.0, %v3466_v6  ;;  %v3106_v58 = vsel %vm960_vm6, 1.0, %v3466_v6 }
 0x105   : > { %vm961_vm7 = vcmp.ge.f32.partialorder %v449_v52, 0.0  ;;  %v452_v59 = vld [vmem:[%s3581_s30 + $0x9d0] sm:$0xff]  ;;  %v453_v60 = vld [vmem:[%s3581_s30 + $0x9d8] sm:$0xff]  ;;  %2494 = vst [vmem:[%s3598_s17 + $0x9a0] sm:$0xff] %v3104_v56  ;;  %2495 = vst [vmem:[%s3598_s17 + $0x9a8] sm:$0xff] %v3105_v57  ;;  %vm962_vm8 = vcmp.ge.f32.partialorder %v450_v54, 0.0 }
 0x106   : > { %2496 = vst [vmem:[%s3598_s17 + $0x9b0] sm:$0xff] %v3106_v58  ;;  %v3107_v61 = vsel %vm961_vm7, 1.0, %v3466_v6  ;;  %vm963_vm9 = vcmp.ge.f32.partialorder %v451_v55, 0.0  ;;  %vm964_vm10 = vcmp.ge.f32.partialorder %v452_v59, 0.0  ;;  %v454_v62 = vld [vmem:[%s3581_s30 + $0x9e0] sm:$0xff]  ;;  %v455_v63 = vld [vmem:[%s3581_s30 + $0x9e8] sm:$0xff] }
 0x107   : > { %2497 = vst [vmem:[%s3598_s17 + $0x9b8] sm:$0xff] %v3107_v61  ;;  %v3108_v0 = vsel %vm962_vm8, 1.0, %v3466_v6  ;;  %v3109_v1 = vsel %vm963_vm9, 1.0, %v3466_v6  ;;  %v3110_v2 = vsel %vm964_vm10, 1.0, %v3466_v6  ;;  %vm965_vm11 = vcmp.ge.f32.partialorder %v453_v60, 0.0  ;;  %v456_v3 = vld [vmem:[%s3581_s30 + $0x9f0] sm:$0xff] }
 0x108   : > { %v457_v4 = vld [vmem:[%s3581_s30 + $0x9f8] sm:$0xff]  ;;  %2498 = vst [vmem:[%s3598_s17 + $0x9c0] sm:$0xff] %v3108_v0  ;;  %2499 = vst [vmem:[%s3598_s17 + $0x9c8] sm:$0xff] %v3109_v1  ;;  %v3111_v5 = vsel %vm965_vm11, 1.0, %v3466_v6  ;;  %vm966_vm12 = vcmp.ge.f32.partialorder %v454_v62, 0.0  ;;  %vm967_vm13 = vcmp.ge.f32.partialorder %v455_v63, 0.0 }
 0x109   : > { %2500 = vst [vmem:[%s3598_s17 + $0x9d0] sm:$0xff] %v3110_v2  ;;  %vm968_vm14 = vcmp.ge.f32.partialorder %v456_v3, 0.0  ;;  %v458_v7 = vld [vmem:[%s3581_s30 + $0xa00] sm:$0xff]  ;;  %v459_v8 = vld [vmem:[%s3581_s30 + $0xa08] sm:$0xff]  ;;  %2501 = vst [vmem:[%s3598_s17 + $0x9d8] sm:$0xff] %v3111_v5  ;;  %v3112_v9 = vsel %vm966_vm12, 1.0, %v3466_v6 }
 0x10a   : > { %v3113_v10 = vsel %vm967_vm13, 1.0, %v3466_v6  ;;  %v3114_v11 = vsel %vm968_vm14, 1.0, %v3466_v6  ;;  %vm969_vm15 = vcmp.ge.f32.partialorder %v457_v4, 0.0  ;;  %v460_v12 = vld [vmem:[%s3581_s30 + $0xa10] sm:$0xff]  ;;  %v461_v13 = vld [vmem:[%s3581_s30 + $0xa18] sm:$0xff]  ;;  %2502 = vst [vmem:[%s3598_s17 + $0x9e0] sm:$0xff] %v3112_v9 }
 0x10b   : > { %2503 = vst [vmem:[%s3598_s17 + $0x9e8] sm:$0xff] %v3113_v10  ;;  %2504 = vst [vmem:[%s3598_s17 + $0x9f0] sm:$0xff] %v3114_v11  ;;  %v3115_v14 = vsel %vm969_vm15, 1.0, %v3466_v6  ;;  %vm970_vm0 = vcmp.ge.f32.partialorder %v458_v7, 0.0  ;;  %vm971_vm1 = vcmp.ge.f32.partialorder %v459_v8, 0.0  ;;  %vm972_vm2 = vcmp.ge.f32.partialorder %v460_v12, 0.0 }
 0x10c   : > { %v462_v15 = vld [vmem:[%s3581_s30 + $0xa20] sm:$0xff]  ;;  %v463_v16 = vld [vmem:[%s3581_s30 + $0xa28] sm:$0xff]  ;;  %2505 = vst [vmem:[%s3598_s17 + $0x9f8] sm:$0xff] %v3115_v14  ;;  %v3116_v17 = vsel %vm970_vm0, 1.0, %v3466_v6  ;;  %v3117_v18 = vsel %vm971_vm1, 1.0, %v3466_v6  ;;  %v3118_v19 = vsel %vm972_vm2, 1.0, %v3466_v6 }
 0x10d   : > { %vm973_vm3 = vcmp.ge.f32.partialorder %v461_v13, 0.0  ;;  %v464_v20 = vld [vmem:[%s3581_s30 + $0xa30] sm:$0xff]  ;;  %v465_v21 = vld [vmem:[%s3581_s30 + $0xa38] sm:$0xff]  ;;  %2506 = vst [vmem:[%s3598_s17 + $0xa00] sm:$0xff] %v3116_v17  ;;  %2507 = vst [vmem:[%s3598_s17 + $0xa08] sm:$0xff] %v3117_v18  ;;  %vm974_vm4 = vcmp.ge.f32.partialorder %v462_v15, 0.0 }
 0x10e   : > { %2508 = vst [vmem:[%s3598_s17 + $0xa10] sm:$0xff] %v3118_v19  ;;  %v3119_v22 = vsel %vm973_vm3, 1.0, %v3466_v6  ;;  %vm975_vm5 = vcmp.ge.f32.partialorder %v463_v16, 0.0  ;;  %vm976_vm6 = vcmp.ge.f32.partialorder %v464_v20, 0.0  ;;  %v466_v23 = vld [vmem:[%s3581_s30 + $0xa40] sm:$0xff]  ;;  %v467_v24 = vld [vmem:[%s3581_s30 + $0xa48] sm:$0xff] }
 0x10f   : > { %2509 = vst [vmem:[%s3598_s17 + $0xa18] sm:$0xff] %v3119_v22  ;;  %v3120_v25 = vsel %vm974_vm4, 1.0, %v3466_v6  ;;  %v3121_v26 = vsel %vm975_vm5, 1.0, %v3466_v6  ;;  %v3122_v27 = vsel %vm976_vm6, 1.0, %v3466_v6  ;;  %vm977_vm7 = vcmp.ge.f32.partialorder %v465_v21, 0.0  ;;  %v468_v28 = vld [vmem:[%s3581_s30 + $0xa50] sm:$0xff] }
 0x110   : > { %v469_v29 = vld [vmem:[%s3581_s30 + $0xa58] sm:$0xff]  ;;  %2510 = vst [vmem:[%s3598_s17 + $0xa20] sm:$0xff] %v3120_v25  ;;  %2511 = vst [vmem:[%s3598_s17 + $0xa28] sm:$0xff] %v3121_v26  ;;  %v3123_v30 = vsel %vm977_vm7, 1.0, %v3466_v6  ;;  %vm978_vm8 = vcmp.ge.f32.partialorder %v466_v23, 0.0  ;;  %vm979_vm9 = vcmp.ge.f32.partialorder %v467_v24, 0.0 }
 0x111   : > { %2512 = vst [vmem:[%s3598_s17 + $0xa30] sm:$0xff] %v3122_v27  ;;  %vm980_vm10 = vcmp.ge.f32.partialorder %v468_v28, 0.0  ;;  %v470_v31 = vld [vmem:[%s3581_s30 + $0xa60] sm:$0xff]  ;;  %v471_v32 = vld [vmem:[%s3581_s30 + $0xa68] sm:$0xff]  ;;  %2513 = vst [vmem:[%s3598_s17 + $0xa38] sm:$0xff] %v3123_v30  ;;  %v3124_v33 = vsel %vm978_vm8, 1.0, %v3466_v6 }
 0x112   : > { %v3125_v34 = vsel %vm979_vm9, 1.0, %v3466_v6  ;;  %v3126_v35 = vsel %vm980_vm10, 1.0, %v3466_v6  ;;  %vm981_vm11 = vcmp.ge.f32.partialorder %v469_v29, 0.0  ;;  %v472_v36 = vld [vmem:[%s3581_s30 + $0xa70] sm:$0xff]  ;;  %v473_v37 = vld [vmem:[%s3581_s30 + $0xa78] sm:$0xff]  ;;  %2514 = vst [vmem:[%s3598_s17 + $0xa40] sm:$0xff] %v3124_v33 }
 0x113   : > { %2515 = vst [vmem:[%s3598_s17 + $0xa48] sm:$0xff] %v3125_v34  ;;  %2516 = vst [vmem:[%s3598_s17 + $0xa50] sm:$0xff] %v3126_v35  ;;  %v3127_v38 = vsel %vm981_vm11, 1.0, %v3466_v6  ;;  %vm982_vm12 = vcmp.ge.f32.partialorder %v470_v31, 0.0  ;;  %vm983_vm13 = vcmp.ge.f32.partialorder %v471_v32, 0.0  ;;  %vm984_vm14 = vcmp.ge.f32.partialorder %v472_v36, 0.0 }
 0x114   : > { %v474_v39 = vld [vmem:[%s3581_s30 + $0xa80] sm:$0xff]  ;;  %v475_v40 = vld [vmem:[%s3581_s30 + $0xa88] sm:$0xff]  ;;  %2517 = vst [vmem:[%s3598_s17 + $0xa58] sm:$0xff] %v3127_v38  ;;  %v3128_v41 = vsel %vm982_vm12, 1.0, %v3466_v6  ;;  %v3129_v42 = vsel %vm983_vm13, 1.0, %v3466_v6  ;;  %v3130_v43 = vsel %vm984_vm14, 1.0, %v3466_v6 }
 0x115   : > { %vm985_vm15 = vcmp.ge.f32.partialorder %v473_v37, 0.0  ;;  %v476_v44 = vld [vmem:[%s3581_s30 + $0xa90] sm:$0xff]  ;;  %v477_v45 = vld [vmem:[%s3581_s30 + $0xa98] sm:$0xff]  ;;  %2518 = vst [vmem:[%s3598_s17 + $0xa60] sm:$0xff] %v3128_v41  ;;  %2519 = vst [vmem:[%s3598_s17 + $0xa68] sm:$0xff] %v3129_v42  ;;  %vm986_vm0 = vcmp.ge.f32.partialorder %v474_v39, 0.0 }
 0x116   : > { %2520 = vst [vmem:[%s3598_s17 + $0xa70] sm:$0xff] %v3130_v43  ;;  %v3131_v46 = vsel %vm985_vm15, 1.0, %v3466_v6  ;;  %vm987_vm1 = vcmp.ge.f32.partialorder %v475_v40, 0.0  ;;  %vm988_vm2 = vcmp.ge.f32.partialorder %v476_v44, 0.0  ;;  %v478_v47 = vld [vmem:[%s3581_s30 + $0xaa0] sm:$0xff]  ;;  %v479_v48 = vld [vmem:[%s3581_s30 + $0xaa8] sm:$0xff] }
 0x117   : > { %2521 = vst [vmem:[%s3598_s17 + $0xa78] sm:$0xff] %v3131_v46  ;;  %v3132_v49 = vsel %vm986_vm0, 1.0, %v3466_v6  ;;  %v3133_v50 = vsel %vm987_vm1, 1.0, %v3466_v6  ;;  %v3134_v51 = vsel %vm988_vm2, 1.0, %v3466_v6  ;;  %vm989_vm3 = vcmp.ge.f32.partialorder %v477_v45, 0.0  ;;  %v480_v52 = vld [vmem:[%s3581_s30 + $0xab0] sm:$0xff] }
 0x118   : > { %v481_v53 = vld [vmem:[%s3581_s30 + $0xab8] sm:$0xff]  ;;  %2522 = vst [vmem:[%s3598_s17 + $0xa80] sm:$0xff] %v3132_v49  ;;  %2523 = vst [vmem:[%s3598_s17 + $0xa88] sm:$0xff] %v3133_v50  ;;  %v3135_v54 = vsel %vm989_vm3, 1.0, %v3466_v6  ;;  %vm990_vm4 = vcmp.ge.f32.partialorder %v478_v47, 0.0  ;;  %vm991_vm5 = vcmp.ge.f32.partialorder %v479_v48, 0.0 }
 0x119   : > { %2524 = vst [vmem:[%s3598_s17 + $0xa90] sm:$0xff] %v3134_v51  ;;  %vm992_vm6 = vcmp.ge.f32.partialorder %v480_v52, 0.0  ;;  %v482_v55 = vld [vmem:[%s3581_s30 + $0xac0] sm:$0xff]  ;;  %v483_v56 = vld [vmem:[%s3581_s30 + $0xac8] sm:$0xff]  ;;  %2525 = vst [vmem:[%s3598_s17 + $0xa98] sm:$0xff] %v3135_v54  ;;  %v3136_v57 = vsel %vm990_vm4, 1.0, %v3466_v6 }
 0x11a   : > { %v3137_v58 = vsel %vm991_vm5, 1.0, %v3466_v6  ;;  %v3138_v59 = vsel %vm992_vm6, 1.0, %v3466_v6  ;;  %vm993_vm7 = vcmp.ge.f32.partialorder %v481_v53, 0.0  ;;  %v484_v60 = vld [vmem:[%s3581_s30 + $0xad0] sm:$0xff]  ;;  %v485_v61 = vld [vmem:[%s3581_s30 + $0xad8] sm:$0xff]  ;;  %2526 = vst [vmem:[%s3598_s17 + $0xaa0] sm:$0xff] %v3136_v57 }
 0x11b   : > { %2527 = vst [vmem:[%s3598_s17 + $0xaa8] sm:$0xff] %v3137_v58  ;;  %2528 = vst [vmem:[%s3598_s17 + $0xab0] sm:$0xff] %v3138_v59  ;;  %v3139_v62 = vsel %vm993_vm7, 1.0, %v3466_v6  ;;  %vm994_vm8 = vcmp.ge.f32.partialorder %v482_v55, 0.0  ;;  %vm995_vm9 = vcmp.ge.f32.partialorder %v483_v56, 0.0  ;;  %vm996_vm10 = vcmp.ge.f32.partialorder %v484_v60, 0.0 }
 0x11c   : > { %v486_v63 = vld [vmem:[%s3581_s30 + $0xae0] sm:$0xff]  ;;  %v487_v0 = vld [vmem:[%s3581_s30 + $0xae8] sm:$0xff]  ;;  %2529 = vst [vmem:[%s3598_s17 + $0xab8] sm:$0xff] %v3139_v62  ;;  %v3140_v1 = vsel %vm994_vm8, 1.0, %v3466_v6  ;;  %v3141_v2 = vsel %vm995_vm9, 1.0, %v3466_v6  ;;  %v3142_v3 = vsel %vm996_vm10, 1.0, %v3466_v6 }
 0x11d   : > { %vm997_vm11 = vcmp.ge.f32.partialorder %v485_v61, 0.0  ;;  %v488_v4 = vld [vmem:[%s3581_s30 + $0xaf0] sm:$0xff]  ;;  %v489_v5 = vld [vmem:[%s3581_s30 + $0xaf8] sm:$0xff]  ;;  %2530 = vst [vmem:[%s3598_s17 + $0xac0] sm:$0xff] %v3140_v1  ;;  %2531 = vst [vmem:[%s3598_s17 + $0xac8] sm:$0xff] %v3141_v2  ;;  %vm998_vm12 = vcmp.ge.f32.partialorder %v486_v63, 0.0 }
 0x11e   : > { %2532 = vst [vmem:[%s3598_s17 + $0xad0] sm:$0xff] %v3142_v3  ;;  %v3143_v7 = vsel %vm997_vm11, 1.0, %v3466_v6  ;;  %vm999_vm13 = vcmp.ge.f32.partialorder %v487_v0, 0.0  ;;  %vm1000_vm14 = vcmp.ge.f32.partialorder %v488_v4, 0.0  ;;  %v490_v8 = vld [vmem:[%s3581_s30 + $0xb00] sm:$0xff]  ;;  %v491_v9 = vld [vmem:[%s3581_s30 + $0xb08] sm:$0xff] }
 0x11f   : > { %2533 = vst [vmem:[%s3598_s17 + $0xad8] sm:$0xff] %v3143_v7  ;;  %v3144_v10 = vsel %vm998_vm12, 1.0, %v3466_v6  ;;  %v3145_v11 = vsel %vm999_vm13, 1.0, %v3466_v6  ;;  %v3146_v12 = vsel %vm1000_vm14, 1.0, %v3466_v6  ;;  %vm1001_vm15 = vcmp.ge.f32.partialorder %v489_v5, 0.0  ;;  %v492_v13 = vld [vmem:[%s3581_s30 + $0xb10] sm:$0xff] }
 0x120   : > { %v493_v14 = vld [vmem:[%s3581_s30 + $0xb18] sm:$0xff]  ;;  %2534 = vst [vmem:[%s3598_s17 + $0xae0] sm:$0xff] %v3144_v10  ;;  %2535 = vst [vmem:[%s3598_s17 + $0xae8] sm:$0xff] %v3145_v11  ;;  %v3147_v15 = vsel %vm1001_vm15, 1.0, %v3466_v6  ;;  %vm1002_vm0 = vcmp.ge.f32.partialorder %v490_v8, 0.0  ;;  %vm1003_vm1 = vcmp.ge.f32.partialorder %v491_v9, 0.0 }
 0x121   : > { %2536 = vst [vmem:[%s3598_s17 + $0xaf0] sm:$0xff] %v3146_v12  ;;  %vm1004_vm2 = vcmp.ge.f32.partialorder %v492_v13, 0.0  ;;  %v494_v16 = vld [vmem:[%s3581_s30 + $0xb20] sm:$0xff]  ;;  %v495_v17 = vld [vmem:[%s3581_s30 + $0xb28] sm:$0xff]  ;;  %2537 = vst [vmem:[%s3598_s17 + $0xaf8] sm:$0xff] %v3147_v15  ;;  %v3148_v18 = vsel %vm1002_vm0, 1.0, %v3466_v6 }
 0x122   : > { %v3149_v19 = vsel %vm1003_vm1, 1.0, %v3466_v6  ;;  %v3150_v20 = vsel %vm1004_vm2, 1.0, %v3466_v6  ;;  %vm1005_vm3 = vcmp.ge.f32.partialorder %v493_v14, 0.0  ;;  %v496_v21 = vld [vmem:[%s3581_s30 + $0xb30] sm:$0xff]  ;;  %v497_v22 = vld [vmem:[%s3581_s30 + $0xb38] sm:$0xff]  ;;  %2538 = vst [vmem:[%s3598_s17 + $0xb00] sm:$0xff] %v3148_v18 }
 0x123   : > { %2539 = vst [vmem:[%s3598_s17 + $0xb08] sm:$0xff] %v3149_v19  ;;  %2540 = vst [vmem:[%s3598_s17 + $0xb10] sm:$0xff] %v3150_v20  ;;  %v3151_v23 = vsel %vm1005_vm3, 1.0, %v3466_v6  ;;  %vm1006_vm4 = vcmp.ge.f32.partialorder %v494_v16, 0.0  ;;  %vm1007_vm5 = vcmp.ge.f32.partialorder %v495_v17, 0.0  ;;  %vm1008_vm6 = vcmp.ge.f32.partialorder %v496_v21, 0.0 }
 0x124   : > { %v498_v24 = vld [vmem:[%s3581_s30 + $0xb40] sm:$0xff]  ;;  %v499_v25 = vld [vmem:[%s3581_s30 + $0xb48] sm:$0xff]  ;;  %2541 = vst [vmem:[%s3598_s17 + $0xb18] sm:$0xff] %v3151_v23  ;;  %v3152_v26 = vsel %vm1006_vm4, 1.0, %v3466_v6  ;;  %v3153_v27 = vsel %vm1007_vm5, 1.0, %v3466_v6  ;;  %v3154_v28 = vsel %vm1008_vm6, 1.0, %v3466_v6 }
 0x125   : > { %vm1009_vm7 = vcmp.ge.f32.partialorder %v497_v22, 0.0  ;;  %v500_v29 = vld [vmem:[%s3581_s30 + $0xb50] sm:$0xff]  ;;  %v501_v30 = vld [vmem:[%s3581_s30 + $0xb58] sm:$0xff]  ;;  %2542 = vst [vmem:[%s3598_s17 + $0xb20] sm:$0xff] %v3152_v26  ;;  %2543 = vst [vmem:[%s3598_s17 + $0xb28] sm:$0xff] %v3153_v27  ;;  %vm1010_vm8 = vcmp.ge.f32.partialorder %v498_v24, 0.0 }
 0x126   : > { %2544 = vst [vmem:[%s3598_s17 + $0xb30] sm:$0xff] %v3154_v28  ;;  %v3155_v31 = vsel %vm1009_vm7, 1.0, %v3466_v6  ;;  %vm1011_vm9 = vcmp.ge.f32.partialorder %v499_v25, 0.0  ;;  %vm1012_vm10 = vcmp.ge.f32.partialorder %v500_v29, 0.0  ;;  %v502_v32 = vld [vmem:[%s3581_s30 + $0xb60] sm:$0xff]  ;;  %v503_v33 = vld [vmem:[%s3581_s30 + $0xb68] sm:$0xff] }
 0x127   : > { %2545 = vst [vmem:[%s3598_s17 + $0xb38] sm:$0xff] %v3155_v31  ;;  %v3156_v34 = vsel %vm1010_vm8, 1.0, %v3466_v6  ;;  %v3157_v35 = vsel %vm1011_vm9, 1.0, %v3466_v6  ;;  %v3158_v36 = vsel %vm1012_vm10, 1.0, %v3466_v6  ;;  %vm1013_vm11 = vcmp.ge.f32.partialorder %v501_v30, 0.0  ;;  %v504_v37 = vld [vmem:[%s3581_s30 + $0xb70] sm:$0xff] }
 0x128   : > { %v505_v38 = vld [vmem:[%s3581_s30 + $0xb78] sm:$0xff]  ;;  %2546 = vst [vmem:[%s3598_s17 + $0xb40] sm:$0xff] %v3156_v34  ;;  %2547 = vst [vmem:[%s3598_s17 + $0xb48] sm:$0xff] %v3157_v35  ;;  %v3159_v39 = vsel %vm1013_vm11, 1.0, %v3466_v6  ;;  %vm1014_vm12 = vcmp.ge.f32.partialorder %v502_v32, 0.0  ;;  %vm1015_vm13 = vcmp.ge.f32.partialorder %v503_v33, 0.0 }
 0x129   : > { %2548 = vst [vmem:[%s3598_s17 + $0xb50] sm:$0xff] %v3158_v36  ;;  %vm1016_vm14 = vcmp.ge.f32.partialorder %v504_v37, 0.0  ;;  %v506_v40 = vld [vmem:[%s3581_s30 + $0xb80] sm:$0xff]  ;;  %v507_v41 = vld [vmem:[%s3581_s30 + $0xb88] sm:$0xff]  ;;  %2549 = vst [vmem:[%s3598_s17 + $0xb58] sm:$0xff] %v3159_v39  ;;  %v3160_v42 = vsel %vm1014_vm12, 1.0, %v3466_v6 }
 0x12a   : > { %v3161_v43 = vsel %vm1015_vm13, 1.0, %v3466_v6  ;;  %v3162_v44 = vsel %vm1016_vm14, 1.0, %v3466_v6  ;;  %vm1017_vm15 = vcmp.ge.f32.partialorder %v505_v38, 0.0  ;;  %v508_v45 = vld [vmem:[%s3581_s30 + $0xb90] sm:$0xff]  ;;  %v509_v46 = vld [vmem:[%s3581_s30 + $0xb98] sm:$0xff]  ;;  %2550 = vst [vmem:[%s3598_s17 + $0xb60] sm:$0xff] %v3160_v42 }
 0x12b   : > { %2551 = vst [vmem:[%s3598_s17 + $0xb68] sm:$0xff] %v3161_v43  ;;  %2552 = vst [vmem:[%s3598_s17 + $0xb70] sm:$0xff] %v3162_v44  ;;  %v3163_v47 = vsel %vm1017_vm15, 1.0, %v3466_v6  ;;  %vm1018_vm0 = vcmp.ge.f32.partialorder %v506_v40, 0.0  ;;  %vm1019_vm1 = vcmp.ge.f32.partialorder %v507_v41, 0.0  ;;  %vm1020_vm2 = vcmp.ge.f32.partialorder %v508_v45, 0.0 }
 0x12c   : > { %v510_v48 = vld [vmem:[%s3581_s30 + $0xba0] sm:$0xff]  ;;  %v511_v49 = vld [vmem:[%s3581_s30 + $0xba8] sm:$0xff]  ;;  %2553 = vst [vmem:[%s3598_s17 + $0xb78] sm:$0xff] %v3163_v47  ;;  %v3164_v50 = vsel %vm1018_vm0, 1.0, %v3466_v6  ;;  %v3165_v51 = vsel %vm1019_vm1, 1.0, %v3466_v6  ;;  %v3166_v52 = vsel %vm1020_vm2, 1.0, %v3466_v6 }
 0x12d   : > { %vm1021_vm3 = vcmp.ge.f32.partialorder %v509_v46, 0.0  ;;  %v512_v53 = vld [vmem:[%s3581_s30 + $0xbb0] sm:$0xff]  ;;  %v513_v54 = vld [vmem:[%s3581_s30 + $0xbb8] sm:$0xff]  ;;  %2554 = vst [vmem:[%s3598_s17 + $0xb80] sm:$0xff] %v3164_v50  ;;  %2555 = vst [vmem:[%s3598_s17 + $0xb88] sm:$0xff] %v3165_v51  ;;  %vm1022_vm4 = vcmp.ge.f32.partialorder %v510_v48, 0.0 }
 0x12e   : > { %2556 = vst [vmem:[%s3598_s17 + $0xb90] sm:$0xff] %v3166_v52  ;;  %v3167_v55 = vsel %vm1021_vm3, 1.0, %v3466_v6  ;;  %vm1023_vm5 = vcmp.ge.f32.partialorder %v511_v49, 0.0  ;;  %vm1024_vm6 = vcmp.ge.f32.partialorder %v512_v53, 0.0  ;;  %v514_v56 = vld [vmem:[%s3581_s30 + $0xbc0] sm:$0xff]  ;;  %v515_v57 = vld [vmem:[%s3581_s30 + $0xbc8] sm:$0xff] }
 0x12f   : > { %2557 = vst [vmem:[%s3598_s17 + $0xb98] sm:$0xff] %v3167_v55  ;;  %v3168_v58 = vsel %vm1022_vm4, 1.0, %v3466_v6  ;;  %v3169_v59 = vsel %vm1023_vm5, 1.0, %v3466_v6  ;;  %v3170_v60 = vsel %vm1024_vm6, 1.0, %v3466_v6  ;;  %vm1025_vm7 = vcmp.ge.f32.partialorder %v513_v54, 0.0  ;;  %v516_v61 = vld [vmem:[%s3581_s30 + $0xbd0] sm:$0xff] }
 0x130   : > { %v517_v62 = vld [vmem:[%s3581_s30 + $0xbd8] sm:$0xff]  ;;  %2558 = vst [vmem:[%s3598_s17 + $0xba0] sm:$0xff] %v3168_v58  ;;  %2559 = vst [vmem:[%s3598_s17 + $0xba8] sm:$0xff] %v3169_v59  ;;  %v3171_v63 = vsel %vm1025_vm7, 1.0, %v3466_v6  ;;  %vm1026_vm8 = vcmp.ge.f32.partialorder %v514_v56, 0.0  ;;  %vm1027_vm9 = vcmp.ge.f32.partialorder %v515_v57, 0.0 }
 0x131   : > { %2560 = vst [vmem:[%s3598_s17 + $0xbb0] sm:$0xff] %v3170_v60  ;;  %vm1028_vm10 = vcmp.ge.f32.partialorder %v516_v61, 0.0  ;;  %v518_v0 = vld [vmem:[%s3581_s30 + $0xbe0] sm:$0xff]  ;;  %v519_v1 = vld [vmem:[%s3581_s30 + $0xbe8] sm:$0xff]  ;;  %2561 = vst [vmem:[%s3598_s17 + $0xbb8] sm:$0xff] %v3171_v63  ;;  %v3172_v2 = vsel %vm1026_vm8, 1.0, %v3466_v6 }
 0x132   : > { %v3173_v3 = vsel %vm1027_vm9, 1.0, %v3466_v6  ;;  %v3174_v4 = vsel %vm1028_vm10, 1.0, %v3466_v6  ;;  %vm1029_vm11 = vcmp.ge.f32.partialorder %v517_v62, 0.0  ;;  %v520_v5 = vld [vmem:[%s3581_s30 + $0xbf0] sm:$0xff]  ;;  %v521_v7 = vld [vmem:[%s3581_s30 + $0xbf8] sm:$0xff]  ;;  %2562 = vst [vmem:[%s3598_s17 + $0xbc0] sm:$0xff] %v3172_v2 }
 0x133   : > { %2563 = vst [vmem:[%s3598_s17 + $0xbc8] sm:$0xff] %v3173_v3  ;;  %2564 = vst [vmem:[%s3598_s17 + $0xbd0] sm:$0xff] %v3174_v4  ;;  %v3175_v8 = vsel %vm1029_vm11, 1.0, %v3466_v6  ;;  %vm1030_vm12 = vcmp.ge.f32.partialorder %v518_v0, 0.0  ;;  %vm1031_vm13 = vcmp.ge.f32.partialorder %v519_v1, 0.0  ;;  %vm1032_vm14 = vcmp.ge.f32.partialorder %v520_v5, 0.0 }
 0x134   : > { %v522_v9 = vld [vmem:[%s3581_s30 + $0xc00] sm:$0xff]  ;;  %v523_v10 = vld [vmem:[%s3581_s30 + $0xc08] sm:$0xff]  ;;  %2565 = vst [vmem:[%s3598_s17 + $0xbd8] sm:$0xff] %v3175_v8  ;;  %v3176_v11 = vsel %vm1030_vm12, 1.0, %v3466_v6  ;;  %v3177_v12 = vsel %vm1031_vm13, 1.0, %v3466_v6  ;;  %v3178_v13 = vsel %vm1032_vm14, 1.0, %v3466_v6 }
 0x135   : > { %vm1033_vm15 = vcmp.ge.f32.partialorder %v521_v7, 0.0  ;;  %v524_v14 = vld [vmem:[%s3581_s30 + $0xc10] sm:$0xff]  ;;  %v525_v15 = vld [vmem:[%s3581_s30 + $0xc18] sm:$0xff]  ;;  %2566 = vst [vmem:[%s3598_s17 + $0xbe0] sm:$0xff] %v3176_v11  ;;  %2567 = vst [vmem:[%s3598_s17 + $0xbe8] sm:$0xff] %v3177_v12  ;;  %vm1034_vm0 = vcmp.ge.f32.partialorder %v522_v9, 0.0 }
 0x136   : > { %2568 = vst [vmem:[%s3598_s17 + $0xbf0] sm:$0xff] %v3178_v13  ;;  %v3179_v16 = vsel %vm1033_vm15, 1.0, %v3466_v6  ;;  %vm1035_vm1 = vcmp.ge.f32.partialorder %v523_v10, 0.0  ;;  %vm1036_vm2 = vcmp.ge.f32.partialorder %v524_v14, 0.0  ;;  %v526_v17 = vld [vmem:[%s3581_s30 + $0xc20] sm:$0xff]  ;;  %v527_v18 = vld [vmem:[%s3581_s30 + $0xc28] sm:$0xff] }
 0x137   : > { %2569 = vst [vmem:[%s3598_s17 + $0xbf8] sm:$0xff] %v3179_v16  ;;  %v3180_v19 = vsel %vm1034_vm0, 1.0, %v3466_v6  ;;  %v3181_v20 = vsel %vm1035_vm1, 1.0, %v3466_v6  ;;  %v3182_v21 = vsel %vm1036_vm2, 1.0, %v3466_v6  ;;  %vm1037_vm3 = vcmp.ge.f32.partialorder %v525_v15, 0.0  ;;  %v528_v22 = vld [vmem:[%s3581_s30 + $0xc30] sm:$0xff] }
 0x138   : > { %v529_v23 = vld [vmem:[%s3581_s30 + $0xc38] sm:$0xff]  ;;  %2570 = vst [vmem:[%s3598_s17 + $0xc00] sm:$0xff] %v3180_v19  ;;  %2571 = vst [vmem:[%s3598_s17 + $0xc08] sm:$0xff] %v3181_v20  ;;  %v3183_v24 = vsel %vm1037_vm3, 1.0, %v3466_v6  ;;  %vm1038_vm4 = vcmp.ge.f32.partialorder %v526_v17, 0.0  ;;  %vm1039_vm5 = vcmp.ge.f32.partialorder %v527_v18, 0.0 }
 0x139   : > { %2572 = vst [vmem:[%s3598_s17 + $0xc10] sm:$0xff] %v3182_v21  ;;  %vm1040_vm6 = vcmp.ge.f32.partialorder %v528_v22, 0.0  ;;  %v530_v25 = vld [vmem:[%s3581_s30 + $0xc40] sm:$0xff]  ;;  %v531_v26 = vld [vmem:[%s3581_s30 + $0xc48] sm:$0xff]  ;;  %2573 = vst [vmem:[%s3598_s17 + $0xc18] sm:$0xff] %v3183_v24  ;;  %v3184_v27 = vsel %vm1038_vm4, 1.0, %v3466_v6 }
 0x13a   : > { %v3185_v28 = vsel %vm1039_vm5, 1.0, %v3466_v6  ;;  %v3186_v29 = vsel %vm1040_vm6, 1.0, %v3466_v6  ;;  %vm1041_vm7 = vcmp.ge.f32.partialorder %v529_v23, 0.0  ;;  %v532_v30 = vld [vmem:[%s3581_s30 + $0xc50] sm:$0xff]  ;;  %v533_v31 = vld [vmem:[%s3581_s30 + $0xc58] sm:$0xff]  ;;  %2574 = vst [vmem:[%s3598_s17 + $0xc20] sm:$0xff] %v3184_v27 }
 0x13b   : > { %2575 = vst [vmem:[%s3598_s17 + $0xc28] sm:$0xff] %v3185_v28  ;;  %2576 = vst [vmem:[%s3598_s17 + $0xc30] sm:$0xff] %v3186_v29  ;;  %v3187_v32 = vsel %vm1041_vm7, 1.0, %v3466_v6  ;;  %vm1042_vm8 = vcmp.ge.f32.partialorder %v530_v25, 0.0  ;;  %vm1043_vm9 = vcmp.ge.f32.partialorder %v531_v26, 0.0  ;;  %vm1044_vm10 = vcmp.ge.f32.partialorder %v532_v30, 0.0 }
 0x13c   : > { %v534_v33 = vld [vmem:[%s3581_s30 + $0xc60] sm:$0xff]  ;;  %v535_v34 = vld [vmem:[%s3581_s30 + $0xc68] sm:$0xff]  ;;  %2577 = vst [vmem:[%s3598_s17 + $0xc38] sm:$0xff] %v3187_v32  ;;  %v3188_v35 = vsel %vm1042_vm8, 1.0, %v3466_v6  ;;  %v3189_v36 = vsel %vm1043_vm9, 1.0, %v3466_v6  ;;  %v3190_v37 = vsel %vm1044_vm10, 1.0, %v3466_v6 }
 0x13d   : > { %vm1045_vm11 = vcmp.ge.f32.partialorder %v533_v31, 0.0  ;;  %v536_v38 = vld [vmem:[%s3581_s30 + $0xc70] sm:$0xff]  ;;  %v537_v39 = vld [vmem:[%s3581_s30 + $0xc78] sm:$0xff]  ;;  %2578 = vst [vmem:[%s3598_s17 + $0xc40] sm:$0xff] %v3188_v35  ;;  %2579 = vst [vmem:[%s3598_s17 + $0xc48] sm:$0xff] %v3189_v36  ;;  %vm1046_vm12 = vcmp.ge.f32.partialorder %v534_v33, 0.0 }
 0x13e   : > { %2580 = vst [vmem:[%s3598_s17 + $0xc50] sm:$0xff] %v3190_v37  ;;  %v3191_v40 = vsel %vm1045_vm11, 1.0, %v3466_v6  ;;  %vm1047_vm13 = vcmp.ge.f32.partialorder %v535_v34, 0.0  ;;  %vm1048_vm14 = vcmp.ge.f32.partialorder %v536_v38, 0.0  ;;  %v538_v41 = vld [vmem:[%s3581_s30 + $0xc80] sm:$0xff]  ;;  %v539_v42 = vld [vmem:[%s3581_s30 + $0xc88] sm:$0xff] }
 0x13f   : > { %2581 = vst [vmem:[%s3598_s17 + $0xc58] sm:$0xff] %v3191_v40  ;;  %v3192_v43 = vsel %vm1046_vm12, 1.0, %v3466_v6  ;;  %v3193_v44 = vsel %vm1047_vm13, 1.0, %v3466_v6  ;;  %v3194_v45 = vsel %vm1048_vm14, 1.0, %v3466_v6  ;;  %vm1049_vm15 = vcmp.ge.f32.partialorder %v537_v39, 0.0  ;;  %v540_v46 = vld [vmem:[%s3581_s30 + $0xc90] sm:$0xff] }
 0x140   : > { %v541_v47 = vld [vmem:[%s3581_s30 + $0xc98] sm:$0xff]  ;;  %2582 = vst [vmem:[%s3598_s17 + $0xc60] sm:$0xff] %v3192_v43  ;;  %2583 = vst [vmem:[%s3598_s17 + $0xc68] sm:$0xff] %v3193_v44  ;;  %v3195_v48 = vsel %vm1049_vm15, 1.0, %v3466_v6  ;;  %vm1050_vm0 = vcmp.ge.f32.partialorder %v538_v41, 0.0  ;;  %vm1051_vm1 = vcmp.ge.f32.partialorder %v539_v42, 0.0 }
 0x141   : > { %2584 = vst [vmem:[%s3598_s17 + $0xc70] sm:$0xff] %v3194_v45  ;;  %vm1052_vm2 = vcmp.ge.f32.partialorder %v540_v46, 0.0  ;;  %v542_v49 = vld [vmem:[%s3581_s30 + $0xca0] sm:$0xff]  ;;  %v543_v50 = vld [vmem:[%s3581_s30 + $0xca8] sm:$0xff]  ;;  %2585 = vst [vmem:[%s3598_s17 + $0xc78] sm:$0xff] %v3195_v48  ;;  %v3196_v51 = vsel %vm1050_vm0, 1.0, %v3466_v6 }
 0x142   : > { %v3197_v52 = vsel %vm1051_vm1, 1.0, %v3466_v6  ;;  %v3198_v53 = vsel %vm1052_vm2, 1.0, %v3466_v6  ;;  %vm1053_vm3 = vcmp.ge.f32.partialorder %v541_v47, 0.0  ;;  %v544_v54 = vld [vmem:[%s3581_s30 + $0xcb0] sm:$0xff]  ;;  %v545_v55 = vld [vmem:[%s3581_s30 + $0xcb8] sm:$0xff]  ;;  %2586 = vst [vmem:[%s3598_s17 + $0xc80] sm:$0xff] %v3196_v51 }
 0x143   : > { %2587 = vst [vmem:[%s3598_s17 + $0xc88] sm:$0xff] %v3197_v52  ;;  %2588 = vst [vmem:[%s3598_s17 + $0xc90] sm:$0xff] %v3198_v53  ;;  %v3199_v56 = vsel %vm1053_vm3, 1.0, %v3466_v6  ;;  %vm1054_vm4 = vcmp.ge.f32.partialorder %v542_v49, 0.0  ;;  %vm1055_vm5 = vcmp.ge.f32.partialorder %v543_v50, 0.0  ;;  %vm1056_vm6 = vcmp.ge.f32.partialorder %v544_v54, 0.0 }
 0x144   : > { %v546_v57 = vld [vmem:[%s3581_s30 + $0xcc0] sm:$0xff]  ;;  %v547_v58 = vld [vmem:[%s3581_s30 + $0xcc8] sm:$0xff]  ;;  %2589 = vst [vmem:[%s3598_s17 + $0xc98] sm:$0xff] %v3199_v56  ;;  %v3200_v59 = vsel %vm1054_vm4, 1.0, %v3466_v6  ;;  %v3201_v60 = vsel %vm1055_vm5, 1.0, %v3466_v6  ;;  %v3202_v61 = vsel %vm1056_vm6, 1.0, %v3466_v6 }
 0x145   : > { %vm1057_vm7 = vcmp.ge.f32.partialorder %v545_v55, 0.0  ;;  %v548_v62 = vld [vmem:[%s3581_s30 + $0xcd0] sm:$0xff]  ;;  %v549_v63 = vld [vmem:[%s3581_s30 + $0xcd8] sm:$0xff]  ;;  %2590 = vst [vmem:[%s3598_s17 + $0xca0] sm:$0xff] %v3200_v59  ;;  %2591 = vst [vmem:[%s3598_s17 + $0xca8] sm:$0xff] %v3201_v60  ;;  %vm1058_vm8 = vcmp.ge.f32.partialorder %v546_v57, 0.0 }
 0x146   : > { %2592 = vst [vmem:[%s3598_s17 + $0xcb0] sm:$0xff] %v3202_v61  ;;  %v3203_v0 = vsel %vm1057_vm7, 1.0, %v3466_v6  ;;  %vm1059_vm9 = vcmp.ge.f32.partialorder %v547_v58, 0.0  ;;  %vm1060_vm10 = vcmp.ge.f32.partialorder %v548_v62, 0.0  ;;  %v550_v1 = vld [vmem:[%s3581_s30 + $0xce0] sm:$0xff]  ;;  %v551_v2 = vld [vmem:[%s3581_s30 + $0xce8] sm:$0xff] }
 0x147   : > { %2593 = vst [vmem:[%s3598_s17 + $0xcb8] sm:$0xff] %v3203_v0  ;;  %v3204_v3 = vsel %vm1058_vm8, 1.0, %v3466_v6  ;;  %v3205_v4 = vsel %vm1059_vm9, 1.0, %v3466_v6  ;;  %v3206_v5 = vsel %vm1060_vm10, 1.0, %v3466_v6  ;;  %vm1061_vm11 = vcmp.ge.f32.partialorder %v549_v63, 0.0  ;;  %v552_v7 = vld [vmem:[%s3581_s30 + $0xcf0] sm:$0xff] }
 0x148   : > { %v553_v8 = vld [vmem:[%s3581_s30 + $0xcf8] sm:$0xff]  ;;  %2594 = vst [vmem:[%s3598_s17 + $0xcc0] sm:$0xff] %v3204_v3  ;;  %2595 = vst [vmem:[%s3598_s17 + $0xcc8] sm:$0xff] %v3205_v4  ;;  %v3207_v9 = vsel %vm1061_vm11, 1.0, %v3466_v6  ;;  %vm1062_vm12 = vcmp.ge.f32.partialorder %v550_v1, 0.0  ;;  %vm1063_vm13 = vcmp.ge.f32.partialorder %v551_v2, 0.0 }
 0x149   : > { %2596 = vst [vmem:[%s3598_s17 + $0xcd0] sm:$0xff] %v3206_v5  ;;  %vm1064_vm14 = vcmp.ge.f32.partialorder %v552_v7, 0.0  ;;  %v554_v10 = vld [vmem:[%s3581_s30 + $0xd00] sm:$0xff]  ;;  %v555_v11 = vld [vmem:[%s3581_s30 + $0xd08] sm:$0xff]  ;;  %2597 = vst [vmem:[%s3598_s17 + $0xcd8] sm:$0xff] %v3207_v9  ;;  %v3208_v12 = vsel %vm1062_vm12, 1.0, %v3466_v6 }
 0x14a   : > { %v3209_v13 = vsel %vm1063_vm13, 1.0, %v3466_v6  ;;  %v3210_v14 = vsel %vm1064_vm14, 1.0, %v3466_v6  ;;  %vm1065_vm15 = vcmp.ge.f32.partialorder %v553_v8, 0.0  ;;  %v556_v15 = vld [vmem:[%s3581_s30 + $0xd10] sm:$0xff]  ;;  %v557_v16 = vld [vmem:[%s3581_s30 + $0xd18] sm:$0xff]  ;;  %2598 = vst [vmem:[%s3598_s17 + $0xce0] sm:$0xff] %v3208_v12 }
 0x14b   : > { %2599 = vst [vmem:[%s3598_s17 + $0xce8] sm:$0xff] %v3209_v13  ;;  %2600 = vst [vmem:[%s3598_s17 + $0xcf0] sm:$0xff] %v3210_v14  ;;  %v3211_v17 = vsel %vm1065_vm15, 1.0, %v3466_v6  ;;  %vm1066_vm0 = vcmp.ge.f32.partialorder %v554_v10, 0.0  ;;  %vm1067_vm1 = vcmp.ge.f32.partialorder %v555_v11, 0.0  ;;  %vm1068_vm2 = vcmp.ge.f32.partialorder %v556_v15, 0.0 }
 0x14c   : > { %v558_v18 = vld [vmem:[%s3581_s30 + $0xd20] sm:$0xff]  ;;  %v559_v19 = vld [vmem:[%s3581_s30 + $0xd28] sm:$0xff]  ;;  %2601 = vst [vmem:[%s3598_s17 + $0xcf8] sm:$0xff] %v3211_v17  ;;  %v3212_v20 = vsel %vm1066_vm0, 1.0, %v3466_v6  ;;  %v3213_v21 = vsel %vm1067_vm1, 1.0, %v3466_v6  ;;  %v3214_v22 = vsel %vm1068_vm2, 1.0, %v3466_v6 }
 0x14d   : > { %vm1069_vm3 = vcmp.ge.f32.partialorder %v557_v16, 0.0  ;;  %v560_v23 = vld [vmem:[%s3581_s30 + $0xd30] sm:$0xff]  ;;  %v561_v24 = vld [vmem:[%s3581_s30 + $0xd38] sm:$0xff]  ;;  %2602 = vst [vmem:[%s3598_s17 + $0xd00] sm:$0xff] %v3212_v20  ;;  %2603 = vst [vmem:[%s3598_s17 + $0xd08] sm:$0xff] %v3213_v21  ;;  %vm1070_vm4 = vcmp.ge.f32.partialorder %v558_v18, 0.0 }
 0x14e   : > { %2604 = vst [vmem:[%s3598_s17 + $0xd10] sm:$0xff] %v3214_v22  ;;  %v3215_v25 = vsel %vm1069_vm3, 1.0, %v3466_v6  ;;  %vm1071_vm5 = vcmp.ge.f32.partialorder %v559_v19, 0.0  ;;  %vm1072_vm6 = vcmp.ge.f32.partialorder %v560_v23, 0.0  ;;  %v562_v26 = vld [vmem:[%s3581_s30 + $0xd40] sm:$0xff]  ;;  %v563_v27 = vld [vmem:[%s3581_s30 + $0xd48] sm:$0xff] }
 0x14f   : > { %2605 = vst [vmem:[%s3598_s17 + $0xd18] sm:$0xff] %v3215_v25  ;;  %v3216_v28 = vsel %vm1070_vm4, 1.0, %v3466_v6  ;;  %v3217_v29 = vsel %vm1071_vm5, 1.0, %v3466_v6  ;;  %v3218_v30 = vsel %vm1072_vm6, 1.0, %v3466_v6  ;;  %vm1073_vm7 = vcmp.ge.f32.partialorder %v561_v24, 0.0  ;;  %v564_v31 = vld [vmem:[%s3581_s30 + $0xd50] sm:$0xff] }
 0x150   : > { %v565_v32 = vld [vmem:[%s3581_s30 + $0xd58] sm:$0xff]  ;;  %2606 = vst [vmem:[%s3598_s17 + $0xd20] sm:$0xff] %v3216_v28  ;;  %2607 = vst [vmem:[%s3598_s17 + $0xd28] sm:$0xff] %v3217_v29  ;;  %v3219_v33 = vsel %vm1073_vm7, 1.0, %v3466_v6  ;;  %vm1074_vm8 = vcmp.ge.f32.partialorder %v562_v26, 0.0  ;;  %vm1075_vm9 = vcmp.ge.f32.partialorder %v563_v27, 0.0 }
 0x151   : > { %2608 = vst [vmem:[%s3598_s17 + $0xd30] sm:$0xff] %v3218_v30  ;;  %vm1076_vm10 = vcmp.ge.f32.partialorder %v564_v31, 0.0  ;;  %v566_v34 = vld [vmem:[%s3581_s30 + $0xd60] sm:$0xff]  ;;  %v567_v35 = vld [vmem:[%s3581_s30 + $0xd68] sm:$0xff]  ;;  %2609 = vst [vmem:[%s3598_s17 + $0xd38] sm:$0xff] %v3219_v33  ;;  %v3220_v36 = vsel %vm1074_vm8, 1.0, %v3466_v6 }
 0x152   : > { %v3221_v37 = vsel %vm1075_vm9, 1.0, %v3466_v6  ;;  %v3222_v38 = vsel %vm1076_vm10, 1.0, %v3466_v6  ;;  %vm1077_vm11 = vcmp.ge.f32.partialorder %v565_v32, 0.0  ;;  %v568_v39 = vld [vmem:[%s3581_s30 + $0xd70] sm:$0xff]  ;;  %v569_v40 = vld [vmem:[%s3581_s30 + $0xd78] sm:$0xff]  ;;  %2610 = vst [vmem:[%s3598_s17 + $0xd40] sm:$0xff] %v3220_v36 }
 0x153   : > { %2611 = vst [vmem:[%s3598_s17 + $0xd48] sm:$0xff] %v3221_v37  ;;  %2612 = vst [vmem:[%s3598_s17 + $0xd50] sm:$0xff] %v3222_v38  ;;  %v3223_v41 = vsel %vm1077_vm11, 1.0, %v3466_v6  ;;  %vm1078_vm12 = vcmp.ge.f32.partialorder %v566_v34, 0.0  ;;  %vm1079_vm13 = vcmp.ge.f32.partialorder %v567_v35, 0.0  ;;  %vm1080_vm14 = vcmp.ge.f32.partialorder %v568_v39, 0.0 }
 0x154   : > { %v570_v42 = vld [vmem:[%s3581_s30 + $0xd80] sm:$0xff]  ;;  %v571_v43 = vld [vmem:[%s3581_s30 + $0xd88] sm:$0xff]  ;;  %2613 = vst [vmem:[%s3598_s17 + $0xd58] sm:$0xff] %v3223_v41  ;;  %v3224_v44 = vsel %vm1078_vm12, 1.0, %v3466_v6  ;;  %v3225_v45 = vsel %vm1079_vm13, 1.0, %v3466_v6  ;;  %v3226_v46 = vsel %vm1080_vm14, 1.0, %v3466_v6 }
 0x155   : > { %vm1081_vm15 = vcmp.ge.f32.partialorder %v569_v40, 0.0  ;;  %v572_v47 = vld [vmem:[%s3581_s30 + $0xd90] sm:$0xff]  ;;  %v573_v48 = vld [vmem:[%s3581_s30 + $0xd98] sm:$0xff]  ;;  %2614 = vst [vmem:[%s3598_s17 + $0xd60] sm:$0xff] %v3224_v44  ;;  %2615 = vst [vmem:[%s3598_s17 + $0xd68] sm:$0xff] %v3225_v45  ;;  %vm1082_vm0 = vcmp.ge.f32.partialorder %v570_v42, 0.0 }
 0x156   : > { %2616 = vst [vmem:[%s3598_s17 + $0xd70] sm:$0xff] %v3226_v46  ;;  %v3227_v49 = vsel %vm1081_vm15, 1.0, %v3466_v6  ;;  %vm1083_vm1 = vcmp.ge.f32.partialorder %v571_v43, 0.0  ;;  %vm1084_vm2 = vcmp.ge.f32.partialorder %v572_v47, 0.0  ;;  %v574_v50 = vld [vmem:[%s3581_s30 + $0xda0] sm:$0xff]  ;;  %v575_v51 = vld [vmem:[%s3581_s30 + $0xda8] sm:$0xff] }
 0x157   : > { %2617 = vst [vmem:[%s3598_s17 + $0xd78] sm:$0xff] %v3227_v49  ;;  %v3228_v52 = vsel %vm1082_vm0, 1.0, %v3466_v6  ;;  %v3229_v53 = vsel %vm1083_vm1, 1.0, %v3466_v6  ;;  %v3230_v54 = vsel %vm1084_vm2, 1.0, %v3466_v6  ;;  %vm1085_vm3 = vcmp.ge.f32.partialorder %v573_v48, 0.0  ;;  %v576_v55 = vld [vmem:[%s3581_s30 + $0xdb0] sm:$0xff] }
 0x158   : > { %v577_v56 = vld [vmem:[%s3581_s30 + $0xdb8] sm:$0xff]  ;;  %2618 = vst [vmem:[%s3598_s17 + $0xd80] sm:$0xff] %v3228_v52  ;;  %2619 = vst [vmem:[%s3598_s17 + $0xd88] sm:$0xff] %v3229_v53  ;;  %v3231_v57 = vsel %vm1085_vm3, 1.0, %v3466_v6  ;;  %vm1086_vm4 = vcmp.ge.f32.partialorder %v574_v50, 0.0  ;;  %vm1087_vm5 = vcmp.ge.f32.partialorder %v575_v51, 0.0 }
 0x159   : > { %2620 = vst [vmem:[%s3598_s17 + $0xd90] sm:$0xff] %v3230_v54  ;;  %vm1088_vm6 = vcmp.ge.f32.partialorder %v576_v55, 0.0  ;;  %v578_v58 = vld [vmem:[%s3581_s30 + $0xdc0] sm:$0xff]  ;;  %v579_v59 = vld [vmem:[%s3581_s30 + $0xdc8] sm:$0xff]  ;;  %2621 = vst [vmem:[%s3598_s17 + $0xd98] sm:$0xff] %v3231_v57  ;;  %v3232_v60 = vsel %vm1086_vm4, 1.0, %v3466_v6 }
 0x15a   : > { %v3233_v61 = vsel %vm1087_vm5, 1.0, %v3466_v6  ;;  %v3234_v62 = vsel %vm1088_vm6, 1.0, %v3466_v6  ;;  %vm1089_vm7 = vcmp.ge.f32.partialorder %v577_v56, 0.0  ;;  %v580_v63 = vld [vmem:[%s3581_s30 + $0xdd0] sm:$0xff]  ;;  %v581_v0 = vld [vmem:[%s3581_s30 + $0xdd8] sm:$0xff]  ;;  %2622 = vst [vmem:[%s3598_s17 + $0xda0] sm:$0xff] %v3232_v60 }
 0x15b   : > { %2623 = vst [vmem:[%s3598_s17 + $0xda8] sm:$0xff] %v3233_v61  ;;  %2624 = vst [vmem:[%s3598_s17 + $0xdb0] sm:$0xff] %v3234_v62  ;;  %v3235_v1 = vsel %vm1089_vm7, 1.0, %v3466_v6  ;;  %vm1090_vm8 = vcmp.ge.f32.partialorder %v578_v58, 0.0  ;;  %vm1091_vm9 = vcmp.ge.f32.partialorder %v579_v59, 0.0  ;;  %vm1092_vm10 = vcmp.ge.f32.partialorder %v580_v63, 0.0 }
 0x15c   : > { %v582_v2 = vld [vmem:[%s3581_s30 + $0xde0] sm:$0xff]  ;;  %v583_v3 = vld [vmem:[%s3581_s30 + $0xde8] sm:$0xff]  ;;  %2625 = vst [vmem:[%s3598_s17 + $0xdb8] sm:$0xff] %v3235_v1  ;;  %v3236_v4 = vsel %vm1090_vm8, 1.0, %v3466_v6  ;;  %v3237_v5 = vsel %vm1091_vm9, 1.0, %v3466_v6  ;;  %v3238_v7 = vsel %vm1092_vm10, 1.0, %v3466_v6 }
 0x15d   : > { %vm1093_vm11 = vcmp.ge.f32.partialorder %v581_v0, 0.0  ;;  %v584_v8 = vld [vmem:[%s3581_s30 + $0xdf0] sm:$0xff]  ;;  %v585_v9 = vld [vmem:[%s3581_s30 + $0xdf8] sm:$0xff]  ;;  %2626 = vst [vmem:[%s3598_s17 + $0xdc0] sm:$0xff] %v3236_v4  ;;  %2627 = vst [vmem:[%s3598_s17 + $0xdc8] sm:$0xff] %v3237_v5  ;;  %vm1094_vm12 = vcmp.ge.f32.partialorder %v582_v2, 0.0 }
 0x15e   : > { %2628 = vst [vmem:[%s3598_s17 + $0xdd0] sm:$0xff] %v3238_v7  ;;  %v3239_v10 = vsel %vm1093_vm11, 1.0, %v3466_v6  ;;  %vm1095_vm13 = vcmp.ge.f32.partialorder %v583_v3, 0.0  ;;  %vm1096_vm14 = vcmp.ge.f32.partialorder %v584_v8, 0.0  ;;  %v586_v11 = vld [vmem:[%s3581_s30 + $0xe00] sm:$0xff]  ;;  %v587_v12 = vld [vmem:[%s3581_s30 + $0xe08] sm:$0xff] }
 0x15f   : > { %2629 = vst [vmem:[%s3598_s17 + $0xdd8] sm:$0xff] %v3239_v10  ;;  %v3240_v13 = vsel %vm1094_vm12, 1.0, %v3466_v6  ;;  %v3241_v14 = vsel %vm1095_vm13, 1.0, %v3466_v6  ;;  %v3242_v15 = vsel %vm1096_vm14, 1.0, %v3466_v6  ;;  %vm1097_vm15 = vcmp.ge.f32.partialorder %v585_v9, 0.0  ;;  %v588_v16 = vld [vmem:[%s3581_s30 + $0xe10] sm:$0xff] }
 0x160   : > { %v589_v17 = vld [vmem:[%s3581_s30 + $0xe18] sm:$0xff]  ;;  %2630 = vst [vmem:[%s3598_s17 + $0xde0] sm:$0xff] %v3240_v13  ;;  %2631 = vst [vmem:[%s3598_s17 + $0xde8] sm:$0xff] %v3241_v14  ;;  %v3243_v18 = vsel %vm1097_vm15, 1.0, %v3466_v6  ;;  %vm1098_vm0 = vcmp.ge.f32.partialorder %v586_v11, 0.0  ;;  %vm1099_vm1 = vcmp.ge.f32.partialorder %v587_v12, 0.0 }
 0x161   : > { %2632 = vst [vmem:[%s3598_s17 + $0xdf0] sm:$0xff] %v3242_v15  ;;  %vm1100_vm2 = vcmp.ge.f32.partialorder %v588_v16, 0.0  ;;  %v590_v19 = vld [vmem:[%s3581_s30 + $0xe20] sm:$0xff]  ;;  %v591_v20 = vld [vmem:[%s3581_s30 + $0xe28] sm:$0xff]  ;;  %2633 = vst [vmem:[%s3598_s17 + $0xdf8] sm:$0xff] %v3243_v18  ;;  %v3244_v21 = vsel %vm1098_vm0, 1.0, %v3466_v6 }
 0x162   : > { %v3245_v22 = vsel %vm1099_vm1, 1.0, %v3466_v6  ;;  %v3246_v23 = vsel %vm1100_vm2, 1.0, %v3466_v6  ;;  %vm1101_vm3 = vcmp.ge.f32.partialorder %v589_v17, 0.0  ;;  %v592_v24 = vld [vmem:[%s3581_s30 + $0xe30] sm:$0xff]  ;;  %v593_v25 = vld [vmem:[%s3581_s30 + $0xe38] sm:$0xff]  ;;  %2634 = vst [vmem:[%s3598_s17 + $0xe00] sm:$0xff] %v3244_v21 }
 0x163   : > { %2635 = vst [vmem:[%s3598_s17 + $0xe08] sm:$0xff] %v3245_v22  ;;  %2636 = vst [vmem:[%s3598_s17 + $0xe10] sm:$0xff] %v3246_v23  ;;  %v3247_v26 = vsel %vm1101_vm3, 1.0, %v3466_v6  ;;  %vm1102_vm4 = vcmp.ge.f32.partialorder %v590_v19, 0.0  ;;  %vm1103_vm5 = vcmp.ge.f32.partialorder %v591_v20, 0.0  ;;  %vm1104_vm6 = vcmp.ge.f32.partialorder %v592_v24, 0.0 }
 0x164   : > { %v594_v27 = vld [vmem:[%s3581_s30 + $0xe40] sm:$0xff]  ;;  %v595_v28 = vld [vmem:[%s3581_s30 + $0xe48] sm:$0xff]  ;;  %2637 = vst [vmem:[%s3598_s17 + $0xe18] sm:$0xff] %v3247_v26  ;;  %v3248_v29 = vsel %vm1102_vm4, 1.0, %v3466_v6  ;;  %v3249_v30 = vsel %vm1103_vm5, 1.0, %v3466_v6  ;;  %v3250_v31 = vsel %vm1104_vm6, 1.0, %v3466_v6 }
 0x165   : > { %vm1105_vm7 = vcmp.ge.f32.partialorder %v593_v25, 0.0  ;;  %v596_v32 = vld [vmem:[%s3581_s30 + $0xe50] sm:$0xff]  ;;  %v597_v33 = vld [vmem:[%s3581_s30 + $0xe58] sm:$0xff]  ;;  %2638 = vst [vmem:[%s3598_s17 + $0xe20] sm:$0xff] %v3248_v29  ;;  %2639 = vst [vmem:[%s3598_s17 + $0xe28] sm:$0xff] %v3249_v30  ;;  %vm1106_vm8 = vcmp.ge.f32.partialorder %v594_v27, 0.0 }
 0x166   : > { %2640 = vst [vmem:[%s3598_s17 + $0xe30] sm:$0xff] %v3250_v31  ;;  %v3251_v34 = vsel %vm1105_vm7, 1.0, %v3466_v6  ;;  %vm1107_vm9 = vcmp.ge.f32.partialorder %v595_v28, 0.0  ;;  %vm1108_vm10 = vcmp.ge.f32.partialorder %v596_v32, 0.0  ;;  %v598_v35 = vld [vmem:[%s3581_s30 + $0xe60] sm:$0xff]  ;;  %v599_v36 = vld [vmem:[%s3581_s30 + $0xe68] sm:$0xff] }
 0x167   : > { %2641 = vst [vmem:[%s3598_s17 + $0xe38] sm:$0xff] %v3251_v34  ;;  %v3252_v37 = vsel %vm1106_vm8, 1.0, %v3466_v6  ;;  %v3253_v38 = vsel %vm1107_vm9, 1.0, %v3466_v6  ;;  %v3254_v39 = vsel %vm1108_vm10, 1.0, %v3466_v6  ;;  %vm1109_vm11 = vcmp.ge.f32.partialorder %v597_v33, 0.0  ;;  %v600_v40 = vld [vmem:[%s3581_s30 + $0xe70] sm:$0xff] }
 0x168   : > { %v601_v41 = vld [vmem:[%s3581_s30 + $0xe78] sm:$0xff]  ;;  %2642 = vst [vmem:[%s3598_s17 + $0xe40] sm:$0xff] %v3252_v37  ;;  %2643 = vst [vmem:[%s3598_s17 + $0xe48] sm:$0xff] %v3253_v38  ;;  %v3255_v42 = vsel %vm1109_vm11, 1.0, %v3466_v6  ;;  %vm1110_vm12 = vcmp.ge.f32.partialorder %v598_v35, 0.0  ;;  %vm1111_vm13 = vcmp.ge.f32.partialorder %v599_v36, 0.0 }
 0x169   : > { %2644 = vst [vmem:[%s3598_s17 + $0xe50] sm:$0xff] %v3254_v39  ;;  %vm1112_vm14 = vcmp.ge.f32.partialorder %v600_v40, 0.0  ;;  %v602_v43 = vld [vmem:[%s3581_s30 + $0xe80] sm:$0xff]  ;;  %v603_v44 = vld [vmem:[%s3581_s30 + $0xe88] sm:$0xff]  ;;  %2645 = vst [vmem:[%s3598_s17 + $0xe58] sm:$0xff] %v3255_v42  ;;  %v3256_v45 = vsel %vm1110_vm12, 1.0, %v3466_v6 }
 0x16a   : > { %v3257_v46 = vsel %vm1111_vm13, 1.0, %v3466_v6  ;;  %v3258_v47 = vsel %vm1112_vm14, 1.0, %v3466_v6  ;;  %vm1113_vm15 = vcmp.ge.f32.partialorder %v601_v41, 0.0  ;;  %v604_v48 = vld [vmem:[%s3581_s30 + $0xe90] sm:$0xff]  ;;  %v605_v49 = vld [vmem:[%s3581_s30 + $0xe98] sm:$0xff]  ;;  %2646 = vst [vmem:[%s3598_s17 + $0xe60] sm:$0xff] %v3256_v45 }
 0x16b   : > { %2647 = vst [vmem:[%s3598_s17 + $0xe68] sm:$0xff] %v3257_v46  ;;  %2648 = vst [vmem:[%s3598_s17 + $0xe70] sm:$0xff] %v3258_v47  ;;  %v3259_v50 = vsel %vm1113_vm15, 1.0, %v3466_v6  ;;  %vm1114_vm0 = vcmp.ge.f32.partialorder %v602_v43, 0.0  ;;  %vm1115_vm1 = vcmp.ge.f32.partialorder %v603_v44, 0.0  ;;  %vm1116_vm2 = vcmp.ge.f32.partialorder %v604_v48, 0.0 }
 0x16c   : > { %v606_v51 = vld [vmem:[%s3581_s30 + $0xea0] sm:$0xff]  ;;  %v607_v52 = vld [vmem:[%s3581_s30 + $0xea8] sm:$0xff]  ;;  %2649 = vst [vmem:[%s3598_s17 + $0xe78] sm:$0xff] %v3259_v50  ;;  %v3260_v53 = vsel %vm1114_vm0, 1.0, %v3466_v6  ;;  %v3261_v54 = vsel %vm1115_vm1, 1.0, %v3466_v6  ;;  %v3262_v55 = vsel %vm1116_vm2, 1.0, %v3466_v6 }
 0x16d   : > { %vm1117_vm3 = vcmp.ge.f32.partialorder %v605_v49, 0.0  ;;  %v608_v56 = vld [vmem:[%s3581_s30 + $0xeb0] sm:$0xff]  ;;  %v609_v57 = vld [vmem:[%s3581_s30 + $0xeb8] sm:$0xff]  ;;  %2650 = vst [vmem:[%s3598_s17 + $0xe80] sm:$0xff] %v3260_v53  ;;  %2651 = vst [vmem:[%s3598_s17 + $0xe88] sm:$0xff] %v3261_v54  ;;  %vm1118_vm4 = vcmp.ge.f32.partialorder %v606_v51, 0.0 }
 0x16e   : > { %2652 = vst [vmem:[%s3598_s17 + $0xe90] sm:$0xff] %v3262_v55  ;;  %v3263_v58 = vsel %vm1117_vm3, 1.0, %v3466_v6  ;;  %vm1119_vm5 = vcmp.ge.f32.partialorder %v607_v52, 0.0  ;;  %vm1120_vm6 = vcmp.ge.f32.partialorder %v608_v56, 0.0  ;;  %v610_v59 = vld [vmem:[%s3581_s30 + $0xec0] sm:$0xff]  ;;  %v611_v60 = vld [vmem:[%s3581_s30 + $0xec8] sm:$0xff] }
 0x16f   : > { %2653 = vst [vmem:[%s3598_s17 + $0xe98] sm:$0xff] %v3263_v58  ;;  %v3264_v61 = vsel %vm1118_vm4, 1.0, %v3466_v6  ;;  %v3265_v62 = vsel %vm1119_vm5, 1.0, %v3466_v6  ;;  %v3266_v63 = vsel %vm1120_vm6, 1.0, %v3466_v6  ;;  %vm1121_vm7 = vcmp.ge.f32.partialorder %v609_v57, 0.0  ;;  %v612_v0 = vld [vmem:[%s3581_s30 + $0xed0] sm:$0xff] }
 0x170   : > { %v613_v1 = vld [vmem:[%s3581_s30 + $0xed8] sm:$0xff]  ;;  %2654 = vst [vmem:[%s3598_s17 + $0xea0] sm:$0xff] %v3264_v61  ;;  %2655 = vst [vmem:[%s3598_s17 + $0xea8] sm:$0xff] %v3265_v62  ;;  %v3267_v2 = vsel %vm1121_vm7, 1.0, %v3466_v6  ;;  %vm1122_vm8 = vcmp.ge.f32.partialorder %v610_v59, 0.0  ;;  %vm1123_vm9 = vcmp.ge.f32.partialorder %v611_v60, 0.0 }
 0x171   : > { %2656 = vst [vmem:[%s3598_s17 + $0xeb0] sm:$0xff] %v3266_v63  ;;  %vm1124_vm10 = vcmp.ge.f32.partialorder %v612_v0, 0.0  ;;  %v614_v3 = vld [vmem:[%s3581_s30 + $0xee0] sm:$0xff]  ;;  %v615_v4 = vld [vmem:[%s3581_s30 + $0xee8] sm:$0xff]  ;;  %2657 = vst [vmem:[%s3598_s17 + $0xeb8] sm:$0xff] %v3267_v2  ;;  %v3268_v5 = vsel %vm1122_vm8, 1.0, %v3466_v6 }
 0x172   : > { %v3269_v7 = vsel %vm1123_vm9, 1.0, %v3466_v6  ;;  %v3270_v8 = vsel %vm1124_vm10, 1.0, %v3466_v6  ;;  %vm1125_vm11 = vcmp.ge.f32.partialorder %v613_v1, 0.0  ;;  %v616_v9 = vld [vmem:[%s3581_s30 + $0xef0] sm:$0xff]  ;;  %v617_v10 = vld [vmem:[%s3581_s30 + $0xef8] sm:$0xff]  ;;  %2658 = vst [vmem:[%s3598_s17 + $0xec0] sm:$0xff] %v3268_v5 }
 0x173   : > { %2659 = vst [vmem:[%s3598_s17 + $0xec8] sm:$0xff] %v3269_v7  ;;  %2660 = vst [vmem:[%s3598_s17 + $0xed0] sm:$0xff] %v3270_v8  ;;  %v3271_v11 = vsel %vm1125_vm11, 1.0, %v3466_v6  ;;  %vm1126_vm12 = vcmp.ge.f32.partialorder %v614_v3, 0.0  ;;  %vm1127_vm13 = vcmp.ge.f32.partialorder %v615_v4, 0.0  ;;  %vm1128_vm14 = vcmp.ge.f32.partialorder %v616_v9, 0.0 }
 0x174   : > { %v618_v12 = vld [vmem:[%s3581_s30 + $0xf00] sm:$0xff]  ;;  %v619_v13 = vld [vmem:[%s3581_s30 + $0xf08] sm:$0xff]  ;;  %2661 = vst [vmem:[%s3598_s17 + $0xed8] sm:$0xff] %v3271_v11  ;;  %v3272_v14 = vsel %vm1126_vm12, 1.0, %v3466_v6  ;;  %v3273_v15 = vsel %vm1127_vm13, 1.0, %v3466_v6  ;;  %v3274_v16 = vsel %vm1128_vm14, 1.0, %v3466_v6 }
 0x175   : > { %vm1129_vm15 = vcmp.ge.f32.partialorder %v617_v10, 0.0  ;;  %v620_v17 = vld [vmem:[%s3581_s30 + $0xf10] sm:$0xff]  ;;  %v621_v18 = vld [vmem:[%s3581_s30 + $0xf18] sm:$0xff]  ;;  %2662 = vst [vmem:[%s3598_s17 + $0xee0] sm:$0xff] %v3272_v14  ;;  %2663 = vst [vmem:[%s3598_s17 + $0xee8] sm:$0xff] %v3273_v15  ;;  %vm1130_vm0 = vcmp.ge.f32.partialorder %v618_v12, 0.0 }
 0x176   : > { %2664 = vst [vmem:[%s3598_s17 + $0xef0] sm:$0xff] %v3274_v16  ;;  %v3275_v19 = vsel %vm1129_vm15, 1.0, %v3466_v6  ;;  %vm1131_vm1 = vcmp.ge.f32.partialorder %v619_v13, 0.0  ;;  %vm1132_vm2 = vcmp.ge.f32.partialorder %v620_v17, 0.0  ;;  %v622_v20 = vld [vmem:[%s3581_s30 + $0xf20] sm:$0xff]  ;;  %v623_v21 = vld [vmem:[%s3581_s30 + $0xf28] sm:$0xff] }
 0x177   : > { %2665 = vst [vmem:[%s3598_s17 + $0xef8] sm:$0xff] %v3275_v19  ;;  %v3276_v22 = vsel %vm1130_vm0, 1.0, %v3466_v6  ;;  %v3277_v23 = vsel %vm1131_vm1, 1.0, %v3466_v6  ;;  %v3278_v24 = vsel %vm1132_vm2, 1.0, %v3466_v6  ;;  %vm1133_vm3 = vcmp.ge.f32.partialorder %v621_v18, 0.0  ;;  %v624_v25 = vld [vmem:[%s3581_s30 + $0xf30] sm:$0xff] }
 0x178   : > { %v625_v26 = vld [vmem:[%s3581_s30 + $0xf38] sm:$0xff]  ;;  %2666 = vst [vmem:[%s3598_s17 + $0xf00] sm:$0xff] %v3276_v22  ;;  %2667 = vst [vmem:[%s3598_s17 + $0xf08] sm:$0xff] %v3277_v23  ;;  %v3279_v27 = vsel %vm1133_vm3, 1.0, %v3466_v6  ;;  %vm1134_vm4 = vcmp.ge.f32.partialorder %v622_v20, 0.0  ;;  %vm1135_vm5 = vcmp.ge.f32.partialorder %v623_v21, 0.0 }
 0x179   : > { %2668 = vst [vmem:[%s3598_s17 + $0xf10] sm:$0xff] %v3278_v24  ;;  %vm1136_vm6 = vcmp.ge.f32.partialorder %v624_v25, 0.0  ;;  %v626_v28 = vld [vmem:[%s3581_s30 + $0xf40] sm:$0xff]  ;;  %v627_v29 = vld [vmem:[%s3581_s30 + $0xf48] sm:$0xff]  ;;  %2669 = vst [vmem:[%s3598_s17 + $0xf18] sm:$0xff] %v3279_v27  ;;  %v3280_v30 = vsel %vm1134_vm4, 1.0, %v3466_v6 }
 0x17a   : > { %v3281_v31 = vsel %vm1135_vm5, 1.0, %v3466_v6  ;;  %v3282_v32 = vsel %vm1136_vm6, 1.0, %v3466_v6  ;;  %vm1137_vm7 = vcmp.ge.f32.partialorder %v625_v26, 0.0  ;;  %v628_v33 = vld [vmem:[%s3581_s30 + $0xf50] sm:$0xff]  ;;  %v629_v34 = vld [vmem:[%s3581_s30 + $0xf58] sm:$0xff]  ;;  %2670 = vst [vmem:[%s3598_s17 + $0xf20] sm:$0xff] %v3280_v30 }
 0x17b   : > { %2671 = vst [vmem:[%s3598_s17 + $0xf28] sm:$0xff] %v3281_v31  ;;  %2672 = vst [vmem:[%s3598_s17 + $0xf30] sm:$0xff] %v3282_v32  ;;  %v3283_v35 = vsel %vm1137_vm7, 1.0, %v3466_v6  ;;  %vm1138_vm8 = vcmp.ge.f32.partialorder %v626_v28, 0.0  ;;  %vm1139_vm9 = vcmp.ge.f32.partialorder %v627_v29, 0.0  ;;  %vm1140_vm10 = vcmp.ge.f32.partialorder %v628_v33, 0.0 }
 0x17c   : > { %v630_v36 = vld [vmem:[%s3581_s30 + $0xf60] sm:$0xff]  ;;  %v631_v37 = vld [vmem:[%s3581_s30 + $0xf68] sm:$0xff]  ;;  %2673 = vst [vmem:[%s3598_s17 + $0xf38] sm:$0xff] %v3283_v35  ;;  %v3284_v38 = vsel %vm1138_vm8, 1.0, %v3466_v6  ;;  %v3285_v39 = vsel %vm1139_vm9, 1.0, %v3466_v6  ;;  %v3286_v40 = vsel %vm1140_vm10, 1.0, %v3466_v6 }
 0x17d   : > { %vm1141_vm11 = vcmp.ge.f32.partialorder %v629_v34, 0.0  ;;  %v632_v41 = vld [vmem:[%s3581_s30 + $0xf70] sm:$0xff]  ;;  %v633_v42 = vld [vmem:[%s3581_s30 + $0xf78] sm:$0xff]  ;;  %2674 = vst [vmem:[%s3598_s17 + $0xf40] sm:$0xff] %v3284_v38  ;;  %2675 = vst [vmem:[%s3598_s17 + $0xf48] sm:$0xff] %v3285_v39  ;;  %vm1142_vm12 = vcmp.ge.f32.partialorder %v630_v36, 0.0 }
 0x17e   : > { %2676 = vst [vmem:[%s3598_s17 + $0xf50] sm:$0xff] %v3286_v40  ;;  %v3287_v43 = vsel %vm1141_vm11, 1.0, %v3466_v6  ;;  %vm1143_vm13 = vcmp.ge.f32.partialorder %v631_v37, 0.0  ;;  %vm1144_vm14 = vcmp.ge.f32.partialorder %v632_v41, 0.0  ;;  %v634_v44 = vld [vmem:[%s3581_s30 + $0xf80] sm:$0xff]  ;;  %v635_v45 = vld [vmem:[%s3581_s30 + $0xf88] sm:$0xff] }
 0x17f   : > { %2677 = vst [vmem:[%s3598_s17 + $0xf58] sm:$0xff] %v3287_v43  ;;  %v3288_v46 = vsel %vm1142_vm12, 1.0, %v3466_v6  ;;  %v3289_v47 = vsel %vm1143_vm13, 1.0, %v3466_v6  ;;  %v3290_v48 = vsel %vm1144_vm14, 1.0, %v3466_v6  ;;  %vm1145_vm15 = vcmp.ge.f32.partialorder %v633_v42, 0.0  ;;  %v636_v49 = vld [vmem:[%s3581_s30 + $0xf90] sm:$0xff] }
 0x180   : > { %v637_v50 = vld [vmem:[%s3581_s30 + $0xf98] sm:$0xff]  ;;  %2678 = vst [vmem:[%s3598_s17 + $0xf60] sm:$0xff] %v3288_v46  ;;  %2679 = vst [vmem:[%s3598_s17 + $0xf68] sm:$0xff] %v3289_v47  ;;  %v3291_v51 = vsel %vm1145_vm15, 1.0, %v3466_v6  ;;  %vm1146_vm0 = vcmp.ge.f32.partialorder %v634_v44, 0.0  ;;  %vm1147_vm1 = vcmp.ge.f32.partialorder %v635_v45, 0.0 }
 0x181   : > { %2680 = vst [vmem:[%s3598_s17 + $0xf70] sm:$0xff] %v3290_v48  ;;  %vm1148_vm2 = vcmp.ge.f32.partialorder %v636_v49, 0.0  ;;  %v638_v52 = vld [vmem:[%s3581_s30 + $0xfa0] sm:$0xff]  ;;  %v639_v53 = vld [vmem:[%s3581_s30 + $0xfa8] sm:$0xff]  ;;  %2681 = vst [vmem:[%s3598_s17 + $0xf78] sm:$0xff] %v3291_v51  ;;  %v3292_v54 = vsel %vm1146_vm0, 1.0, %v3466_v6 }
 0x182   : > { %v3293_v55 = vsel %vm1147_vm1, 1.0, %v3466_v6  ;;  %v3294_v56 = vsel %vm1148_vm2, 1.0, %v3466_v6  ;;  %vm1149_vm3 = vcmp.ge.f32.partialorder %v637_v50, 0.0  ;;  %v640_v57 = vld [vmem:[%s3581_s30 + $0xfb0] sm:$0xff]  ;;  %v641_v58 = vld [vmem:[%s3581_s30 + $0xfb8] sm:$0xff]  ;;  %2682 = vst [vmem:[%s3598_s17 + $0xf80] sm:$0xff] %v3292_v54 }
 0x183   : > { %2683 = vst [vmem:[%s3598_s17 + $0xf88] sm:$0xff] %v3293_v55  ;;  %2684 = vst [vmem:[%s3598_s17 + $0xf90] sm:$0xff] %v3294_v56  ;;  %v3295_v59 = vsel %vm1149_vm3, 1.0, %v3466_v6  ;;  %vm1150_vm4 = vcmp.ge.f32.partialorder %v638_v52, 0.0  ;;  %vm1151_vm5 = vcmp.ge.f32.partialorder %v639_v53, 0.0  ;;  %vm1152_vm6 = vcmp.ge.f32.partialorder %v640_v57, 0.0 }
 0x184   : > { %v642_v60 = vld [vmem:[%s3581_s30 + $0xfc0] sm:$0xff]  ;;  %v643_v61 = vld [vmem:[%s3581_s30 + $0xfc8] sm:$0xff]  ;;  %2685 = vst [vmem:[%s3598_s17 + $0xf98] sm:$0xff] %v3295_v59  ;;  %v3296_v62 = vsel %vm1150_vm4, 1.0, %v3466_v6  ;;  %v3297_v63 = vsel %vm1151_vm5, 1.0, %v3466_v6  ;;  %v3298_v0 = vsel %vm1152_vm6, 1.0, %v3466_v6 }
 0x185   : > { %vm1153_vm7 = vcmp.ge.f32.partialorder %v641_v58, 0.0  ;;  %v644_v1 = vld [vmem:[%s3581_s30 + $0xfd0] sm:$0xff]  ;;  %v645_v2 = vld [vmem:[%s3581_s30 + $0xfd8] sm:$0xff]  ;;  %2686 = vst [vmem:[%s3598_s17 + $0xfa0] sm:$0xff] %v3296_v62  ;;  %2687 = vst [vmem:[%s3598_s17 + $0xfa8] sm:$0xff] %v3297_v63  ;;  %vm1154_vm8 = vcmp.ge.f32.partialorder %v642_v60, 0.0 }
 0x186   : > { %2688 = vst [vmem:[%s3598_s17 + $0xfb0] sm:$0xff] %v3298_v0  ;;  %v3299_v3 = vsel %vm1153_vm7, 1.0, %v3466_v6  ;;  %vm1155_vm9 = vcmp.ge.f32.partialorder %v643_v61, 0.0  ;;  %vm1156_vm10 = vcmp.ge.f32.partialorder %v644_v1, 0.0  ;;  %v646_v4 = vld [vmem:[%s3581_s30 + $0xfe0] sm:$0xff]  ;;  %v647_v5 = vld [vmem:[%s3581_s30 + $0xfe8] sm:$0xff] }
 0x187   : > { %2689 = vst [vmem:[%s3598_s17 + $0xfb8] sm:$0xff] %v3299_v3  ;;  %v3300_v7 = vsel %vm1154_vm8, 1.0, %v3466_v6  ;;  %v3301_v8 = vsel %vm1155_vm9, 1.0, %v3466_v6  ;;  %v3302_v9 = vsel %vm1156_vm10, 1.0, %v3466_v6  ;;  %vm1157_vm11 = vcmp.ge.f32.partialorder %v645_v2, 0.0  ;;  %v648_v10 = vld [vmem:[%s3581_s30 + $0xff0] sm:$0xff] }
 0x188   : > { %v649_v11 = vld [vmem:[%s3581_s30 + $0xff8] sm:$0xff]  ;;  %2690 = vst [vmem:[%s3598_s17 + $0xfc0] sm:$0xff] %v3300_v7  ;;  %2691 = vst [vmem:[%s3598_s17 + $0xfc8] sm:$0xff] %v3301_v8  ;;  %v3303_v12 = vsel %vm1157_vm11, 1.0, %v3466_v6  ;;  %vm1158_vm12 = vcmp.ge.f32.partialorder %v646_v4, 0.0  ;;  %vm1159_vm13 = vcmp.ge.f32.partialorder %v647_v5, 0.0 }
 0x189   : > { %2692 = vst [vmem:[%s3598_s17 + $0xfd0] sm:$0xff] %v3302_v9  ;;  %vm1160_vm14 = vcmp.ge.f32.partialorder %v648_v10, 0.0  ;;  %2693 = vst [vmem:[%s3598_s17 + $0xfd8] sm:$0xff] %v3303_v12  ;;  %v3304_v13 = vsel %vm1158_vm12, 1.0, %v3466_v6  ;;  %v3305_v14 = vsel %vm1159_vm13, 1.0, %v3466_v6  ;;  %vm1161_vm15 = vcmp.ge.f32.partialorder %v649_v11, 0.0 }
 0x18a   : > { %v3306_v15 = vsel %vm1160_vm14, 1.0, %v3466_v6  ;;  %2694 = vst [vmem:[%s3598_s17 + $0xfe0] sm:$0xff] %v3304_v13  ;;  %2695 = vst [vmem:[%s3598_s17 + $0xfe8] sm:$0xff] %v3305_v14  ;;  %v3307_v16 = vsel %vm1161_vm15, 1.0, %v3466_v6  ;;  %s2699_s10 = scalar_lea.sflag [#allocation4], %s3577_s23  ;;  %s3397_s3 = scalar_lea.vmem %s5131_s2, 65536 }
 0x18b   : > { %2696 = vst [vmem:[%s3598_s17 + $0xff0] sm:$0xff] %v3306_v15  ;;  %2697 = vst [vmem:[%s3598_s17 + $0xff8] sm:$0xff] %v3307_v16  ;;  %p3398_p11 = scmp.ne.s32.totalorder %s5131_s2, %s3397_s3  ;;  %p5185_p12 = scmp.ne.s32.totalorder %s5181_s18, 0 }
 0x18c   : > { %s3467_s4 = smov [#allocation5]  }
 0x18d   : > { %p3399_p13 = pnand %p3398_p11, %p5185_p12  ;;  %s3401_s5 = sshll.u32 %s3467_s4, 4  ;;  %s3402_s5 = int_to_ptr.vmem [resolvable:$false] %s3401_s5 }
 0x18e   : > { %s3403_s11 = scalar_lea.vmem %s3402_s5, 131072  ;;  %p3404_p5 = scmp.lt.s32.totalorder %s5131_s2, %s3402_s5 }
 0x18f   : > { %p3400_p4 = pneg %p3399_p13  ;;  %p3405_p7 = scmp.lt.s32.totalorder %s3403_s11, %s3397_s3 }
 0x191   : > { %p3406_p8 = por %p3405_p7, %p3404_p5 }
 0x193   : > { %p3407_p10 = pnand %p3406_p8, %p3400_p4 }
 0x195   : > { %3410 = shalt.err (!%p3407_p10)
}
 0x196   : > { %s3411_s13 = scalar_lea.hbm %s5124_s29, 65536  ;;  %s3415_s20 = scalar_lea.hbm %s5176_s1, 131072 }
 0x197   : > { %p3412_p0 = scmp.ne.s32.totalorder %s5124_s29, %s3411_s13  ;;  %p3416_p1 = scmp.lt.s32.totalorder %s5124_s29, %s5176_s1 }
 0x198   : > { %p3417_p3 = scmp.lt.s32.totalorder %s3415_s20, %s3411_s13 }
 0x199   : > { %p3413_p2 = pnand %p3412_p0, %p5185_p12 }
 0x19a   : > { %p3418_p6 = por %p3417_p3, %p3416_p1 }
 0x19b   : > { %p3414_p9 = pneg %p3413_p2 }
 0x19d   : > { %p3419_p11 = pnand %p3418_p6, %p3414_p9 }
 0x19f   : > { %3422 = shalt.err (!%p3419_p11)
}
 0x1a0   : > { %s3468_s24 = smov 1024   ;;  %s3469_s26 = smov 64  }
 0x1a1   : > { %3320 = dma.vmem_to_hbm [thread:$0]  (%p5185_p12), %s5131_s2, 65536, %s5124_s29, %s2699_s10, %s3468_s24, %s3468_s24, %s3469_s26  }
 0x1a2 PF: > { %s2728_s30 = sand.u32 1, %s3449_s6   ;;  %p5186_p13 = scmp.ne.s32.totalorder %s5182_s19, 0 }
 0x1a3   : > { %p5187_p4 = scmp.ge.s32.totalorder %s3461_s9, 2  ;;  %s2729_s17 = scalar_lea.sflag [#allocation4], %s2728_s30 }
 0x1a5   : > { %p3327_p5 = pnand %p5187_p4, %p5186_p13 }
 0x1a7   : > { %p3328_p7 = pneg %p3327_p5 }
 0x1a9   : > { %3444 = dma.done.wait (%p3328_p7), %s2729_s17, 65536  }
 0x1aa   : > { %3446 = vsyncadd (%p3328_p7), %s2729_s17, 4294901760  ;;  %p14_p8 = scmp.ge.s32.totalorder %s3505_s12, 4   ;;  %s5188_s6 = smov %s3453_s7 }
 0x1ab   : > { %s5189_s7 = smov %s3457_s8  ;;  %s5190_s8 = smov %s3517_s15 }
 0x1ac   : > { %s5191_s9 = smov %s3505_s12  ;;  %16 = sbr.rel (!%p14_p8) target bundleno = 5 (0x5), region = 69 }
 0x1b1   :  { %2734 = vsyncpa [#allocation3], 1 }
 0x1b2   :  { %2736 = vsyncpa [#allocation3 + $0x1], 1 }
 0x1b3   :  { %2737 = vsyncpa [#allocation4], 1 }
 0x1b4   :  { %2739 = vsyncpa [#allocation4 + $0x1], 1 }

</bundles_post_ra>
